<compile_context>
chip_gen: v7x
topology: tpu7x:2x2x1
jax: 0.10.0
libtpu: 0.0.40
codegen_flags: <defaults>
</compile_context>

<pallas_src>
import functools

import jax
import jax.numpy as jnp
from jax.experimental import pallas as pl
from jax.experimental.pallas import tpu as pltpu


# -----------------------------------------------------------------------------
# Fused kernel
# -----------------------------------------------------------------------------
def fused_net_kernel(patchesT_ref, y_ref, wcT_ref, bcT_ref, w1c_hbm_ref, w1y_ref,
                     b1_ref, w2_ref, b2_ref, w3_ref, b3_ref, wo_ref, bo_ref,
                     o_ref, lhs_ref, w1c_vmem, w1_sem, *, B, HW, Cout):
    # Kick off the dominant fc1-weight DMA immediately so it overlaps the conv
    # matmul + flatten instead of sitting in the (serial) input prologue.
    w1_copy = pltpu.make_async_copy(w1c_hbm_ref, w1c_vmem, w1_sem)
    w1_copy.start()

    # conv1 as ONE im2col matmul (bf16 x bf16 -> f32 accumulate), channel-major
    # lane-dense output: convT[c, b*HW + p].
    convT = jnp.dot(wcT_ref[...], patchesT_ref[...],
                    preferred_element_type=jnp.float32)            # (Cout, B*HW)
    convT = jnp.maximum(convT + bcT_ref[...], 0.0)

    # Flatten to torch NCHW order (row b, column c*HW + p) with 24 lane-aligned
    # single-row stores; this is the only inter-layer VMEM round trip.
    for c in range(Cout):
        for b in range(B):
            lhs_ref[b:b + 1, c * HW:(c + 1) * HW] = \
                convT[c:c + 1, b * HW:(b + 1) * HW]
    lhs = lhs_ref[...].astype(jnp.bfloat16)                        # (B, Cout*HW)

    # Small y contribution of fc1 can be computed before the DMA wait.
    h = jnp.dot(y_ref[...], w1y_ref[...], preferred_element_type=jnp.float32)

    # fc1 as ONE (B, Cout*HW) @ (Cout*HW, 258) matmul (was 24 chained M=1 dots).
    w1_copy.wait()
    h = h + jnp.dot(lhs, w1c_vmem[...], preferred_element_type=jnp.float32)
    h = jnp.maximum(h + b1_ref[...], 0.0)

    # fc2 / fc3 / out: bf16 weights & activations on the MXU, f32 accumulate,
    # bias add + ReLU in f32; activations stay in registers.
    h = jnp.maximum(jnp.dot(h.astype(jnp.bfloat16), w2_ref[...],
                            preferred_element_type=jnp.float32) + b2_ref[...], 0.0)
    h = jnp.maximum(jnp.dot(h.astype(jnp.bfloat16), w3_ref[...],
                            preferred_element_type=jnp.float32) + b3_ref[...], 0.0)
    o_ref[...] = jnp.dot(h.astype(jnp.bfloat16), wo_ref[...],
                         preferred_element_type=jnp.float32) + bo_ref[...]


# -----------------------------------------------------------------------------
# Parameters: torch-native layout init + one-time kernel-ready preprocessing
# -----------------------------------------------------------------------------
def init_torch_params(key, W, H, num_actions, feature_len):
    """Parameters in the PyTorch module's native layout (f32)."""
    def uniform(k, shape, fan_in):
        bound = 1.0 / jnp.sqrt(jnp.float32(fan_in))
        return jax.random.uniform(k, shape, jnp.float32, -bound, bound)

    cin, cout, dh = 4, 12, 258
    d_in = cout * W * H + feature_len
    ks = jax.random.split(key, 10)
    return {
        "conv_w": uniform(ks[0], (cout, cin, 3, 3), cin * 9),
        "conv_b": uniform(ks[1], (cout,), cin * 9),
        "fc1_w": uniform(ks[2], (dh, d_in), d_in),
        "fc1_b": uniform(ks[3], (dh,), d_in),
        "fc2_w": uniform(ks[4], (dh, dh), dh),
        "fc2_b": uniform(ks[5], (dh,), dh),
        "fc3_w": uniform(ks[6], (dh, dh), dh),
        "fc3_b": uniform(ks[7], (dh,), dh),
        "out_w": uniform(ks[8], (num_actions, dh), dh),
        "out_b": uniform(ks[9], (num_actions,), dh),
    }


def prepare_params(p, W, H):
    """One-time conversion to kernel-ready layouts/dtypes (outside jit)."""
    cout, cin = p["conv_w"].shape[0], p["conv_w"].shape[1]
    hw = W * H
    dh = p["fc1_w"].shape[0]
    # conv weight -> (Cout, 9*Cin); column index = (kh*3+kw)*Cin + ci, matching
    # the wrapper-side im2col column order.
    wcT = jnp.transpose(p["conv_w"], (0, 2, 3, 1)).reshape(cout, 9 * cin)
    # fc1 weight split: conv part keeps the torch NCHW flatten order (c*HW + p),
    # which is exactly the order the kernel writes into lhs_ref.
    w1_t = p["fc1_w"].T                                   # (Cout*HW + F, 258)
    return {
        "wcT": wcT.astype(jnp.bfloat16),
        "bcT": p["conv_b"].reshape(cout, 1).astype(jnp.float32),
        "w1c": w1_t[:cout * hw].astype(jnp.bfloat16),     # (Cout*HW, 258)
        "w1y": w1_t[cout * hw:].astype(jnp.bfloat16),     # (F, 258)
        "b1": p["fc1_b"].reshape(1, dh).astype(jnp.float32),
        "w2": p["fc2_w"].T.astype(jnp.bfloat16),
        "b2": p["fc2_b"].reshape(1, dh).astype(jnp.float32),
        "w3": p["fc3_w"].T.astype(jnp.bfloat16),
        "b3": p["fc3_b"].reshape(1, dh).astype(jnp.float32),
        "wo": p["out_w"].T.astype(jnp.bfloat16),
        "bo": p["out_b"].reshape(1, -1).astype(jnp.float32),
    }


# -----------------------------------------------------------------------------
# Forward
# -----------------------------------------------------------------------------
@jax.jit
def net_forward(kp, x, y):
    B, Cin, H, W = x.shape
    HW = H * W
    Cout = kp["wcT"].shape[0]
    DH = kp["b1"].shape[1]
    A = kp["bo"].shape[1]

    # Per-call preprocessing (one small fused XLA op): NCHW -> NHWC, 1px zero
    # halo, im2col into a lane-dense (9*Cin, B*HW) bf16 patch matrix.
    x_pad = jnp.pad(jnp.transpose(x, (0, 2, 3, 1)).astype(jnp.float32),
                    ((0, 0), (1, 1), (1, 1), (0, 0)))
    patches = jnp.concatenate(
        [x_pad[:, kh:kh + H, kw:kw + W, :].reshape(B * HW, Cin)
         for kh in range(3) for kw in range(3)], axis=1)           # (B*HW, 9*Cin)
    patchesT = patches.T.astype(jnp.bfloat16)                       # (9*Cin, B*HW)
    y_bf = y.astype(jnp.bfloat16)

    vmem = pl.BlockSpec(memory_space=pltpu.MemorySpace.VMEM)
    hbm = pl.BlockSpec(memory_space=pl.ANY)   # fc1 weight: manual DMA in-kernel
    kernel = functools.partial(fused_net_kernel, B=B, HW=HW, Cout=Cout)
    return pl.pallas_call(
        kernel,
        out_shape=jax.ShapeDtypeStruct((B, A), jnp.float32),
        in_specs=[vmem, vmem, vmem, vmem, hbm, vmem, vmem,
                  vmem, vmem, vmem, vmem, vmem, vmem],
        out_specs=vmem,
        scratch_shapes=[pltpu.VMEM((B, Cout * HW), jnp.float32),     # flattened conv
                        pltpu.VMEM((Cout * HW, DH), jnp.bfloat16),   # fc1 weight landing buf
                        pltpu.SemaphoreType.DMA(())],
    )(patchesT, y_bf, kp["wcT"], kp["bcT"], kp["w1c"], kp["w1y"], kp["b1"],
      kp["w2"], kp["b2"], kp["w3"], kp["b3"], kp["wo"], kp["bo"])


# -----------------------------------------------------------------------------
# Pure-JAX reference (torch semantics with the same bf16 operand rounding the
# kernel uses, f32 accumulation) — justifies the tolerance below.
# -----------------------------------------------------------------------------
def reference_forward(p, x, y):
    rb = lambda a: a.astype(jnp.bfloat16).astype(jnp.float32)
    conv = jax.lax.conv_general_dilated(
        rb(x), rb(p["conv_w"]), window_strides=(1, 1),
        padding=((1, 1), (1, 1)), dimension_numbers=("NCHW", "OIHW", "NCHW"))
    conv = jnp.maximum(conv + p["conv_b"][None, :, None, None], 0.0)
    z = jnp.concatenate([conv.reshape(conv.shape[0], -1),
                         y.astype(jnp.float32)], axis=1)
    h = jnp.maximum(rb(z) @ rb(p["fc1_w"]).T + p["fc1_b"], 0.0)
    h = jnp.maximum(rb(h) @ rb(p["fc2_w"]).T + p["fc2_b"], 0.0)
    h = jnp.maximum(rb(h) @ rb(p["fc3_w"]).T + p["fc3_b"], 0.0)
    return rb(h) @ rb(p["out_w"]).T + p["out_b"]


if __name__ == "__main__":
    # Net(W=16, H=16, NUM_ACTIONS=6, feature_len=8), batch=2
    B, Cin, H, W = 2, 4, 16, 16
    NUM_ACTIONS, FEATURE_LEN = 6, 8

    key = jax.random.PRNGKey(0)
    k_params, k_x, k_y = jax.random.split(key, 3)
    torch_params = init_torch_params(k_params, W, H, NUM_ACTIONS, FEATURE_LEN)
    kernel_params = prepare_params(torch_params, W, H)   # one-time prep, outside jit

    x = jax.random.normal(k_x, (B, Cin, H, W), jnp.float32)
    y = jax.random.normal(k_y, (B, FEATURE_LEN), jnp.float32)

    out = jax.block_until_ready(net_forward(kernel_params, x, y))
    assert out.shape == (B, NUM_ACTIONS), out.shape

    ref = jax.block_until_ready(reference_forward(torch_params, x, y))
    max_err = float(jnp.max(jnp.abs(out - ref)))
    # Reference mirrors the kernel's bf16-operand / f32-accumulate precision, so
    # only accumulation-order noise remains; tolerance kept generous.
    tol = 1e-2 + 2e-2 * float(jnp.max(jnp.abs(ref)))
    assert max_err <= tol, (max_err, tol)

    print("KERNEL_OK")
</pallas_src>

<mosaic_0001>
module attributes {stable_mosaic.version = 11 : i64} {
  func.func @fused_net_kernel(%arg0: memref<36x512xbf16, #tpu.memory_space<vmem>>, %arg1: memref<2x8xbf16, #tpu.memory_space<vmem>>, %arg2: memref<12x36xbf16, #tpu.memory_space<vmem>>, %arg3: memref<12x1xf32, #tpu.memory_space<vmem>>, %arg4: memref<3072x258xbf16, #tpu.memory_space<any>>, %arg5: memref<8x258xbf16, #tpu.memory_space<vmem>>, %arg6: memref<1x258xf32, #tpu.memory_space<vmem>>, %arg7: memref<258x258xbf16, #tpu.memory_space<vmem>>, %arg8: memref<1x258xf32, #tpu.memory_space<vmem>>, %arg9: memref<258x258xbf16, #tpu.memory_space<vmem>>, %arg10: memref<1x258xf32, #tpu.memory_space<vmem>>, %arg11: memref<258x6xbf16, #tpu.memory_space<vmem>>, %arg12: memref<1x6xf32, #tpu.memory_space<vmem>>, %arg13: memref<2x6xf32, #tpu.memory_space<vmem>>, %arg14: memref<2x3072xf32, #tpu.memory_space<vmem>>, %arg15: memref<3072x258xbf16, #tpu.memory_space<vmem>>, %arg16: memref<!tpu.dma_semaphore, #tpu.memory_space<semaphore_mem>>) attributes {dimension_semantics = [], scalar_prefetch = 0 : i64, scratch_operands = 3 : i64, tpu.core_type = #tpu.core_type<tc>} {
    tpu.enqueue_dma source(%arg4 : memref<3072x258xbf16, #tpu.memory_space<any>>) target(%arg15 : memref<3072x258xbf16, #tpu.memory_space<vmem>>) target_semaphore(%arg16 : memref<!tpu.dma_semaphore, #tpu.memory_space<semaphore_mem>>)
    %c0 = arith.constant 0 : index
    %c0_0 = arith.constant 0 : index
    %0 = vector.load %arg2[%c0, %c0_0] : memref<12x36xbf16, #tpu.memory_space<vmem>>, vector<12x36xbf16>
    %c0_1 = arith.constant 0 : index
    %c0_2 = arith.constant 0 : index
    %1 = vector.load %arg0[%c0_1, %c0_2] : memref<36x512xbf16, #tpu.memory_space<vmem>>, vector<36x512xbf16>
    %cst = arith.constant dense<0.000000e+00> : vector<12x512xf32>
    %2 = tpu.matmul %0, %1, %cst {dimension_numbers = #tpu.dot_dimension_numbers<[1], [0], [0], [1], [0, 0, 1, 1], [], []>} : vector<12x36xbf16>, vector<36x512xbf16>, vector<12x512xf32> -> vector<12x512xf32>
    %c0_3 = arith.constant 0 : index
    %c0_4 = arith.constant 0 : index
    %3 = vector.load %arg3[%c0_3, %c0_4] : memref<12x1xf32, #tpu.memory_space<vmem>>, vector<12x1xf32>
    %4 = vector.broadcast %3 : vector<12x1xf32> to vector<12x512xf32>
    %5 = arith.addf %2, %4 : vector<12x512xf32>
    %cst_5 = arith.constant 0.000000e+00 : f32
    %6 = vector.broadcast %cst_5 : f32 to vector<12x512xf32>
    %7 = arith.maximumf %5, %6 : vector<12x512xf32>
    %8 = vector.extract_strided_slice %7 {offsets = [0, 0], sizes = [1, 256], strides = [1, 1]} : vector<12x512xf32> to vector<1x256xf32>
    %c0_6 = arith.constant 0 : index
    %c0_7 = arith.constant 0 : index
    %9 = vector.load %arg14[%c0_6, %c0_7] : memref<2x3072xf32, #tpu.memory_space<vmem>>, vector<1x256xf32>
    tpu.vector_store %arg14[%c0_6, %c0_7], %8 {strides = array<i32>} : memref<2x3072xf32, #tpu.memory_space<vmem>>, vector<1x256xf32>,
    %10 = vector.extract_strided_slice %7 {offsets = [0, 256], sizes = [1, 256], strides = [1, 1]} : vector<12x512xf32> to vector<1x256xf32>
    %c1 = arith.constant 1 : index
    %c0_8 = arith.constant 0 : index
    %11 = vector.load %arg14[%c1, %c0_8] : memref<2x3072xf32, #tpu.memory_space<vmem>>, vector<1x256xf32>
    tpu.vector_store %arg14[%c1, %c0_8], %10 {strides = array<i32>} : memref<2x3072xf32, #tpu.memory_space<vmem>>, vector<1x256xf32>,
    %12 = vector.extract_strided_slice %7 {offsets = [1, 0], sizes = [1, 256], strides = [1, 1]} : vector<12x512xf32> to vector<1x256xf32>
    %c0_9 = arith.constant 0 : index
    %c256 = arith.constant 256 : index
    %13 = vector.load %arg14[%c0_9, %c256] : memref<2x3072xf32, #tpu.memory_space<vmem>>, vector<1x256xf32>
    tpu.vector_store %arg14[%c0_9, %c256], %12 {strides = array<i32>} : memref<2x3072xf32, #tpu.memory_space<vmem>>, vector<1x256xf32>,
    %14 = vector.extract_strided_slice %7 {offsets = [1, 256], sizes = [1, 256], strides = [1, 1]} : vector<12x512xf32> to vector<1x256xf32>
    %c1_10 = arith.constant 1 : index
    %c256_11 = arith.constant 256 : index
    %15 = vector.load %arg14[%c1_10, %c256_11] : memref<2x3072xf32, #tpu.memory_space<vmem>>, vector<1x256xf32>
    tpu.vector_store %arg14[%c1_10, %c256_11], %14 {strides = array<i32>} : memref<2x3072xf32, #tpu.memory_space<vmem>>, vector<1x256xf32>,
    %16 = vector.extract_strided_slice %7 {offsets = [2, 0], sizes = [1, 256], strides = [1, 1]} : vector<12x512xf32> to vector<1x256xf32>
    %c0_12 = arith.constant 0 : index
    %c512 = arith.constant 512 : index
    %17 = vector.load %arg14[%c0_12, %c512] : memref<2x3072xf32, #tpu.memory_space<vmem>>, vector<1x256xf32>
    tpu.vector_store %arg14[%c0_12, %c512], %16 {strides = array<i32>} : memref<2x3072xf32, #tpu.memory_space<vmem>>, vector<1x256xf32>,
    %18 = vector.extract_strided_slice %7 {offsets = [2, 256], sizes = [1, 256], strides = [1, 1]} : vector<12x512xf32> to vector<1x256xf32>
    %c1_13 = arith.constant 1 : index
    %c512_14 = arith.constant 512 : index
    %19 = vector.load %arg14[%c1_13, %c512_14] : memref<2x3072xf32, #tpu.memory_space<vmem>>, vector<1x256xf32>
    tpu.vector_store %arg14[%c1_13, %c512_14], %18 {strides = array<i32>} : memref<2x3072xf32, #tpu.memory_space<vmem>>, vector<1x256xf32>,
    %20 = vector.extract_strided_slice %7 {offsets = [3, 0], sizes = [1, 256], strides = [1, 1]} : vector<12x512xf32> to vector<1x256xf32>
    %c0_15 = arith.constant 0 : index
    %c768 = arith.constant 768 : index
    %21 = vector.load %arg14[%c0_15, %c768] : memref<2x3072xf32, #tpu.memory_space<vmem>>, vector<1x256xf32>
    tpu.vector_store %arg14[%c0_15, %c768], %20 {strides = array<i32>} : memref<2x3072xf32, #tpu.memory_space<vmem>>, vector<1x256xf32>,
    %22 = vector.extract_strided_slice %7 {offsets = [3, 256], sizes = [1, 256], strides = [1, 1]} : vector<12x512xf32> to vector<1x256xf32>
    %c1_16 = arith.constant 1 : index
    %c768_17 = arith.constant 768 : index
    %23 = vector.load %arg14[%c1_16, %c768_17] : memref<2x3072xf32, #tpu.memory_space<vmem>>, vector<1x256xf32>
    tpu.vector_store %arg14[%c1_16, %c768_17], %22 {strides = array<i32>} : memref<2x3072xf32, #tpu.memory_space<vmem>>, vector<1x256xf32>,
    %24 = vector.extract_strided_slice %7 {offsets = [4, 0], sizes = [1, 256], strides = [1, 1]} : vector<12x512xf32> to vector<1x256xf32>
    %c0_18 = arith.constant 0 : index
    %c1024 = arith.constant 1024 : index
    %25 = vector.load %arg14[%c0_18, %c1024] : memref<2x3072xf32, #tpu.memory_space<vmem>>, vector<1x256xf32>
    tpu.vector_store %arg14[%c0_18, %c1024], %24 {strides = array<i32>} : memref<2x3072xf32, #tpu.memory_space<vmem>>, vector<1x256xf32>,
    %26 = vector.extract_strided_slice %7 {offsets = [4, 256], sizes = [1, 256], strides = [1, 1]} : vector<12x512xf32> to vector<1x256xf32>
    %c1_19 = arith.constant 1 : index
    %c1024_20 = arith.constant 1024 : index
    %27 = vector.load %arg14[%c1_19, %c1024_20] : memref<2x3072xf32, #tpu.memory_space<vmem>>, vector<1x256xf32>
    tpu.vector_store %arg14[%c1_19, %c1024_20], %26 {strides = array<i32>} : memref<2x3072xf32, #tpu.memory_space<vmem>>, vector<1x256xf32>,
    %28 = vector.extract_strided_slice %7 {offsets = [5, 0], sizes = [1, 256], strides = [1, 1]} : vector<12x512xf32> to vector<1x256xf32>
    %c0_21 = arith.constant 0 : index
    %c1280 = arith.constant 1280 : index
    %29 = vector.load %arg14[%c0_21, %c1280] : memref<2x3072xf32, #tpu.memory_space<vmem>>, vector<1x256xf32>
    tpu.vector_store %arg14[%c0_21, %c1280], %28 {strides = array<i32>} : memref<2x3072xf32, #tpu.memory_space<vmem>>, vector<1x256xf32>,
    %30 = vector.extract_strided_slice %7 {offsets = [5, 256], sizes = [1, 256], strides = [1, 1]} : vector<12x512xf32> to vector<1x256xf32>
    %c1_22 = arith.constant 1 : index
    %c1280_23 = arith.constant 1280 : index
    %31 = vector.load %arg14[%c1_22, %c1280_23] : memref<2x3072xf32, #tpu.memory_space<vmem>>, vector<1x256xf32>
    tpu.vector_store %arg14[%c1_22, %c1280_23], %30 {strides = array<i32>} : memref<2x3072xf32, #tpu.memory_space<vmem>>, vector<1x256xf32>,
    %32 = vector.extract_strided_slice %7 {offsets = [6, 0], sizes = [1, 256], strides = [1, 1]} : vector<12x512xf32> to vector<1x256xf32>
    %c0_24 = arith.constant 0 : index
    %c1536 = arith.constant 1536 : index
    %33 = vector.load %arg14[%c0_24, %c1536] : memref<2x3072xf32, #tpu.memory_space<vmem>>, vector<1x256xf32>
    tpu.vector_store %arg14[%c0_24, %c1536], %32 {strides = array<i32>} : memref<2x3072xf32, #tpu.memory_space<vmem>>, vector<1x256xf32>,
    %34 = vector.extract_strided_slice %7 {offsets = [6, 256], sizes = [1, 256], strides = [1, 1]} : vector<12x512xf32> to vector<1x256xf32>
    %c1_25 = arith.constant 1 : index
    %c1536_26 = arith.constant 1536 : index
    %35 = vector.load %arg14[%c1_25, %c1536_26] : memref<2x3072xf32, #tpu.memory_space<vmem>>, vector<1x256xf32>
    tpu.vector_store %arg14[%c1_25, %c1536_26], %34 {strides = array<i32>} : memref<2x3072xf32, #tpu.memory_space<vmem>>, vector<1x256xf32>,
    %36 = vector.extract_strided_slice %7 {offsets = [7, 0], sizes = [1, 256], strides = [1, 1]} : vector<12x512xf32> to vector<1x256xf32>
    %c0_27 = arith.constant 0 : index
    %c1792 = arith.constant 1792 : index
    %37 = vector.load %arg14[%c0_27, %c1792] : memref<2x3072xf32, #tpu.memory_space<vmem>>, vector<1x256xf32>
    tpu.vector_store %arg14[%c0_27, %c1792], %36 {strides = array<i32>} : memref<2x3072xf32, #tpu.memory_space<vmem>>, vector<1x256xf32>,
    %38 = vector.extract_strided_slice %7 {offsets = [7, 256], sizes = [1, 256], strides = [1, 1]} : vector<12x512xf32> to vector<1x256xf32>
    %c1_28 = arith.constant 1 : index
    %c1792_29 = arith.constant 1792 : index
    %39 = vector.load %arg14[%c1_28, %c1792_29] : memref<2x3072xf32, #tpu.memory_space<vmem>>, vector<1x256xf32>
    tpu.vector_store %arg14[%c1_28, %c1792_29], %38 {strides = array<i32>} : memref<2x3072xf32, #tpu.memory_space<vmem>>, vector<1x256xf32>,
    %40 = vector.extract_strided_slice %7 {offsets = [8, 0], sizes = [1, 256], strides = [1, 1]} : vector<12x512xf32> to vector<1x256xf32>
    %c0_30 = arith.constant 0 : index
    %c2048 = arith.constant 2048 : index
    %41 = vector.load %arg14[%c0_30, %c2048] : memref<2x3072xf32, #tpu.memory_space<vmem>>, vector<1x256xf32>
    tpu.vector_store %arg14[%c0_30, %c2048], %40 {strides = array<i32>} : memref<2x3072xf32, #tpu.memory_space<vmem>>, vector<1x256xf32>,
    %42 = vector.extract_strided_slice %7 {offsets = [8, 256], sizes = [1, 256], strides = [1, 1]} : vector<12x512xf32> to vector<1x256xf32>
    %c1_31 = arith.constant 1 : index
    %c2048_32 = arith.constant 2048 : index
    %43 = vector.load %arg14[%c1_31, %c2048_32] : memref<2x3072xf32, #tpu.memory_space<vmem>>, vector<1x256xf32>
    tpu.vector_store %arg14[%c1_31, %c2048_32], %42 {strides = array<i32>} : memref<2x3072xf32, #tpu.memory_space<vmem>>, vector<1x256xf32>,
    %44 = vector.extract_strided_slice %7 {offsets = [9, 0], sizes = [1, 256], strides = [1, 1]} : vector<12x512xf32> to vector<1x256xf32>
    %c0_33 = arith.constant 0 : index
    %c2304 = arith.constant 2304 : index
    %45 = vector.load %arg14[%c0_33, %c2304] : memref<2x3072xf32, #tpu.memory_space<vmem>>, vector<1x256xf32>
    tpu.vector_store %arg14[%c0_33, %c2304], %44 {strides = array<i32>} : memref<2x3072xf32, #tpu.memory_space<vmem>>, vector<1x256xf32>,
    %46 = vector.extract_strided_slice %7 {offsets = [9, 256], sizes = [1, 256], strides = [1, 1]} : vector<12x512xf32> to vector<1x256xf32>
    %c1_34 = arith.constant 1 : index
    %c2304_35 = arith.constant 2304 : index
    %47 = vector.load %arg14[%c1_34, %c2304_35] : memref<2x3072xf32, #tpu.memory_space<vmem>>, vector<1x256xf32>
    tpu.vector_store %arg14[%c1_34, %c2304_35], %46 {strides = array<i32>} : memref<2x3072xf32, #tpu.memory_space<vmem>>, vector<1x256xf32>,
    %48 = vector.extract_strided_slice %7 {offsets = [10, 0], sizes = [1, 256], strides = [1, 1]} : vector<12x512xf32> to vector<1x256xf32>
    %c0_36 = arith.constant 0 : index
    %c2560 = arith.constant 2560 : index
    %49 = vector.load %arg14[%c0_36, %c2560] : memref<2x3072xf32, #tpu.memory_space<vmem>>, vector<1x256xf32>
    tpu.vector_store %arg14[%c0_36, %c2560], %48 {strides = array<i32>} : memref<2x3072xf32, #tpu.memory_space<vmem>>, vector<1x256xf32>,
    %50 = vector.extract_strided_slice %7 {offsets = [10, 256], sizes = [1, 256], strides = [1, 1]} : vector<12x512xf32> to vector<1x256xf32>
    %c1_37 = arith.constant 1 : index
    %c2560_38 = arith.constant 2560 : index
    %51 = vector.load %arg14[%c1_37, %c2560_38] : memref<2x3072xf32, #tpu.memory_space<vmem>>, vector<1x256xf32>
    tpu.vector_store %arg14[%c1_37, %c2560_38], %50 {strides = array<i32>} : memref<2x3072xf32, #tpu.memory_space<vmem>>, vector<1x256xf32>,
    %52 = vector.extract_strided_slice %7 {offsets = [11, 0], sizes = [1, 256], strides = [1, 1]} : vector<12x512xf32> to vector<1x256xf32>
    %c0_39 = arith.constant 0 : index
    %c2816 = arith.constant 2816 : index
    %53 = vector.load %arg14[%c0_39, %c2816] : memref<2x3072xf32, #tpu.memory_space<vmem>>, vector<1x256xf32>
    tpu.vector_store %arg14[%c0_39, %c2816], %52 {strides = array<i32>} : memref<2x3072xf32, #tpu.memory_space<vmem>>, vector<1x256xf32>,
    %54 = vector.extract_strided_slice %7 {offsets = [11, 256], sizes = [1, 256], strides = [1, 1]} : vector<12x512xf32> to vector<1x256xf32>
    %c1_40 = arith.constant 1 : index
    %c2816_41 = arith.constant 2816 : index
    %55 = vector.load %arg14[%c1_40, %c2816_41] : memref<2x3072xf32, #tpu.memory_space<vmem>>, vector<1x256xf32>
    tpu.vector_store %arg14[%c1_40, %c2816_41], %54 {strides = array<i32>} : memref<2x3072xf32, #tpu.memory_space<vmem>>, vector<1x256xf32>,
    %c0_42 = arith.constant 0 : index
    %c0_43 = arith.constant 0 : index
    %56 = vector.load %arg14[%c0_42, %c0_43] : memref<2x3072xf32, #tpu.memory_space<vmem>>, vector<2x3072xf32>
    %57 = arith.truncf %56 : vector<2x3072xf32> to vector<2x3072xbf16>
    %c0_44 = arith.constant 0 : index
    %c0_45 = arith.constant 0 : index
    %58 = vector.load %arg1[%c0_44, %c0_45] : memref<2x8xbf16, #tpu.memory_space<vmem>>, vector<2x8xbf16>
    %c0_46 = arith.constant 0 : index
    %c0_47 = arith.constant 0 : index
    %59 = vector.load %arg5[%c0_46, %c0_47] : memref<8x258xbf16, #tpu.memory_space<vmem>>, vector<8x258xbf16>
    %cst_48 = arith.constant dense<0.000000e+00> : vector<2x258xf32>
    %60 = tpu.matmul %58, %59, %cst_48 {dimension_numbers = #tpu.dot_dimension_numbers<[1], [0], [0], [1], [0, 0, 1, 1], [], []>} : vector<2x8xbf16>, vector<8x258xbf16>, vector<2x258xf32> -> vector<2x258xf32>
    tpu.wait_dma2 semaphore(%arg16 : memref<!tpu.dma_semaphore, #tpu.memory_space<semaphore_mem>>) src(%arg4 : memref<3072x258xbf16, #tpu.memory_space<any>>) dst(%arg15 : memref<3072x258xbf16, #tpu.memory_space<vmem>>)
    %c0_49 = arith.constant 0 : index
    %c0_50 = arith.constant 0 : index
    %61 = vector.load %arg15[%c0_49, %c0_50] : memref<3072x258xbf16, #tpu.memory_space<vmem>>, vector<3072x258xbf16>
    %cst_51 = arith.constant dense<0.000000e+00> : vector<2x258xf32>
    %62 = tpu.matmul %57, %61, %cst_51 {dimension_numbers = #tpu.dot_dimension_numbers<[1], [0], [0], [1], [0, 0, 1, 1], [], []>} : vector<2x3072xbf16>, vector<3072x258xbf16>, vector<2x258xf32> -> vector<2x258xf32>
    %63 = arith.addf %60, %62 : vector<2x258xf32>
    %c0_52 = arith.constant 0 : index
    %c0_53 = arith.constant 0 : index
    %64 = vector.load %arg6[%c0_52, %c0_53] : memref<1x258xf32, #tpu.memory_space<vmem>>, vector<1x258xf32>
    %65 = vector.broadcast %64 : vector<1x258xf32> to vector<2x258xf32>
    %66 = arith.addf %63, %65 : vector<2x258xf32>
    %cst_54 = arith.constant 0.000000e+00 : f32
    %67 = vector.broadcast %cst_54 : f32 to vector<2x258xf32>
    %68 = arith.maximumf %66, %67 : vector<2x258xf32>
    %69 = arith.truncf %68 : vector<2x258xf32> to vector<2x258xbf16>
    %c0_55 = arith.constant 0 : index
    %c0_56 = arith.constant 0 : index
    %70 = vector.load %arg7[%c0_55, %c0_56] : memref<258x258xbf16, #tpu.memory_space<vmem>>, vector<258x258xbf16>
    %cst_57 = arith.constant dense<0.000000e+00> : vector<2x258xf32>
    %71 = tpu.matmul %69, %70, %cst_57 {dimension_numbers = #tpu.dot_dimension_numbers<[1], [0], [0], [1], [0, 0, 1, 1], [], []>} : vector<2x258xbf16>, vector<258x258xbf16>, vector<2x258xf32> -> vector<2x258xf32>
    %c0_58 = arith.constant 0 : index
    %c0_59 = arith.constant 0 : index
    %72 = vector.load %arg8[%c0_58, %c0_59] : memref<1x258xf32, #tpu.memory_space<vmem>>, vector<1x258xf32>
    %73 = vector.broadcast %72 : vector<1x258xf32> to vector<2x258xf32>
    %74 = arith.addf %71, %73 : vector<2x258xf32>
    %cst_60 = arith.constant 0.000000e+00 : f32
    %75 = vector.broadcast %cst_60 : f32 to vector<2x258xf32>
    %76 = arith.maximumf %74, %75 : vector<2x258xf32>
    %77 = arith.truncf %76 : vector<2x258xf32> to vector<2x258xbf16>
    %c0_61 = arith.constant 0 : index
    %c0_62 = arith.constant 0 : index
    %78 = vector.load %arg9[%c0_61, %c0_62] : memref<258x258xbf16, #tpu.memory_space<vmem>>, vector<258x258xbf16>
    %cst_63 = arith.constant dense<0.000000e+00> : vector<2x258xf32>
    %79 = tpu.matmul %77, %78, %cst_63 {dimension_numbers = #tpu.dot_dimension_numbers<[1], [0], [0], [1], [0, 0, 1, 1], [], []>} : vector<2x258xbf16>, vector<258x258xbf16>, vector<2x258xf32> -> vector<2x258xf32>
    %c0_64 = arith.constant 0 : index
    %c0_65 = arith.constant 0 : index
    %80 = vector.load %arg10[%c0_64, %c0_65] : memref<1x258xf32, #tpu.memory_space<vmem>>, vector<1x258xf32>
    %81 = vector.broadcast %80 : vector<1x258xf32> to vector<2x258xf32>
    %82 = arith.addf %79, %81 : vector<2x258xf32>
    %cst_66 = arith.constant 0.000000e+00 : f32
    %83 = vector.broadcast %cst_66 : f32 to vector<2x258xf32>
    %84 = arith.maximumf %82, %83 : vector<2x258xf32>
    %85 = arith.truncf %84 : vector<2x258xf32> to vector<2x258xbf16>
    %c0_67 = arith.constant 0 : index
    %c0_68 = arith.constant 0 : index
    %86 = vector.load %arg11[%c0_67, %c0_68] : memref<258x6xbf16, #tpu.memory_space<vmem>>, vector<258x6xbf16>
    %cst_69 = arith.constant dense<0.000000e+00> : vector<2x6xf32>
    %87 = tpu.matmul %85, %86, %cst_69 {dimension_numbers = #tpu.dot_dimension_numbers<[1], [0], [0], [1], [0, 0, 1, 1], [], []>} : vector<2x258xbf16>, vector<258x6xbf16>, vector<2x6xf32> -> vector<2x6xf32>
    %c0_70 = arith.constant 0 : index
    %c0_71 = arith.constant 0 : index
    %88 = vector.load %arg12[%c0_70, %c0_71] : memref<1x6xf32, #tpu.memory_space<vmem>>, vector<1x6xf32>
    %89 = vector.broadcast %88 : vector<1x6xf32> to vector<2x6xf32>
    %90 = arith.addf %87, %89 : vector<2x6xf32>
    %c0_72 = arith.constant 0 : index
    %c0_73 = arith.constant 0 : index
    %91 = vector.load %arg13[%c0_72, %c0_73] : memref<2x6xf32, #tpu.memory_space<vmem>>, vector<2x6xf32>
    tpu.vector_store %arg13[%c0_72, %c0_73], %90 {strides = array<i32>} : memref<2x6xf32, #tpu.memory_space<vmem>>, vector<2x6xf32>,
    return
  }
}

</mosaic_0001>

<bundles_post_ra>
// kernel: net_forward.1
= control target key start
LH: loop header
LB: loop body
LE: loop exit
PB: predicated region body
PF: predicated region fallthrough
CT: control target
= control target key end

     0   :  { %18 = vsyncpa [#allocation6], 0  ;;  %s9317_s25 = smov [#allocation3]   ;;  %s9324_s29 = smov 0   ;;  %s11210_s0 = inlined_call_operand.vmem [shape: bf16[36,512], index: 0, kind: input, shape index: {}]   ;;  %s11211_s1 = inlined_call_operand.vmem [shape: bf16[2,8], index: 1, kind: input, shape index: {}]   ;;  %s11212_s2 = inlined_call_operand.vmem [shape: bf16[12,36], index: 2, kind: input, shape index: {}]   ;;  %s11213_s3 = inlined_call_operand.vmem [shape: f32[12,1], index: 3, kind: input, shape index: {}]   ;;  %s11214_s4 = inlined_call_operand.vmem [shape: bf16[3072,258], index: 4, kind: input, shape index: {}]   ;;  %s11215_s5 = inlined_call_operand.vmem [shape: bf16[8,258], index: 5, kind: input, shape index: {}]   ;;  %s11216_s6 = inlined_call_operand.vmem [shape: f32[1,258], index: 6, kind: input, shape index: {}]   ;;  %s11217_s7 = inlined_call_operand.vmem [shape: bf16[258,258], index: 7, kind: input, shape index: {}]   ;;  %s11218_s8 = inlined_call_operand.vmem [shape: f32[1,258], index: 8, kind: input, shape index: {}]   ;;  %s11219_s9 = inlined_call_operand.vmem [shape: bf16[258,258], index: 9, kind: input, shape index: {}]   ;;  %s11220_s10 = inlined_call_operand.vmem [shape: f32[1,258], index: 10, kind: input, shape index: {}]   ;;  %s11221_s11 = inlined_call_operand.vmem [shape: bf16[258,6], index: 11, kind: input, shape index: {}]   ;;  %s11222_s12 = inlined_call_operand.vmem [shape: f32[1,6], index: 12, kind: input, shape index: {}]   ;;  %s11223_s13 = inlined_call_operand.hbm [shape: f32[2,6], index: 13, kind: output, shape index: {}]  }
   0x1   :  { %s11224_s28 = smov %s11214_s4  ;;  %s9326_s30 = smov 0  }
   0x2 LB: > { %v64_v0 = vld [vmem:[%s9231_s28] sm:$0xf]  ;;  %v66_v1 = vld [vmem:[%s9231_s28 + $0x4] sm:$0xf]  ;;  %v68_v2 = vld [vmem:[%s9231_s28 + $0x8] sm:$0xf]  ;;  %s9239_s30 = sphi %s9326_s30, %s60_s30   ;;  %s9235_s29 = sphi %s9324_s29, %s11225_s29   ;;  %s9231_s28 = sphi %s11224_s28, %s1221_s28   ;;  %s9227_s25 = sphi %s9317_s25, %s1222_s25  }
   0x3   : > { %65 = vst [vmem:[%s9227_s25] sm:$0xf] %v64_v0  ;;  %67 = vst [vmem:[%s9227_s25 + $0x8] sm:$0xf] %v66_v1  ;;  %v70_v3 = vld [vmem:[%s9231_s28 + $0x18] sm:$0xf]  ;;  %s1216_s14 = sadd.s32 1, %s9235_s29 }
   0x4   : > { %69 = vst [vmem:[%s9227_s25 + $0x10] sm:$0xf] %v68_v2  ;;  %v72_v4 = vld [vmem:[%s9231_s28 + $0x1c] sm:$0xf]  ;;  %v74_v5 = vld [vmem:[%s9231_s28 + $0x20] sm:$0xf] }
   0x5   : > { %71 = vst [vmem:[%s9227_s25 + $0x18] sm:$0xf] %v70_v3  ;;  %73 = vst [vmem:[%s9227_s25 + $0x20] sm:$0xf] %v72_v4  ;;  %v76_v6 = vld [vmem:[%s9231_s28 + $0x30] sm:$0xf] }
   0x6   : > { %75 = vst [vmem:[%s9227_s25 + $0x28] sm:$0xf] %v74_v5  ;;  %v78_v7 = vld [vmem:[%s9231_s28 + $0x34] sm:$0xf]  ;;  %v80_v8 = vld [vmem:[%s9231_s28 + $0x38] sm:$0xf] }
   0x7   : > { %77 = vst [vmem:[%s9227_s25 + $0x30] sm:$0xf] %v76_v6  ;;  %79 = vst [vmem:[%s9227_s25 + $0x38] sm:$0xf] %v78_v7  ;;  %v82_v9 = vld [vmem:[%s9231_s28 + $0x48] sm:$0xf] }
   0x8   : > { %81 = vst [vmem:[%s9227_s25 + $0x40] sm:$0xf] %v80_v8  ;;  %v84_v10 = vld [vmem:[%s9231_s28 + $0x4c] sm:$0xf]  ;;  %v86_v11 = vld [vmem:[%s9231_s28 + $0x50] sm:$0xf] }
   0x9   : > { %83 = vst [vmem:[%s9227_s25 + $0x48] sm:$0xf] %v82_v9  ;;  %85 = vst [vmem:[%s9227_s25 + $0x50] sm:$0xf] %v84_v10  ;;  %v88_v12 = vld [vmem:[%s9231_s28 + $0x60] sm:$0xf] }
   0xa   : > { %87 = vst [vmem:[%s9227_s25 + $0x58] sm:$0xf] %v86_v11  ;;  %v90_v13 = vld [vmem:[%s9231_s28 + $0x64] sm:$0xf]  ;;  %v92_v14 = vld [vmem:[%s9231_s28 + $0x68] sm:$0xf] }
   0xb   : > { %89 = vst [vmem:[%s9227_s25 + $0x60] sm:$0xf] %v88_v12  ;;  %91 = vst [vmem:[%s9227_s25 + $0x68] sm:$0xf] %v90_v13  ;;  %v94_v15 = vld [vmem:[%s9231_s28 + $0x78] sm:$0xf] }
   0xc   : > { %93 = vst [vmem:[%s9227_s25 + $0x70] sm:$0xf] %v92_v14  ;;  %v96_v16 = vld [vmem:[%s9231_s28 + $0x7c] sm:$0xf]  ;;  %v98_v17 = vld [vmem:[%s9231_s28 + $0x80] sm:$0xf] }
   0xd   : > { %95 = vst [vmem:[%s9227_s25 + $0x78] sm:$0xf] %v94_v15  ;;  %97 = vst [vmem:[%s9227_s25 + $0x80] sm:$0xf] %v96_v16  ;;  %v100_v18 = vld [vmem:[%s9231_s28 + $0x90] sm:$0xf] }
   0xe   : > { %99 = vst [vmem:[%s9227_s25 + $0x88] sm:$0xf] %v98_v17  ;;  %v102_v19 = vld [vmem:[%s9231_s28 + $0x94] sm:$0xf]  ;;  %v104_v20 = vld [vmem:[%s9231_s28 + $0x98] sm:$0xf] }
   0xf   : > { %101 = vst [vmem:[%s9227_s25 + $0x90] sm:$0xf] %v100_v18  ;;  %103 = vst [vmem:[%s9227_s25 + $0x98] sm:$0xf] %v102_v19  ;;  %v106_v21 = vld [vmem:[%s9231_s28 + $0xa8] sm:$0xf] }
  0x10   : > { %105 = vst [vmem:[%s9227_s25 + $0xa0] sm:$0xf] %v104_v20  ;;  %v108_v22 = vld [vmem:[%s9231_s28 + $0xac] sm:$0xf]  ;;  %v110_v23 = vld [vmem:[%s9231_s28 + $0xb0] sm:$0xf] }
  0x11   : > { %107 = vst [vmem:[%s9227_s25 + $0xa8] sm:$0xf] %v106_v21  ;;  %109 = vst [vmem:[%s9227_s25 + $0xb0] sm:$0xf] %v108_v22  ;;  %v112_v24 = vld [vmem:[%s9231_s28 + $0xc0] sm:$0xf] }
  0x12   : > { %111 = vst [vmem:[%s9227_s25 + $0xb8] sm:$0xf] %v110_v23  ;;  %v114_v25 = vld [vmem:[%s9231_s28 + $0xc4] sm:$0xf]  ;;  %v116_v26 = vld [vmem:[%s9231_s28 + $0xc8] sm:$0xf] }
  0x13   : > { %113 = vst [vmem:[%s9227_s25 + $0xc0] sm:$0xf] %v112_v24  ;;  %115 = vst [vmem:[%s9227_s25 + $0xc8] sm:$0xf] %v114_v25  ;;  %v118_v27 = vld [vmem:[%s9231_s28 + $0xd8] sm:$0xf] }
  0x14   : > { %117 = vst [vmem:[%s9227_s25 + $0xd0] sm:$0xf] %v116_v26  ;;  %v120_v28 = vld [vmem:[%s9231_s28 + $0xdc] sm:$0xf]  ;;  %v122_v29 = vld [vmem:[%s9231_s28 + $0xe0] sm:$0xf] }
  0x15   : > { %119 = vst [vmem:[%s9227_s25 + $0xd8] sm:$0xf] %v118_v27  ;;  %121 = vst [vmem:[%s9227_s25 + $0xe0] sm:$0xf] %v120_v28  ;;  %v124_v30 = vld [vmem:[%s9231_s28 + $0xf0] sm:$0xf] }
  0x16   : > { %123 = vst [vmem:[%s9227_s25 + $0xe8] sm:$0xf] %v122_v29  ;;  %v126_v31 = vld [vmem:[%s9231_s28 + $0xf4] sm:$0xf]  ;;  %v128_v32 = vld [vmem:[%s9231_s28 + $0xf8] sm:$0xf] }
  0x17   : > { %125 = vst [vmem:[%s9227_s25 + $0xf0] sm:$0xf] %v124_v30  ;;  %127 = vst [vmem:[%s9227_s25 + $0xf8] sm:$0xf] %v126_v31  ;;  %v130_v33 = vld [vmem:[%s9231_s28 + $0x108] sm:$0xf] }
  0x18   : > { %129 = vst [vmem:[%s9227_s25 + $0x100] sm:$0xf] %v128_v32  ;;  %v132_v34 = vld [vmem:[%s9231_s28 + $0x10c] sm:$0xf]  ;;  %v134_v35 = vld [vmem:[%s9231_s28 + $0x110] sm:$0xf] }
  0x19   : > { %131 = vst [vmem:[%s9227_s25 + $0x108] sm:$0xf] %v130_v33  ;;  %133 = vst [vmem:[%s9227_s25 + $0x110] sm:$0xf] %v132_v34  ;;  %v136_v36 = vld [vmem:[%s9231_s28 + $0x120] sm:$0xf] }
  0x1a   : > { %135 = vst [vmem:[%s9227_s25 + $0x118] sm:$0xf] %v134_v35  ;;  %v138_v37 = vld [vmem:[%s9231_s28 + $0x124] sm:$0xf]  ;;  %v140_v38 = vld [vmem:[%s9231_s28 + $0x128] sm:$0xf] }
  0x1b   : > { %137 = vst [vmem:[%s9227_s25 + $0x120] sm:$0xf] %v136_v36  ;;  %139 = vst [vmem:[%s9227_s25 + $0x128] sm:$0xf] %v138_v37  ;;  %v142_v39 = vld [vmem:[%s9231_s28 + $0x138] sm:$0xf] }
  0x1c   : > { %141 = vst [vmem:[%s9227_s25 + $0x130] sm:$0xf] %v140_v38  ;;  %v144_v40 = vld [vmem:[%s9231_s28 + $0x13c] sm:$0xf]  ;;  %v146_v41 = vld [vmem:[%s9231_s28 + $0x140] sm:$0xf] }
  0x1d   : > { %143 = vst [vmem:[%s9227_s25 + $0x138] sm:$0xf] %v142_v39  ;;  %145 = vst [vmem:[%s9227_s25 + $0x140] sm:$0xf] %v144_v40  ;;  %v148_v42 = vld [vmem:[%s9231_s28 + $0x150] sm:$0xf] }
  0x1e   : > { %147 = vst [vmem:[%s9227_s25 + $0x148] sm:$0xf] %v146_v41  ;;  %v150_v43 = vld [vmem:[%s9231_s28 + $0x154] sm:$0xf]  ;;  %v152_v44 = vld [vmem:[%s9231_s28 + $0x158] sm:$0xf] }
  0x1f   : > { %149 = vst [vmem:[%s9227_s25 + $0x150] sm:$0xf] %v148_v42  ;;  %151 = vst [vmem:[%s9227_s25 + $0x158] sm:$0xf] %v150_v43  ;;  %v154_v45 = vld [vmem:[%s9231_s28 + $0x168] sm:$0xf] }
  0x20   : > { %153 = vst [vmem:[%s9227_s25 + $0x160] sm:$0xf] %v152_v44  ;;  %v156_v46 = vld [vmem:[%s9231_s28 + $0x16c] sm:$0xf]  ;;  %v158_v47 = vld [vmem:[%s9231_s28 + $0x170] sm:$0xf] }
  0x21   : > { %155 = vst [vmem:[%s9227_s25 + $0x168] sm:$0xf] %v154_v45  ;;  %157 = vst [vmem:[%s9227_s25 + $0x170] sm:$0xf] %v156_v46  ;;  %v160_v48 = vld [vmem:[%s9231_s28 + $0x180] sm:$0xf] }
  0x22   : > { %159 = vst [vmem:[%s9227_s25 + $0x178] sm:$0xf] %v158_v47  ;;  %v162_v49 = vld [vmem:[%s9231_s28 + $0x184] sm:$0xf]  ;;  %v164_v50 = vld [vmem:[%s9231_s28 + $0x188] sm:$0xf] }
  0x23   : > { %161 = vst [vmem:[%s9227_s25 + $0x180] sm:$0xf] %v160_v48  ;;  %163 = vst [vmem:[%s9227_s25 + $0x188] sm:$0xf] %v162_v49  ;;  %v166_v51 = vld [vmem:[%s9231_s28 + $0x198] sm:$0xf] }
  0x24   : > { %165 = vst [vmem:[%s9227_s25 + $0x190] sm:$0xf] %v164_v50  ;;  %v168_v52 = vld [vmem:[%s9231_s28 + $0x19c] sm:$0xf]  ;;  %v170_v53 = vld [vmem:[%s9231_s28 + $0x1a0] sm:$0xf] }
  0x25   : > { %167 = vst [vmem:[%s9227_s25 + $0x198] sm:$0xf] %v166_v51  ;;  %169 = vst [vmem:[%s9227_s25 + $0x1a0] sm:$0xf] %v168_v52  ;;  %v172_v54 = vld [vmem:[%s9231_s28 + $0x1b0] sm:$0xf] }
  0x26   : > { %171 = vst [vmem:[%s9227_s25 + $0x1a8] sm:$0xf] %v170_v53  ;;  %v174_v55 = vld [vmem:[%s9231_s28 + $0x1b4] sm:$0xf]  ;;  %v176_v56 = vld [vmem:[%s9231_s28 + $0x1b8] sm:$0xf] }
  0x27   : > { %173 = vst [vmem:[%s9227_s25 + $0x1b0] sm:$0xf] %v172_v54  ;;  %175 = vst [vmem:[%s9227_s25 + $0x1b8] sm:$0xf] %v174_v55  ;;  %v178_v57 = vld [vmem:[%s9231_s28 + $0x1c8] sm:$0xf] }
  0x28   : > { %177 = vst [vmem:[%s9227_s25 + $0x1c0] sm:$0xf] %v176_v56  ;;  %v180_v58 = vld [vmem:[%s9231_s28 + $0x1cc] sm:$0xf]  ;;  %v182_v59 = vld [vmem:[%s9231_s28 + $0x1d0] sm:$0xf] }
  0x29   : > { %179 = vst [vmem:[%s9227_s25 + $0x1c8] sm:$0xf] %v178_v57  ;;  %181 = vst [vmem:[%s9227_s25 + $0x1d0] sm:$0xf] %v180_v58  ;;  %v184_v60 = vld [vmem:[%s9231_s28 + $0x1e0] sm:$0xf] }
  0x2a   : > { %183 = vst [vmem:[%s9227_s25 + $0x1d8] sm:$0xf] %v182_v59  ;;  %v186_v61 = vld [vmem:[%s9231_s28 + $0x1e4] sm:$0xf]  ;;  %v188_v62 = vld [vmem:[%s9231_s28 + $0x1e8] sm:$0xf] }
  0x2b   : > { %185 = vst [vmem:[%s9227_s25 + $0x1e0] sm:$0xf] %v184_v60  ;;  %187 = vst [vmem:[%s9227_s25 + $0x1e8] sm:$0xf] %v186_v61  ;;  %v190_v63 = vld [vmem:[%s9231_s28 + $0x1f8] sm:$0xf] }
  0x2c   : > { %189 = vst [vmem:[%s9227_s25 + $0x1f0] sm:$0xf] %v188_v62  ;;  %v192_v0 = vld [vmem:[%s9231_s28 + $0x1fc] sm:$0xf]  ;;  %v194_v1 = vld [vmem:[%s9231_s28 + $0x200] sm:$0xf] }
  0x2d   : > { %191 = vst [vmem:[%s9227_s25 + $0x1f8] sm:$0xf] %v190_v63  ;;  %193 = vst [vmem:[%s9227_s25 + $0x200] sm:$0xf] %v192_v0  ;;  %v196_v2 = vld [vmem:[%s9231_s28 + $0x210] sm:$0xf] }
  0x2e   : > { %195 = vst [vmem:[%s9227_s25 + $0x208] sm:$0xf] %v194_v1  ;;  %v198_v3 = vld [vmem:[%s9231_s28 + $0x214] sm:$0xf]  ;;  %v200_v4 = vld [vmem:[%s9231_s28 + $0x218] sm:$0xf] }
  0x2f   : > { %197 = vst [vmem:[%s9227_s25 + $0x210] sm:$0xf] %v196_v2  ;;  %199 = vst [vmem:[%s9227_s25 + $0x218] sm:$0xf] %v198_v3  ;;  %v202_v5 = vld [vmem:[%s9231_s28 + $0x228] sm:$0xf] }
  0x30   : > { %201 = vst [vmem:[%s9227_s25 + $0x220] sm:$0xf] %v200_v4  ;;  %v204_v6 = vld [vmem:[%s9231_s28 + $0x22c] sm:$0xf]  ;;  %v206_v7 = vld [vmem:[%s9231_s28 + $0x230] sm:$0xf] }
  0x31   : > { %203 = vst [vmem:[%s9227_s25 + $0x228] sm:$0xf] %v202_v5  ;;  %205 = vst [vmem:[%s9227_s25 + $0x230] sm:$0xf] %v204_v6  ;;  %v208_v8 = vld [vmem:[%s9231_s28 + $0x240] sm:$0xf] }
  0x32   : > { %207 = vst [vmem:[%s9227_s25 + $0x238] sm:$0xf] %v206_v7  ;;  %v210_v9 = vld [vmem:[%s9231_s28 + $0x244] sm:$0xf]  ;;  %v212_v10 = vld [vmem:[%s9231_s28 + $0x248] sm:$0xf] }
  0x33   : > { %209 = vst [vmem:[%s9227_s25 + $0x240] sm:$0xf] %v208_v8  ;;  %211 = vst [vmem:[%s9227_s25 + $0x248] sm:$0xf] %v210_v9  ;;  %v214_v11 = vld [vmem:[%s9231_s28 + $0x258] sm:$0xf] }
  0x34   : > { %213 = vst [vmem:[%s9227_s25 + $0x250] sm:$0xf] %v212_v10  ;;  %v216_v12 = vld [vmem:[%s9231_s28 + $0x25c] sm:$0xf]  ;;  %v218_v13 = vld [vmem:[%s9231_s28 + $0x260] sm:$0xf] }
  0x35   : > { %215 = vst [vmem:[%s9227_s25 + $0x258] sm:$0xf] %v214_v11  ;;  %217 = vst [vmem:[%s9227_s25 + $0x260] sm:$0xf] %v216_v12  ;;  %v220_v14 = vld [vmem:[%s9231_s28 + $0x270] sm:$0xf] }
  0x36   : > { %219 = vst [vmem:[%s9227_s25 + $0x268] sm:$0xf] %v218_v13  ;;  %v222_v15 = vld [vmem:[%s9231_s28 + $0x274] sm:$0xf]  ;;  %v224_v16 = vld [vmem:[%s9231_s28 + $0x278] sm:$0xf] }
  0x37   : > { %221 = vst [vmem:[%s9227_s25 + $0x270] sm:$0xf] %v220_v14  ;;  %223 = vst [vmem:[%s9227_s25 + $0x278] sm:$0xf] %v222_v15  ;;  %v226_v17 = vld [vmem:[%s9231_s28 + $0x288] sm:$0xf] }
  0x38   : > { %225 = vst [vmem:[%s9227_s25 + $0x280] sm:$0xf] %v224_v16  ;;  %v228_v18 = vld [vmem:[%s9231_s28 + $0x28c] sm:$0xf]  ;;  %v230_v19 = vld [vmem:[%s9231_s28 + $0x290] sm:$0xf] }
  0x39   : > { %227 = vst [vmem:[%s9227_s25 + $0x288] sm:$0xf] %v226_v17  ;;  %229 = vst [vmem:[%s9227_s25 + $0x290] sm:$0xf] %v228_v18  ;;  %v232_v20 = vld [vmem:[%s9231_s28 + $0x2a0] sm:$0xf] }
  0x3a   : > { %231 = vst [vmem:[%s9227_s25 + $0x298] sm:$0xf] %v230_v19  ;;  %v234_v21 = vld [vmem:[%s9231_s28 + $0x2a4] sm:$0xf]  ;;  %v236_v22 = vld [vmem:[%s9231_s28 + $0x2a8] sm:$0xf] }
  0x3b   : > { %233 = vst [vmem:[%s9227_s25 + $0x2a0] sm:$0xf] %v232_v20  ;;  %235 = vst [vmem:[%s9227_s25 + $0x2a8] sm:$0xf] %v234_v21  ;;  %v238_v23 = vld [vmem:[%s9231_s28 + $0x2b8] sm:$0xf] }
  0x3c   : > { %237 = vst [vmem:[%s9227_s25 + $0x2b0] sm:$0xf] %v236_v22  ;;  %v240_v24 = vld [vmem:[%s9231_s28 + $0x2bc] sm:$0xf]  ;;  %v242_v25 = vld [vmem:[%s9231_s28 + $0x2c0] sm:$0xf] }
  0x3d   : > { %239 = vst [vmem:[%s9227_s25 + $0x2b8] sm:$0xf] %v238_v23  ;;  %241 = vst [vmem:[%s9227_s25 + $0x2c0] sm:$0xf] %v240_v24  ;;  %v244_v26 = vld [vmem:[%s9231_s28 + $0x2d0] sm:$0xf] }
  0x3e   : > { %243 = vst [vmem:[%s9227_s25 + $0x2c8] sm:$0xf] %v242_v25  ;;  %v246_v27 = vld [vmem:[%s9231_s28 + $0x2d4] sm:$0xf]  ;;  %v248_v28 = vld [vmem:[%s9231_s28 + $0x2d8] sm:$0xf] }
  0x3f   : > { %245 = vst [vmem:[%s9227_s25 + $0x2d0] sm:$0xf] %v244_v26  ;;  %247 = vst [vmem:[%s9227_s25 + $0x2d8] sm:$0xf] %v246_v27  ;;  %v250_v29 = vld [vmem:[%s9231_s28 + $0x2e8] sm:$0xf] }
  0x40   : > { %249 = vst [vmem:[%s9227_s25 + $0x2e0] sm:$0xf] %v248_v28  ;;  %v252_v30 = vld [vmem:[%s9231_s28 + $0x2ec] sm:$0xf]  ;;  %v254_v31 = vld [vmem:[%s9231_s28 + $0x2f0] sm:$0xf] }
  0x41   : > { %251 = vst [vmem:[%s9227_s25 + $0x2e8] sm:$0xf] %v250_v29  ;;  %253 = vst [vmem:[%s9227_s25 + $0x2f0] sm:$0xf] %v252_v30  ;;  %v256_v32 = vld [vmem:[%s9231_s28 + $0x300] sm:$0xf] }
  0x42   : > { %255 = vst [vmem:[%s9227_s25 + $0x2f8] sm:$0xf] %v254_v31  ;;  %v258_v33 = vld [vmem:[%s9231_s28 + $0x304] sm:$0xf]  ;;  %v260_v34 = vld [vmem:[%s9231_s28 + $0x308] sm:$0xf] }
  0x43   : > { %257 = vst [vmem:[%s9227_s25 + $0x300] sm:$0xf] %v256_v32  ;;  %259 = vst [vmem:[%s9227_s25 + $0x308] sm:$0xf] %v258_v33  ;;  %v262_v35 = vld [vmem:[%s9231_s28 + $0x318] sm:$0xf] }
  0x44   : > { %261 = vst [vmem:[%s9227_s25 + $0x310] sm:$0xf] %v260_v34  ;;  %v264_v36 = vld [vmem:[%s9231_s28 + $0x31c] sm:$0xf]  ;;  %v266_v37 = vld [vmem:[%s9231_s28 + $0x320] sm:$0xf] }
  0x45   : > { %263 = vst [vmem:[%s9227_s25 + $0x318] sm:$0xf] %v262_v35  ;;  %265 = vst [vmem:[%s9227_s25 + $0x320] sm:$0xf] %v264_v36  ;;  %v268_v38 = vld [vmem:[%s9231_s28 + $0x330] sm:$0xf] }
  0x46   : > { %267 = vst [vmem:[%s9227_s25 + $0x328] sm:$0xf] %v266_v37  ;;  %v270_v39 = vld [vmem:[%s9231_s28 + $0x334] sm:$0xf]  ;;  %v272_v40 = vld [vmem:[%s9231_s28 + $0x338] sm:$0xf] }
  0x47   : > { %269 = vst [vmem:[%s9227_s25 + $0x330] sm:$0xf] %v268_v38  ;;  %271 = vst [vmem:[%s9227_s25 + $0x338] sm:$0xf] %v270_v39  ;;  %v274_v41 = vld [vmem:[%s9231_s28 + $0x348] sm:$0xf] }
  0x48   : > { %273 = vst [vmem:[%s9227_s25 + $0x340] sm:$0xf] %v272_v40  ;;  %v276_v42 = vld [vmem:[%s9231_s28 + $0x34c] sm:$0xf]  ;;  %v278_v43 = vld [vmem:[%s9231_s28 + $0x350] sm:$0xf] }
  0x49   : > { %275 = vst [vmem:[%s9227_s25 + $0x348] sm:$0xf] %v274_v41  ;;  %277 = vst [vmem:[%s9227_s25 + $0x350] sm:$0xf] %v276_v42  ;;  %v280_v44 = vld [vmem:[%s9231_s28 + $0x360] sm:$0xf] }
  0x4a   : > { %279 = vst [vmem:[%s9227_s25 + $0x358] sm:$0xf] %v278_v43  ;;  %v282_v45 = vld [vmem:[%s9231_s28 + $0x364] sm:$0xf]  ;;  %v284_v46 = vld [vmem:[%s9231_s28 + $0x368] sm:$0xf] }
  0x4b   : > { %281 = vst [vmem:[%s9227_s25 + $0x360] sm:$0xf] %v280_v44  ;;  %283 = vst [vmem:[%s9227_s25 + $0x368] sm:$0xf] %v282_v45  ;;  %v286_v47 = vld [vmem:[%s9231_s28 + $0x378] sm:$0xf] }
  0x4c   : > { %285 = vst [vmem:[%s9227_s25 + $0x370] sm:$0xf] %v284_v46  ;;  %v288_v48 = vld [vmem:[%s9231_s28 + $0x37c] sm:$0xf]  ;;  %v290_v49 = vld [vmem:[%s9231_s28 + $0x380] sm:$0xf] }
  0x4d   : > { %287 = vst [vmem:[%s9227_s25 + $0x378] sm:$0xf] %v286_v47  ;;  %289 = vst [vmem:[%s9227_s25 + $0x380] sm:$0xf] %v288_v48  ;;  %v292_v50 = vld [vmem:[%s9231_s28 + $0x390] sm:$0xf] }
  0x4e   : > { %291 = vst [vmem:[%s9227_s25 + $0x388] sm:$0xf] %v290_v49  ;;  %v294_v51 = vld [vmem:[%s9231_s28 + $0x394] sm:$0xf]  ;;  %v296_v52 = vld [vmem:[%s9231_s28 + $0x398] sm:$0xf] }
  0x4f   : > { %293 = vst [vmem:[%s9227_s25 + $0x390] sm:$0xf] %v292_v50  ;;  %295 = vst [vmem:[%s9227_s25 + $0x398] sm:$0xf] %v294_v51  ;;  %v298_v53 = vld [vmem:[%s9231_s28 + $0x3a8] sm:$0xf] }
  0x50   : > { %297 = vst [vmem:[%s9227_s25 + $0x3a0] sm:$0xf] %v296_v52  ;;  %v300_v54 = vld [vmem:[%s9231_s28 + $0x3ac] sm:$0xf]  ;;  %v302_v55 = vld [vmem:[%s9231_s28 + $0x3b0] sm:$0xf] }
  0x51   : > { %299 = vst [vmem:[%s9227_s25 + $0x3a8] sm:$0xf] %v298_v53  ;;  %301 = vst [vmem:[%s9227_s25 + $0x3b0] sm:$0xf] %v300_v54  ;;  %v304_v56 = vld [vmem:[%s9231_s28 + $0x3c0] sm:$0xf] }
  0x52   : > { %303 = vst [vmem:[%s9227_s25 + $0x3b8] sm:$0xf] %v302_v55  ;;  %v306_v57 = vld [vmem:[%s9231_s28 + $0x3c4] sm:$0xf]  ;;  %v308_v58 = vld [vmem:[%s9231_s28 + $0x3c8] sm:$0xf] }
  0x53   : > { %305 = vst [vmem:[%s9227_s25 + $0x3c0] sm:$0xf] %v304_v56  ;;  %307 = vst [vmem:[%s9227_s25 + $0x3c8] sm:$0xf] %v306_v57  ;;  %v310_v59 = vld [vmem:[%s9231_s28 + $0x3d8] sm:$0xf] }
  0x54   : > { %309 = vst [vmem:[%s9227_s25 + $0x3d0] sm:$0xf] %v308_v58  ;;  %v312_v60 = vld [vmem:[%s9231_s28 + $0x3dc] sm:$0xf]  ;;  %v314_v61 = vld [vmem:[%s9231_s28 + $0x3e0] sm:$0xf] }
  0x55   : > { %311 = vst [vmem:[%s9227_s25 + $0x3d8] sm:$0xf] %v310_v59  ;;  %313 = vst [vmem:[%s9227_s25 + $0x3e0] sm:$0xf] %v312_v60  ;;  %v316_v62 = vld [vmem:[%s9231_s28 + $0x3f0] sm:$0xf] }
  0x56   : > { %315 = vst [vmem:[%s9227_s25 + $0x3e8] sm:$0xf] %v314_v61  ;;  %v318_v63 = vld [vmem:[%s9231_s28 + $0x3f4] sm:$0xf]  ;;  %v320_v0 = vld [vmem:[%s9231_s28 + $0x3f8] sm:$0xf] }
  0x57   : > { %317 = vst [vmem:[%s9227_s25 + $0x3f0] sm:$0xf] %v316_v62  ;;  %319 = vst [vmem:[%s9227_s25 + $0x3f8] sm:$0xf] %v318_v63  ;;  %v322_v1 = vld [vmem:[%s9231_s28 + $0x408] sm:$0xf] }
  0x58   : > { %321 = vst [vmem:[%s9227_s25 + $0x400] sm:$0xf] %v320_v0  ;;  %v324_v2 = vld [vmem:[%s9231_s28 + $0x40c] sm:$0xf]  ;;  %v326_v3 = vld [vmem:[%s9231_s28 + $0x410] sm:$0xf] }
  0x59   : > { %323 = vst [vmem:[%s9227_s25 + $0x408] sm:$0xf] %v322_v1  ;;  %325 = vst [vmem:[%s9227_s25 + $0x410] sm:$0xf] %v324_v2  ;;  %v328_v4 = vld [vmem:[%s9231_s28 + $0x420] sm:$0xf] }
  0x5a   : > { %327 = vst [vmem:[%s9227_s25 + $0x418] sm:$0xf] %v326_v3  ;;  %v330_v5 = vld [vmem:[%s9231_s28 + $0x424] sm:$0xf]  ;;  %v332_v6 = vld [vmem:[%s9231_s28 + $0x428] sm:$0xf] }
  0x5b   : > { %329 = vst [vmem:[%s9227_s25 + $0x420] sm:$0xf] %v328_v4  ;;  %331 = vst [vmem:[%s9227_s25 + $0x428] sm:$0xf] %v330_v5  ;;  %v334_v7 = vld [vmem:[%s9231_s28 + $0x438] sm:$0xf] }
  0x5c   : > { %333 = vst [vmem:[%s9227_s25 + $0x430] sm:$0xf] %v332_v6  ;;  %v336_v8 = vld [vmem:[%s9231_s28 + $0x43c] sm:$0xf]  ;;  %v338_v9 = vld [vmem:[%s9231_s28 + $0x440] sm:$0xf] }
  0x5d   : > { %335 = vst [vmem:[%s9227_s25 + $0x438] sm:$0xf] %v334_v7  ;;  %337 = vst [vmem:[%s9227_s25 + $0x440] sm:$0xf] %v336_v8  ;;  %v340_v10 = vld [vmem:[%s9231_s28 + $0x450] sm:$0xf] }
  0x5e   : > { %339 = vst [vmem:[%s9227_s25 + $0x448] sm:$0xf] %v338_v9  ;;  %v342_v11 = vld [vmem:[%s9231_s28 + $0x454] sm:$0xf]  ;;  %v344_v12 = vld [vmem:[%s9231_s28 + $0x458] sm:$0xf] }
  0x5f   : > { %341 = vst [vmem:[%s9227_s25 + $0x450] sm:$0xf] %v340_v10  ;;  %343 = vst [vmem:[%s9227_s25 + $0x458] sm:$0xf] %v342_v11  ;;  %v346_v13 = vld [vmem:[%s9231_s28 + $0x468] sm:$0xf] }
  0x60   : > { %345 = vst [vmem:[%s9227_s25 + $0x460] sm:$0xf] %v344_v12  ;;  %v348_v14 = vld [vmem:[%s9231_s28 + $0x46c] sm:$0xf]  ;;  %v350_v15 = vld [vmem:[%s9231_s28 + $0x470] sm:$0xf] }
  0x61   : > { %347 = vst [vmem:[%s9227_s25 + $0x468] sm:$0xf] %v346_v13  ;;  %349 = vst [vmem:[%s9227_s25 + $0x470] sm:$0xf] %v348_v14  ;;  %v352_v16 = vld [vmem:[%s9231_s28 + $0x480] sm:$0xf] }
  0x62   : > { %351 = vst [vmem:[%s9227_s25 + $0x478] sm:$0xf] %v350_v15  ;;  %v354_v17 = vld [vmem:[%s9231_s28 + $0x484] sm:$0xf]  ;;  %v356_v18 = vld [vmem:[%s9231_s28 + $0x488] sm:$0xf] }
  0x63   : > { %353 = vst [vmem:[%s9227_s25 + $0x480] sm:$0xf] %v352_v16  ;;  %355 = vst [vmem:[%s9227_s25 + $0x488] sm:$0xf] %v354_v17  ;;  %v358_v19 = vld [vmem:[%s9231_s28 + $0x498] sm:$0xf] }
  0x64   : > { %357 = vst [vmem:[%s9227_s25 + $0x490] sm:$0xf] %v356_v18  ;;  %v360_v20 = vld [vmem:[%s9231_s28 + $0x49c] sm:$0xf]  ;;  %v362_v21 = vld [vmem:[%s9231_s28 + $0x4a0] sm:$0xf] }
  0x65   : > { %359 = vst [vmem:[%s9227_s25 + $0x498] sm:$0xf] %v358_v19  ;;  %361 = vst [vmem:[%s9227_s25 + $0x4a0] sm:$0xf] %v360_v20  ;;  %v364_v22 = vld [vmem:[%s9231_s28 + $0x4b0] sm:$0xf] }
  0x66   : > { %363 = vst [vmem:[%s9227_s25 + $0x4a8] sm:$0xf] %v362_v21  ;;  %v366_v23 = vld [vmem:[%s9231_s28 + $0x4b4] sm:$0xf]  ;;  %v368_v24 = vld [vmem:[%s9231_s28 + $0x4b8] sm:$0xf] }
  0x67   : > { %365 = vst [vmem:[%s9227_s25 + $0x4b0] sm:$0xf] %v364_v22  ;;  %367 = vst [vmem:[%s9227_s25 + $0x4b8] sm:$0xf] %v366_v23  ;;  %v370_v25 = vld [vmem:[%s9231_s28 + $0x4c8] sm:$0xf] }
  0x68   : > { %369 = vst [vmem:[%s9227_s25 + $0x4c0] sm:$0xf] %v368_v24  ;;  %v372_v26 = vld [vmem:[%s9231_s28 + $0x4cc] sm:$0xf]  ;;  %v374_v27 = vld [vmem:[%s9231_s28 + $0x4d0] sm:$0xf] }
  0x69   : > { %371 = vst [vmem:[%s9227_s25 + $0x4c8] sm:$0xf] %v370_v25  ;;  %373 = vst [vmem:[%s9227_s25 + $0x4d0] sm:$0xf] %v372_v26  ;;  %v376_v28 = vld [vmem:[%s9231_s28 + $0x4e0] sm:$0xf] }
  0x6a   : > { %375 = vst [vmem:[%s9227_s25 + $0x4d8] sm:$0xf] %v374_v27  ;;  %v378_v29 = vld [vmem:[%s9231_s28 + $0x4e4] sm:$0xf]  ;;  %v380_v30 = vld [vmem:[%s9231_s28 + $0x4e8] sm:$0xf] }
  0x6b   : > { %377 = vst [vmem:[%s9227_s25 + $0x4e0] sm:$0xf] %v376_v28  ;;  %379 = vst [vmem:[%s9227_s25 + $0x4e8] sm:$0xf] %v378_v29  ;;  %v382_v31 = vld [vmem:[%s9231_s28 + $0x4f8] sm:$0xf] }
  0x6c   : > { %381 = vst [vmem:[%s9227_s25 + $0x4f0] sm:$0xf] %v380_v30  ;;  %v384_v32 = vld [vmem:[%s9231_s28 + $0x4fc] sm:$0xf]  ;;  %v386_v33 = vld [vmem:[%s9231_s28 + $0x500] sm:$0xf] }
  0x6d   : > { %383 = vst [vmem:[%s9227_s25 + $0x4f8] sm:$0xf] %v382_v31  ;;  %385 = vst [vmem:[%s9227_s25 + $0x500] sm:$0xf] %v384_v32  ;;  %v388_v34 = vld [vmem:[%s9231_s28 + $0x510] sm:$0xf] }
  0x6e   : > { %387 = vst [vmem:[%s9227_s25 + $0x508] sm:$0xf] %v386_v33  ;;  %v390_v35 = vld [vmem:[%s9231_s28 + $0x514] sm:$0xf]  ;;  %v392_v36 = vld [vmem:[%s9231_s28 + $0x518] sm:$0xf] }
  0x6f   : > { %389 = vst [vmem:[%s9227_s25 + $0x510] sm:$0xf] %v388_v34  ;;  %391 = vst [vmem:[%s9227_s25 + $0x518] sm:$0xf] %v390_v35  ;;  %v394_v37 = vld [vmem:[%s9231_s28 + $0x528] sm:$0xf] }
  0x70   : > { %393 = vst [vmem:[%s9227_s25 + $0x520] sm:$0xf] %v392_v36  ;;  %v396_v38 = vld [vmem:[%s9231_s28 + $0x52c] sm:$0xf]  ;;  %v398_v39 = vld [vmem:[%s9231_s28 + $0x530] sm:$0xf] }
  0x71   : > { %395 = vst [vmem:[%s9227_s25 + $0x528] sm:$0xf] %v394_v37  ;;  %397 = vst [vmem:[%s9227_s25 + $0x530] sm:$0xf] %v396_v38  ;;  %v400_v40 = vld [vmem:[%s9231_s28 + $0x540] sm:$0xf] }
  0x72   : > { %399 = vst [vmem:[%s9227_s25 + $0x538] sm:$0xf] %v398_v39  ;;  %v402_v41 = vld [vmem:[%s9231_s28 + $0x544] sm:$0xf]  ;;  %v404_v42 = vld [vmem:[%s9231_s28 + $0x548] sm:$0xf] }
  0x73   : > { %401 = vst [vmem:[%s9227_s25 + $0x540] sm:$0xf] %v400_v40  ;;  %403 = vst [vmem:[%s9227_s25 + $0x548] sm:$0xf] %v402_v41  ;;  %v406_v43 = vld [vmem:[%s9231_s28 + $0x558] sm:$0xf] }
  0x74   : > { %405 = vst [vmem:[%s9227_s25 + $0x550] sm:$0xf] %v404_v42  ;;  %v408_v44 = vld [vmem:[%s9231_s28 + $0x55c] sm:$0xf]  ;;  %v410_v45 = vld [vmem:[%s9231_s28 + $0x560] sm:$0xf] }
  0x75   : > { %407 = vst [vmem:[%s9227_s25 + $0x558] sm:$0xf] %v406_v43  ;;  %409 = vst [vmem:[%s9227_s25 + $0x560] sm:$0xf] %v408_v44  ;;  %v412_v46 = vld [vmem:[%s9231_s28 + $0x570] sm:$0xf] }
  0x76   : > { %411 = vst [vmem:[%s9227_s25 + $0x568] sm:$0xf] %v410_v45  ;;  %v414_v47 = vld [vmem:[%s9231_s28 + $0x574] sm:$0xf]  ;;  %v416_v48 = vld [vmem:[%s9231_s28 + $0x578] sm:$0xf] }
  0x77   : > { %413 = vst [vmem:[%s9227_s25 + $0x570] sm:$0xf] %v412_v46  ;;  %415 = vst [vmem:[%s9227_s25 + $0x578] sm:$0xf] %v414_v47  ;;  %v418_v49 = vld [vmem:[%s9231_s28 + $0x588] sm:$0xf] }
  0x78   : > { %417 = vst [vmem:[%s9227_s25 + $0x580] sm:$0xf] %v416_v48  ;;  %v420_v50 = vld [vmem:[%s9231_s28 + $0x58c] sm:$0xf]  ;;  %v422_v51 = vld [vmem:[%s9231_s28 + $0x590] sm:$0xf] }
  0x79   : > { %419 = vst [vmem:[%s9227_s25 + $0x588] sm:$0xf] %v418_v49  ;;  %421 = vst [vmem:[%s9227_s25 + $0x590] sm:$0xf] %v420_v50  ;;  %v424_v52 = vld [vmem:[%s9231_s28 + $0x5a0] sm:$0xf] }
  0x7a   : > { %423 = vst [vmem:[%s9227_s25 + $0x598] sm:$0xf] %v422_v51  ;;  %v426_v53 = vld [vmem:[%s9231_s28 + $0x5a4] sm:$0xf]  ;;  %v428_v54 = vld [vmem:[%s9231_s28 + $0x5a8] sm:$0xf] }
  0x7b   : > { %425 = vst [vmem:[%s9227_s25 + $0x5a0] sm:$0xf] %v424_v52  ;;  %427 = vst [vmem:[%s9227_s25 + $0x5a8] sm:$0xf] %v426_v53  ;;  %v430_v55 = vld [vmem:[%s9231_s28 + $0x5b8] sm:$0xf] }
  0x7c   : > { %429 = vst [vmem:[%s9227_s25 + $0x5b0] sm:$0xf] %v428_v54  ;;  %v432_v56 = vld [vmem:[%s9231_s28 + $0x5bc] sm:$0xf]  ;;  %v434_v57 = vld [vmem:[%s9231_s28 + $0x5c0] sm:$0xf] }
  0x7d   : > { %431 = vst [vmem:[%s9227_s25 + $0x5b8] sm:$0xf] %v430_v55  ;;  %433 = vst [vmem:[%s9227_s25 + $0x5c0] sm:$0xf] %v432_v56  ;;  %v436_v58 = vld [vmem:[%s9231_s28 + $0x5d0] sm:$0xf] }
  0x7e   : > { %435 = vst [vmem:[%s9227_s25 + $0x5c8] sm:$0xf] %v434_v57  ;;  %v438_v59 = vld [vmem:[%s9231_s28 + $0x5d4] sm:$0xf]  ;;  %v440_v60 = vld [vmem:[%s9231_s28 + $0x5d8] sm:$0xf] }
  0x7f   : > { %437 = vst [vmem:[%s9227_s25 + $0x5d0] sm:$0xf] %v436_v58  ;;  %439 = vst [vmem:[%s9227_s25 + $0x5d8] sm:$0xf] %v438_v59  ;;  %v442_v61 = vld [vmem:[%s9231_s28 + $0x5e8] sm:$0xf] }
  0x80   : > { %441 = vst [vmem:[%s9227_s25 + $0x5e0] sm:$0xf] %v440_v60  ;;  %v444_v62 = vld [vmem:[%s9231_s28 + $0x5ec] sm:$0xf]  ;;  %v446_v63 = vld [vmem:[%s9231_s28 + $0x5f0] sm:$0xf] }
  0x81   : > { %443 = vst [vmem:[%s9227_s25 + $0x5e8] sm:$0xf] %v442_v61  ;;  %445 = vst [vmem:[%s9227_s25 + $0x5f0] sm:$0xf] %v444_v62  ;;  %v448_v0 = vld [vmem:[%s9231_s28 + $0x600] sm:$0xf] }
  0x82   : > { %447 = vst [vmem:[%s9227_s25 + $0x5f8] sm:$0xf] %v446_v63  ;;  %v450_v1 = vld [vmem:[%s9231_s28 + $0x604] sm:$0xf]  ;;  %v452_v2 = vld [vmem:[%s9231_s28 + $0x608] sm:$0xf] }
  0x83   : > { %449 = vst [vmem:[%s9227_s25 + $0x600] sm:$0xf] %v448_v0  ;;  %451 = vst [vmem:[%s9227_s25 + $0x608] sm:$0xf] %v450_v1  ;;  %v454_v3 = vld [vmem:[%s9231_s28 + $0x618] sm:$0xf] }
  0x84   : > { %453 = vst [vmem:[%s9227_s25 + $0x610] sm:$0xf] %v452_v2  ;;  %v456_v4 = vld [vmem:[%s9231_s28 + $0x61c] sm:$0xf]  ;;  %v458_v5 = vld [vmem:[%s9231_s28 + $0x620] sm:$0xf] }
  0x85   : > { %455 = vst [vmem:[%s9227_s25 + $0x618] sm:$0xf] %v454_v3  ;;  %457 = vst [vmem:[%s9227_s25 + $0x620] sm:$0xf] %v456_v4  ;;  %v460_v6 = vld [vmem:[%s9231_s28 + $0x630] sm:$0xf] }
  0x86   : > { %459 = vst [vmem:[%s9227_s25 + $0x628] sm:$0xf] %v458_v5  ;;  %v462_v7 = vld [vmem:[%s9231_s28 + $0x634] sm:$0xf]  ;;  %v464_v8 = vld [vmem:[%s9231_s28 + $0x638] sm:$0xf] }
  0x87   : > { %461 = vst [vmem:[%s9227_s25 + $0x630] sm:$0xf] %v460_v6  ;;  %463 = vst [vmem:[%s9227_s25 + $0x638] sm:$0xf] %v462_v7  ;;  %v466_v9 = vld [vmem:[%s9231_s28 + $0x648] sm:$0xf] }
  0x88   : > { %465 = vst [vmem:[%s9227_s25 + $0x640] sm:$0xf] %v464_v8  ;;  %v468_v10 = vld [vmem:[%s9231_s28 + $0x64c] sm:$0xf]  ;;  %v470_v11 = vld [vmem:[%s9231_s28 + $0x650] sm:$0xf] }
  0x89   : > { %467 = vst [vmem:[%s9227_s25 + $0x648] sm:$0xf] %v466_v9  ;;  %469 = vst [vmem:[%s9227_s25 + $0x650] sm:$0xf] %v468_v10  ;;  %v472_v12 = vld [vmem:[%s9231_s28 + $0x660] sm:$0xf] }
  0x8a   : > { %471 = vst [vmem:[%s9227_s25 + $0x658] sm:$0xf] %v470_v11  ;;  %v474_v13 = vld [vmem:[%s9231_s28 + $0x664] sm:$0xf]  ;;  %v476_v14 = vld [vmem:[%s9231_s28 + $0x668] sm:$0xf] }
  0x8b   : > { %473 = vst [vmem:[%s9227_s25 + $0x660] sm:$0xf] %v472_v12  ;;  %475 = vst [vmem:[%s9227_s25 + $0x668] sm:$0xf] %v474_v13  ;;  %v478_v15 = vld [vmem:[%s9231_s28 + $0x678] sm:$0xf] }
  0x8c   : > { %477 = vst [vmem:[%s9227_s25 + $0x670] sm:$0xf] %v476_v14  ;;  %v480_v16 = vld [vmem:[%s9231_s28 + $0x67c] sm:$0xf]  ;;  %v482_v17 = vld [vmem:[%s9231_s28 + $0x680] sm:$0xf] }
  0x8d   : > { %479 = vst [vmem:[%s9227_s25 + $0x678] sm:$0xf] %v478_v15  ;;  %481 = vst [vmem:[%s9227_s25 + $0x680] sm:$0xf] %v480_v16  ;;  %v484_v18 = vld [vmem:[%s9231_s28 + $0x690] sm:$0xf] }
  0x8e   : > { %483 = vst [vmem:[%s9227_s25 + $0x688] sm:$0xf] %v482_v17  ;;  %v486_v19 = vld [vmem:[%s9231_s28 + $0x694] sm:$0xf]  ;;  %v488_v20 = vld [vmem:[%s9231_s28 + $0x698] sm:$0xf] }
  0x8f   : > { %485 = vst [vmem:[%s9227_s25 + $0x690] sm:$0xf] %v484_v18  ;;  %487 = vst [vmem:[%s9227_s25 + $0x698] sm:$0xf] %v486_v19  ;;  %v490_v21 = vld [vmem:[%s9231_s28 + $0x6a8] sm:$0xf] }
  0x90   : > { %489 = vst [vmem:[%s9227_s25 + $0x6a0] sm:$0xf] %v488_v20  ;;  %v492_v22 = vld [vmem:[%s9231_s28 + $0x6ac] sm:$0xf]  ;;  %v494_v23 = vld [vmem:[%s9231_s28 + $0x6b0] sm:$0xf] }
  0x91   : > { %491 = vst [vmem:[%s9227_s25 + $0x6a8] sm:$0xf] %v490_v21  ;;  %493 = vst [vmem:[%s9227_s25 + $0x6b0] sm:$0xf] %v492_v22  ;;  %v496_v24 = vld [vmem:[%s9231_s28 + $0x6c0] sm:$0xf] }
  0x92   : > { %495 = vst [vmem:[%s9227_s25 + $0x6b8] sm:$0xf] %v494_v23  ;;  %v498_v25 = vld [vmem:[%s9231_s28 + $0x6c4] sm:$0xf]  ;;  %v500_v26 = vld [vmem:[%s9231_s28 + $0x6c8] sm:$0xf] }
  0x93   : > { %497 = vst [vmem:[%s9227_s25 + $0x6c0] sm:$0xf] %v496_v24  ;;  %499 = vst [vmem:[%s9227_s25 + $0x6c8] sm:$0xf] %v498_v25  ;;  %v502_v27 = vld [vmem:[%s9231_s28 + $0x6d8] sm:$0xf] }
  0x94   : > { %501 = vst [vmem:[%s9227_s25 + $0x6d0] sm:$0xf] %v500_v26  ;;  %v504_v28 = vld [vmem:[%s9231_s28 + $0x6dc] sm:$0xf]  ;;  %v506_v29 = vld [vmem:[%s9231_s28 + $0x6e0] sm:$0xf] }
  0x95   : > { %503 = vst [vmem:[%s9227_s25 + $0x6d8] sm:$0xf] %v502_v27  ;;  %505 = vst [vmem:[%s9227_s25 + $0x6e0] sm:$0xf] %v504_v28  ;;  %v508_v30 = vld [vmem:[%s9231_s28 + $0x6f0] sm:$0xf] }
  0x96   : > { %507 = vst [vmem:[%s9227_s25 + $0x6e8] sm:$0xf] %v506_v29  ;;  %v510_v31 = vld [vmem:[%s9231_s28 + $0x6f4] sm:$0xf]  ;;  %v512_v32 = vld [vmem:[%s9231_s28 + $0x6f8] sm:$0xf] }
  0x97   : > { %509 = vst [vmem:[%s9227_s25 + $0x6f0] sm:$0xf] %v508_v30  ;;  %511 = vst [vmem:[%s9227_s25 + $0x6f8] sm:$0xf] %v510_v31  ;;  %v514_v33 = vld [vmem:[%s9231_s28 + $0x708] sm:$0xf] }
  0x98   : > { %513 = vst [vmem:[%s9227_s25 + $0x700] sm:$0xf] %v512_v32  ;;  %v516_v34 = vld [vmem:[%s9231_s28 + $0x70c] sm:$0xf]  ;;  %v518_v35 = vld [vmem:[%s9231_s28 + $0x710] sm:$0xf] }
  0x99   : > { %515 = vst [vmem:[%s9227_s25 + $0x708] sm:$0xf] %v514_v33  ;;  %517 = vst [vmem:[%s9227_s25 + $0x710] sm:$0xf] %v516_v34  ;;  %v520_v36 = vld [vmem:[%s9231_s28 + $0x720] sm:$0xf] }
  0x9a   : > { %519 = vst [vmem:[%s9227_s25 + $0x718] sm:$0xf] %v518_v35  ;;  %v522_v37 = vld [vmem:[%s9231_s28 + $0x724] sm:$0xf]  ;;  %v524_v38 = vld [vmem:[%s9231_s28 + $0x728] sm:$0xf] }
  0x9b   : > { %521 = vst [vmem:[%s9227_s25 + $0x720] sm:$0xf] %v520_v36  ;;  %523 = vst [vmem:[%s9227_s25 + $0x728] sm:$0xf] %v522_v37  ;;  %v526_v39 = vld [vmem:[%s9231_s28 + $0x738] sm:$0xf] }
  0x9c   : > { %525 = vst [vmem:[%s9227_s25 + $0x730] sm:$0xf] %v524_v38  ;;  %v528_v40 = vld [vmem:[%s9231_s28 + $0x73c] sm:$0xf]  ;;  %v530_v41 = vld [vmem:[%s9231_s28 + $0x740] sm:$0xf] }
  0x9d   : > { %527 = vst [vmem:[%s9227_s25 + $0x738] sm:$0xf] %v526_v39  ;;  %529 = vst [vmem:[%s9227_s25 + $0x740] sm:$0xf] %v528_v40  ;;  %v532_v42 = vld [vmem:[%s9231_s28 + $0x750] sm:$0xf] }
  0x9e   : > { %531 = vst [vmem:[%s9227_s25 + $0x748] sm:$0xf] %v530_v41  ;;  %v534_v43 = vld [vmem:[%s9231_s28 + $0x754] sm:$0xf]  ;;  %v536_v44 = vld [vmem:[%s9231_s28 + $0x758] sm:$0xf] }
  0x9f   : > { %533 = vst [vmem:[%s9227_s25 + $0x750] sm:$0xf] %v532_v42  ;;  %535 = vst [vmem:[%s9227_s25 + $0x758] sm:$0xf] %v534_v43  ;;  %v538_v45 = vld [vmem:[%s9231_s28 + $0x768] sm:$0xf] }
  0xa0   : > { %537 = vst [vmem:[%s9227_s25 + $0x760] sm:$0xf] %v536_v44  ;;  %v540_v46 = vld [vmem:[%s9231_s28 + $0x76c] sm:$0xf]  ;;  %v542_v47 = vld [vmem:[%s9231_s28 + $0x770] sm:$0xf] }
  0xa1   : > { %539 = vst [vmem:[%s9227_s25 + $0x768] sm:$0xf] %v538_v45  ;;  %541 = vst [vmem:[%s9227_s25 + $0x770] sm:$0xf] %v540_v46  ;;  %v544_v48 = vld [vmem:[%s9231_s28 + $0x780] sm:$0xf] }
  0xa2   : > { %543 = vst [vmem:[%s9227_s25 + $0x778] sm:$0xf] %v542_v47  ;;  %v546_v49 = vld [vmem:[%s9231_s28 + $0x784] sm:$0xf]  ;;  %v548_v50 = vld [vmem:[%s9231_s28 + $0x788] sm:$0xf] }
  0xa3   : > { %545 = vst [vmem:[%s9227_s25 + $0x780] sm:$0xf] %v544_v48  ;;  %547 = vst [vmem:[%s9227_s25 + $0x788] sm:$0xf] %v546_v49  ;;  %v550_v51 = vld [vmem:[%s9231_s28 + $0x798] sm:$0xf] }
  0xa4   : > { %549 = vst [vmem:[%s9227_s25 + $0x790] sm:$0xf] %v548_v50  ;;  %v552_v52 = vld [vmem:[%s9231_s28 + $0x79c] sm:$0xf]  ;;  %v554_v53 = vld [vmem:[%s9231_s28 + $0x7a0] sm:$0xf] }
  0xa5   : > { %551 = vst [vmem:[%s9227_s25 + $0x798] sm:$0xf] %v550_v51  ;;  %553 = vst [vmem:[%s9227_s25 + $0x7a0] sm:$0xf] %v552_v52  ;;  %v556_v54 = vld [vmem:[%s9231_s28 + $0x7b0] sm:$0xf] }
  0xa6   : > { %555 = vst [vmem:[%s9227_s25 + $0x7a8] sm:$0xf] %v554_v53  ;;  %v558_v55 = vld [vmem:[%s9231_s28 + $0x7b4] sm:$0xf]  ;;  %v560_v56 = vld [vmem:[%s9231_s28 + $0x7b8] sm:$0xf] }
  0xa7   : > { %557 = vst [vmem:[%s9227_s25 + $0x7b0] sm:$0xf] %v556_v54  ;;  %559 = vst [vmem:[%s9227_s25 + $0x7b8] sm:$0xf] %v558_v55  ;;  %v562_v57 = vld [vmem:[%s9231_s28 + $0x7c8] sm:$0xf] }
  0xa8   : > { %561 = vst [vmem:[%s9227_s25 + $0x7c0] sm:$0xf] %v560_v56  ;;  %v564_v58 = vld [vmem:[%s9231_s28 + $0x7cc] sm:$0xf]  ;;  %v566_v59 = vld [vmem:[%s9231_s28 + $0x7d0] sm:$0xf] }
  0xa9   : > { %563 = vst [vmem:[%s9227_s25 + $0x7c8] sm:$0xf] %v562_v57  ;;  %565 = vst [vmem:[%s9227_s25 + $0x7d0] sm:$0xf] %v564_v58  ;;  %v568_v60 = vld [vmem:[%s9231_s28 + $0x7e0] sm:$0xf] }
  0xaa   : > { %567 = vst [vmem:[%s9227_s25 + $0x7d8] sm:$0xf] %v566_v59  ;;  %v570_v61 = vld [vmem:[%s9231_s28 + $0x7e4] sm:$0xf]  ;;  %v572_v62 = vld [vmem:[%s9231_s28 + $0x7e8] sm:$0xf] }
  0xab   : > { %569 = vst [vmem:[%s9227_s25 + $0x7e0] sm:$0xf] %v568_v60  ;;  %571 = vst [vmem:[%s9227_s25 + $0x7e8] sm:$0xf] %v570_v61  ;;  %v574_v63 = vld [vmem:[%s9231_s28 + $0x7f8] sm:$0xf] }
  0xac   : > { %573 = vst [vmem:[%s9227_s25 + $0x7f0] sm:$0xf] %v572_v62  ;;  %v576_v0 = vld [vmem:[%s9231_s28 + $0x7fc] sm:$0xf]  ;;  %v578_v1 = vld [vmem:[%s9231_s28 + $0x800] sm:$0xf] }
  0xad   : > { %575 = vst [vmem:[%s9227_s25 + $0x7f8] sm:$0xf] %v574_v63  ;;  %577 = vst [vmem:[%s9227_s25 + $0x800] sm:$0xf] %v576_v0  ;;  %v580_v2 = vld [vmem:[%s9231_s28 + $0x810] sm:$0xf] }
  0xae   : > { %579 = vst [vmem:[%s9227_s25 + $0x808] sm:$0xf] %v578_v1  ;;  %v582_v3 = vld [vmem:[%s9231_s28 + $0x814] sm:$0xf]  ;;  %v584_v4 = vld [vmem:[%s9231_s28 + $0x818] sm:$0xf] }
  0xaf   : > { %581 = vst [vmem:[%s9227_s25 + $0x810] sm:$0xf] %v580_v2  ;;  %583 = vst [vmem:[%s9227_s25 + $0x818] sm:$0xf] %v582_v3  ;;  %v586_v5 = vld [vmem:[%s9231_s28 + $0x828] sm:$0xf] }
  0xb0   : > { %585 = vst [vmem:[%s9227_s25 + $0x820] sm:$0xf] %v584_v4  ;;  %v588_v6 = vld [vmem:[%s9231_s28 + $0x82c] sm:$0xf]  ;;  %v590_v7 = vld [vmem:[%s9231_s28 + $0x830] sm:$0xf] }
  0xb1   : > { %587 = vst [vmem:[%s9227_s25 + $0x828] sm:$0xf] %v586_v5  ;;  %589 = vst [vmem:[%s9227_s25 + $0x830] sm:$0xf] %v588_v6  ;;  %v592_v8 = vld [vmem:[%s9231_s28 + $0x840] sm:$0xf] }
  0xb2   : > { %591 = vst [vmem:[%s9227_s25 + $0x838] sm:$0xf] %v590_v7  ;;  %v594_v9 = vld [vmem:[%s9231_s28 + $0x844] sm:$0xf]  ;;  %v596_v10 = vld [vmem:[%s9231_s28 + $0x848] sm:$0xf] }
  0xb3   : > { %593 = vst [vmem:[%s9227_s25 + $0x840] sm:$0xf] %v592_v8  ;;  %595 = vst [vmem:[%s9227_s25 + $0x848] sm:$0xf] %v594_v9  ;;  %v598_v11 = vld [vmem:[%s9231_s28 + $0x858] sm:$0xf] }
  0xb4   : > { %597 = vst [vmem:[%s9227_s25 + $0x850] sm:$0xf] %v596_v10  ;;  %v600_v12 = vld [vmem:[%s9231_s28 + $0x85c] sm:$0xf]  ;;  %v602_v13 = vld [vmem:[%s9231_s28 + $0x860] sm:$0xf] }
  0xb5   : > { %599 = vst [vmem:[%s9227_s25 + $0x858] sm:$0xf] %v598_v11  ;;  %601 = vst [vmem:[%s9227_s25 + $0x860] sm:$0xf] %v600_v12  ;;  %v604_v14 = vld [vmem:[%s9231_s28 + $0x870] sm:$0xf] }
  0xb6   : > { %603 = vst [vmem:[%s9227_s25 + $0x868] sm:$0xf] %v602_v13  ;;  %v606_v15 = vld [vmem:[%s9231_s28 + $0x874] sm:$0xf]  ;;  %v608_v16 = vld [vmem:[%s9231_s28 + $0x878] sm:$0xf] }
  0xb7   : > { %605 = vst [vmem:[%s9227_s25 + $0x870] sm:$0xf] %v604_v14  ;;  %607 = vst [vmem:[%s9227_s25 + $0x878] sm:$0xf] %v606_v15  ;;  %v610_v17 = vld [vmem:[%s9231_s28 + $0x888] sm:$0xf] }
  0xb8   : > { %609 = vst [vmem:[%s9227_s25 + $0x880] sm:$0xf] %v608_v16  ;;  %v612_v18 = vld [vmem:[%s9231_s28 + $0x88c] sm:$0xf]  ;;  %v614_v19 = vld [vmem:[%s9231_s28 + $0x890] sm:$0xf] }
  0xb9   : > { %611 = vst [vmem:[%s9227_s25 + $0x888] sm:$0xf] %v610_v17  ;;  %613 = vst [vmem:[%s9227_s25 + $0x890] sm:$0xf] %v612_v18  ;;  %v616_v20 = vld [vmem:[%s9231_s28 + $0x8a0] sm:$0xf] }
  0xba   : > { %615 = vst [vmem:[%s9227_s25 + $0x898] sm:$0xf] %v614_v19  ;;  %v618_v21 = vld [vmem:[%s9231_s28 + $0x8a4] sm:$0xf]  ;;  %v620_v22 = vld [vmem:[%s9231_s28 + $0x8a8] sm:$0xf] }
  0xbb   : > { %617 = vst [vmem:[%s9227_s25 + $0x8a0] sm:$0xf] %v616_v20  ;;  %619 = vst [vmem:[%s9227_s25 + $0x8a8] sm:$0xf] %v618_v21  ;;  %v622_v23 = vld [vmem:[%s9231_s28 + $0x8b8] sm:$0xf] }
  0xbc   : > { %621 = vst [vmem:[%s9227_s25 + $0x8b0] sm:$0xf] %v620_v22  ;;  %v624_v24 = vld [vmem:[%s9231_s28 + $0x8bc] sm:$0xf]  ;;  %v626_v25 = vld [vmem:[%s9231_s28 + $0x8c0] sm:$0xf] }
  0xbd   : > { %623 = vst [vmem:[%s9227_s25 + $0x8b8] sm:$0xf] %v622_v23  ;;  %625 = vst [vmem:[%s9227_s25 + $0x8c0] sm:$0xf] %v624_v24  ;;  %v628_v26 = vld [vmem:[%s9231_s28 + $0x8d0] sm:$0xf] }
  0xbe   : > { %627 = vst [vmem:[%s9227_s25 + $0x8c8] sm:$0xf] %v626_v25  ;;  %v630_v27 = vld [vmem:[%s9231_s28 + $0x8d4] sm:$0xf]  ;;  %v632_v28 = vld [vmem:[%s9231_s28 + $0x8d8] sm:$0xf] }
  0xbf   : > { %629 = vst [vmem:[%s9227_s25 + $0x8d0] sm:$0xf] %v628_v26  ;;  %631 = vst [vmem:[%s9227_s25 + $0x8d8] sm:$0xf] %v630_v27  ;;  %v634_v29 = vld [vmem:[%s9231_s28 + $0x8e8] sm:$0xf] }
  0xc0   : > { %633 = vst [vmem:[%s9227_s25 + $0x8e0] sm:$0xf] %v632_v28  ;;  %v636_v30 = vld [vmem:[%s9231_s28 + $0x8ec] sm:$0xf]  ;;  %v638_v31 = vld [vmem:[%s9231_s28 + $0x8f0] sm:$0xf] }
  0xc1   : > { %635 = vst [vmem:[%s9227_s25 + $0x8e8] sm:$0xf] %v634_v29  ;;  %637 = vst [vmem:[%s9227_s25 + $0x8f0] sm:$0xf] %v636_v30  ;;  %v640_v32 = vld [vmem:[%s9231_s28 + $0x900] sm:$0xf] }
  0xc2   : > { %639 = vst [vmem:[%s9227_s25 + $0x8f8] sm:$0xf] %v638_v31  ;;  %v642_v33 = vld [vmem:[%s9231_s28 + $0x904] sm:$0xf]  ;;  %v644_v34 = vld [vmem:[%s9231_s28 + $0x908] sm:$0xf] }
  0xc3   : > { %641 = vst [vmem:[%s9227_s25 + $0x900] sm:$0xf] %v640_v32  ;;  %643 = vst [vmem:[%s9227_s25 + $0x908] sm:$0xf] %v642_v33  ;;  %v646_v35 = vld [vmem:[%s9231_s28 + $0x918] sm:$0xf] }
  0xc4   : > { %645 = vst [vmem:[%s9227_s25 + $0x910] sm:$0xf] %v644_v34  ;;  %v648_v36 = vld [vmem:[%s9231_s28 + $0x91c] sm:$0xf]  ;;  %v650_v37 = vld [vmem:[%s9231_s28 + $0x920] sm:$0xf] }
  0xc5   : > { %647 = vst [vmem:[%s9227_s25 + $0x918] sm:$0xf] %v646_v35  ;;  %649 = vst [vmem:[%s9227_s25 + $0x920] sm:$0xf] %v648_v36  ;;  %v652_v38 = vld [vmem:[%s9231_s28 + $0x930] sm:$0xf] }
  0xc6   : > { %651 = vst [vmem:[%s9227_s25 + $0x928] sm:$0xf] %v650_v37  ;;  %v654_v39 = vld [vmem:[%s9231_s28 + $0x934] sm:$0xf]  ;;  %v656_v40 = vld [vmem:[%s9231_s28 + $0x938] sm:$0xf] }
  0xc7   : > { %653 = vst [vmem:[%s9227_s25 + $0x930] sm:$0xf] %v652_v38  ;;  %655 = vst [vmem:[%s9227_s25 + $0x938] sm:$0xf] %v654_v39  ;;  %v658_v41 = vld [vmem:[%s9231_s28 + $0x948] sm:$0xf] }
  0xc8   : > { %657 = vst [vmem:[%s9227_s25 + $0x940] sm:$0xf] %v656_v40  ;;  %v660_v42 = vld [vmem:[%s9231_s28 + $0x94c] sm:$0xf]  ;;  %v662_v43 = vld [vmem:[%s9231_s28 + $0x950] sm:$0xf] }
  0xc9   : > { %659 = vst [vmem:[%s9227_s25 + $0x948] sm:$0xf] %v658_v41  ;;  %661 = vst [vmem:[%s9227_s25 + $0x950] sm:$0xf] %v660_v42  ;;  %v664_v44 = vld [vmem:[%s9231_s28 + $0x960] sm:$0xf] }
  0xca   : > { %663 = vst [vmem:[%s9227_s25 + $0x958] sm:$0xf] %v662_v43  ;;  %v666_v45 = vld [vmem:[%s9231_s28 + $0x964] sm:$0xf]  ;;  %v668_v46 = vld [vmem:[%s9231_s28 + $0x968] sm:$0xf] }
  0xcb   : > { %665 = vst [vmem:[%s9227_s25 + $0x960] sm:$0xf] %v664_v44  ;;  %667 = vst [vmem:[%s9227_s25 + $0x968] sm:$0xf] %v666_v45  ;;  %v670_v47 = vld [vmem:[%s9231_s28 + $0x978] sm:$0xf] }
  0xcc   : > { %669 = vst [vmem:[%s9227_s25 + $0x970] sm:$0xf] %v668_v46  ;;  %v672_v48 = vld [vmem:[%s9231_s28 + $0x97c] sm:$0xf]  ;;  %v674_v49 = vld [vmem:[%s9231_s28 + $0x980] sm:$0xf] }
  0xcd   : > { %671 = vst [vmem:[%s9227_s25 + $0x978] sm:$0xf] %v670_v47  ;;  %673 = vst [vmem:[%s9227_s25 + $0x980] sm:$0xf] %v672_v48  ;;  %v676_v50 = vld [vmem:[%s9231_s28 + $0x990] sm:$0xf] }
  0xce   : > { %675 = vst [vmem:[%s9227_s25 + $0x988] sm:$0xf] %v674_v49  ;;  %v678_v51 = vld [vmem:[%s9231_s28 + $0x994] sm:$0xf]  ;;  %v680_v52 = vld [vmem:[%s9231_s28 + $0x998] sm:$0xf] }
  0xcf   : > { %677 = vst [vmem:[%s9227_s25 + $0x990] sm:$0xf] %v676_v50  ;;  %679 = vst [vmem:[%s9227_s25 + $0x998] sm:$0xf] %v678_v51  ;;  %v682_v53 = vld [vmem:[%s9231_s28 + $0x9a8] sm:$0xf] }
  0xd0   : > { %681 = vst [vmem:[%s9227_s25 + $0x9a0] sm:$0xf] %v680_v52  ;;  %v684_v54 = vld [vmem:[%s9231_s28 + $0x9ac] sm:$0xf]  ;;  %v686_v55 = vld [vmem:[%s9231_s28 + $0x9b0] sm:$0xf] }
  0xd1   : > { %683 = vst [vmem:[%s9227_s25 + $0x9a8] sm:$0xf] %v682_v53  ;;  %685 = vst [vmem:[%s9227_s25 + $0x9b0] sm:$0xf] %v684_v54  ;;  %v688_v56 = vld [vmem:[%s9231_s28 + $0x9c0] sm:$0xf] }
  0xd2   : > { %687 = vst [vmem:[%s9227_s25 + $0x9b8] sm:$0xf] %v686_v55  ;;  %v690_v57 = vld [vmem:[%s9231_s28 + $0x9c4] sm:$0xf]  ;;  %v692_v58 = vld [vmem:[%s9231_s28 + $0x9c8] sm:$0xf] }
  0xd3   : > { %689 = vst [vmem:[%s9227_s25 + $0x9c0] sm:$0xf] %v688_v56  ;;  %691 = vst [vmem:[%s9227_s25 + $0x9c8] sm:$0xf] %v690_v57  ;;  %v694_v59 = vld [vmem:[%s9231_s28 + $0x9d8] sm:$0xf] }
  0xd4   : > { %693 = vst [vmem:[%s9227_s25 + $0x9d0] sm:$0xf] %v692_v58  ;;  %v696_v60 = vld [vmem:[%s9231_s28 + $0x9dc] sm:$0xf]  ;;  %v698_v61 = vld [vmem:[%s9231_s28 + $0x9e0] sm:$0xf] }
  0xd5   : > { %695 = vst [vmem:[%s9227_s25 + $0x9d8] sm:$0xf] %v694_v59  ;;  %697 = vst [vmem:[%s9227_s25 + $0x9e0] sm:$0xf] %v696_v60  ;;  %v700_v62 = vld [vmem:[%s9231_s28 + $0x9f0] sm:$0xf] }
  0xd6   : > { %699 = vst [vmem:[%s9227_s25 + $0x9e8] sm:$0xf] %v698_v61  ;;  %v702_v63 = vld [vmem:[%s9231_s28 + $0x9f4] sm:$0xf]  ;;  %v704_v0 = vld [vmem:[%s9231_s28 + $0x9f8] sm:$0xf] }
  0xd7   : > { %701 = vst [vmem:[%s9227_s25 + $0x9f0] sm:$0xf] %v700_v62  ;;  %703 = vst [vmem:[%s9227_s25 + $0x9f8] sm:$0xf] %v702_v63  ;;  %v706_v1 = vld [vmem:[%s9231_s28 + $0xa08] sm:$0xf] }
  0xd8   : > { %705 = vst [vmem:[%s9227_s25 + $0xa00] sm:$0xf] %v704_v0  ;;  %v708_v2 = vld [vmem:[%s9231_s28 + $0xa0c] sm:$0xf]  ;;  %v710_v3 = vld [vmem:[%s9231_s28 + $0xa10] sm:$0xf] }
  0xd9   : > { %707 = vst [vmem:[%s9227_s25 + $0xa08] sm:$0xf] %v706_v1  ;;  %709 = vst [vmem:[%s9227_s25 + $0xa10] sm:$0xf] %v708_v2  ;;  %v712_v4 = vld [vmem:[%s9231_s28 + $0xa20] sm:$0xf] }
  0xda   : > { %711 = vst [vmem:[%s9227_s25 + $0xa18] sm:$0xf] %v710_v3  ;;  %v714_v5 = vld [vmem:[%s9231_s28 + $0xa24] sm:$0xf]  ;;  %v716_v6 = vld [vmem:[%s9231_s28 + $0xa28] sm:$0xf] }
  0xdb   : > { %713 = vst [vmem:[%s9227_s25 + $0xa20] sm:$0xf] %v712_v4  ;;  %715 = vst [vmem:[%s9227_s25 + $0xa28] sm:$0xf] %v714_v5  ;;  %v718_v7 = vld [vmem:[%s9231_s28 + $0xa38] sm:$0xf] }
  0xdc   : > { %717 = vst [vmem:[%s9227_s25 + $0xa30] sm:$0xf] %v716_v6  ;;  %v720_v8 = vld [vmem:[%s9231_s28 + $0xa3c] sm:$0xf]  ;;  %v722_v9 = vld [vmem:[%s9231_s28 + $0xa40] sm:$0xf] }
  0xdd   : > { %719 = vst [vmem:[%s9227_s25 + $0xa38] sm:$0xf] %v718_v7  ;;  %721 = vst [vmem:[%s9227_s25 + $0xa40] sm:$0xf] %v720_v8  ;;  %v724_v10 = vld [vmem:[%s9231_s28 + $0xa50] sm:$0xf] }
  0xde   : > { %723 = vst [vmem:[%s9227_s25 + $0xa48] sm:$0xf] %v722_v9  ;;  %v726_v11 = vld [vmem:[%s9231_s28 + $0xa54] sm:$0xf]  ;;  %v728_v12 = vld [vmem:[%s9231_s28 + $0xa58] sm:$0xf] }
  0xdf   : > { %725 = vst [vmem:[%s9227_s25 + $0xa50] sm:$0xf] %v724_v10  ;;  %727 = vst [vmem:[%s9227_s25 + $0xa58] sm:$0xf] %v726_v11  ;;  %v730_v13 = vld [vmem:[%s9231_s28 + $0xa68] sm:$0xf] }
  0xe0   : > { %729 = vst [vmem:[%s9227_s25 + $0xa60] sm:$0xf] %v728_v12  ;;  %v732_v14 = vld [vmem:[%s9231_s28 + $0xa6c] sm:$0xf]  ;;  %v734_v15 = vld [vmem:[%s9231_s28 + $0xa70] sm:$0xf] }
  0xe1   : > { %731 = vst [vmem:[%s9227_s25 + $0xa68] sm:$0xf] %v730_v13  ;;  %733 = vst [vmem:[%s9227_s25 + $0xa70] sm:$0xf] %v732_v14  ;;  %v736_v16 = vld [vmem:[%s9231_s28 + $0xa80] sm:$0xf] }
  0xe2   : > { %735 = vst [vmem:[%s9227_s25 + $0xa78] sm:$0xf] %v734_v15  ;;  %v738_v17 = vld [vmem:[%s9231_s28 + $0xa84] sm:$0xf]  ;;  %v740_v18 = vld [vmem:[%s9231_s28 + $0xa88] sm:$0xf] }
  0xe3   : > { %737 = vst [vmem:[%s9227_s25 + $0xa80] sm:$0xf] %v736_v16  ;;  %739 = vst [vmem:[%s9227_s25 + $0xa88] sm:$0xf] %v738_v17  ;;  %v742_v19 = vld [vmem:[%s9231_s28 + $0xa98] sm:$0xf] }
  0xe4   : > { %741 = vst [vmem:[%s9227_s25 + $0xa90] sm:$0xf] %v740_v18  ;;  %v744_v20 = vld [vmem:[%s9231_s28 + $0xa9c] sm:$0xf]  ;;  %v746_v21 = vld [vmem:[%s9231_s28 + $0xaa0] sm:$0xf] }
  0xe5   : > { %743 = vst [vmem:[%s9227_s25 + $0xa98] sm:$0xf] %v742_v19  ;;  %745 = vst [vmem:[%s9227_s25 + $0xaa0] sm:$0xf] %v744_v20  ;;  %v748_v22 = vld [vmem:[%s9231_s28 + $0xab0] sm:$0xf] }
  0xe6   : > { %747 = vst [vmem:[%s9227_s25 + $0xaa8] sm:$0xf] %v746_v21  ;;  %v750_v23 = vld [vmem:[%s9231_s28 + $0xab4] sm:$0xf]  ;;  %v752_v24 = vld [vmem:[%s9231_s28 + $0xab8] sm:$0xf] }
  0xe7   : > { %749 = vst [vmem:[%s9227_s25 + $0xab0] sm:$0xf] %v748_v22  ;;  %751 = vst [vmem:[%s9227_s25 + $0xab8] sm:$0xf] %v750_v23  ;;  %v754_v25 = vld [vmem:[%s9231_s28 + $0xac8] sm:$0xf] }
  0xe8   : > { %753 = vst [vmem:[%s9227_s25 + $0xac0] sm:$0xf] %v752_v24  ;;  %v756_v26 = vld [vmem:[%s9231_s28 + $0xacc] sm:$0xf]  ;;  %v758_v27 = vld [vmem:[%s9231_s28 + $0xad0] sm:$0xf] }
  0xe9   : > { %755 = vst [vmem:[%s9227_s25 + $0xac8] sm:$0xf] %v754_v25  ;;  %757 = vst [vmem:[%s9227_s25 + $0xad0] sm:$0xf] %v756_v26  ;;  %v760_v28 = vld [vmem:[%s9231_s28 + $0xae0] sm:$0xf] }
  0xea   : > { %759 = vst [vmem:[%s9227_s25 + $0xad8] sm:$0xf] %v758_v27  ;;  %v762_v29 = vld [vmem:[%s9231_s28 + $0xae4] sm:$0xf]  ;;  %v764_v30 = vld [vmem:[%s9231_s28 + $0xae8] sm:$0xf] }
  0xeb   : > { %761 = vst [vmem:[%s9227_s25 + $0xae0] sm:$0xf] %v760_v28  ;;  %763 = vst [vmem:[%s9227_s25 + $0xae8] sm:$0xf] %v762_v29  ;;  %v766_v31 = vld [vmem:[%s9231_s28 + $0xaf8] sm:$0xf] }
  0xec   : > { %765 = vst [vmem:[%s9227_s25 + $0xaf0] sm:$0xf] %v764_v30  ;;  %v768_v32 = vld [vmem:[%s9231_s28 + $0xafc] sm:$0xf]  ;;  %v770_v33 = vld [vmem:[%s9231_s28 + $0xb00] sm:$0xf] }
  0xed   : > { %767 = vst [vmem:[%s9227_s25 + $0xaf8] sm:$0xf] %v766_v31  ;;  %769 = vst [vmem:[%s9227_s25 + $0xb00] sm:$0xf] %v768_v32  ;;  %v772_v34 = vld [vmem:[%s9231_s28 + $0xb10] sm:$0xf] }
  0xee   : > { %771 = vst [vmem:[%s9227_s25 + $0xb08] sm:$0xf] %v770_v33  ;;  %v774_v35 = vld [vmem:[%s9231_s28 + $0xb14] sm:$0xf]  ;;  %v776_v36 = vld [vmem:[%s9231_s28 + $0xb18] sm:$0xf] }
  0xef   : > { %773 = vst [vmem:[%s9227_s25 + $0xb10] sm:$0xf] %v772_v34  ;;  %775 = vst [vmem:[%s9227_s25 + $0xb18] sm:$0xf] %v774_v35  ;;  %v778_v37 = vld [vmem:[%s9231_s28 + $0xb28] sm:$0xf] }
  0xf0   : > { %777 = vst [vmem:[%s9227_s25 + $0xb20] sm:$0xf] %v776_v36  ;;  %v780_v38 = vld [vmem:[%s9231_s28 + $0xb2c] sm:$0xf]  ;;  %v782_v39 = vld [vmem:[%s9231_s28 + $0xb30] sm:$0xf] }
  0xf1   : > { %779 = vst [vmem:[%s9227_s25 + $0xb28] sm:$0xf] %v778_v37  ;;  %781 = vst [vmem:[%s9227_s25 + $0xb30] sm:$0xf] %v780_v38  ;;  %v784_v40 = vld [vmem:[%s9231_s28 + $0xb40] sm:$0xf] }
  0xf2   : > { %783 = vst [vmem:[%s9227_s25 + $0xb38] sm:$0xf] %v782_v39  ;;  %v786_v41 = vld [vmem:[%s9231_s28 + $0xb44] sm:$0xf]  ;;  %v788_v42 = vld [vmem:[%s9231_s28 + $0xb48] sm:$0xf] }
  0xf3   : > { %785 = vst [vmem:[%s9227_s25 + $0xb40] sm:$0xf] %v784_v40  ;;  %787 = vst [vmem:[%s9227_s25 + $0xb48] sm:$0xf] %v786_v41  ;;  %v790_v43 = vld [vmem:[%s9231_s28 + $0xb58] sm:$0xf] }
  0xf4   : > { %789 = vst [vmem:[%s9227_s25 + $0xb50] sm:$0xf] %v788_v42  ;;  %v792_v44 = vld [vmem:[%s9231_s28 + $0xb5c] sm:$0xf]  ;;  %v794_v45 = vld [vmem:[%s9231_s28 + $0xb60] sm:$0xf] }
  0xf5   : > { %791 = vst [vmem:[%s9227_s25 + $0xb58] sm:$0xf] %v790_v43  ;;  %793 = vst [vmem:[%s9227_s25 + $0xb60] sm:$0xf] %v792_v44  ;;  %v796_v46 = vld [vmem:[%s9231_s28 + $0xb70] sm:$0xf] }
  0xf6   : > { %795 = vst [vmem:[%s9227_s25 + $0xb68] sm:$0xf] %v794_v45  ;;  %v798_v47 = vld [vmem:[%s9231_s28 + $0xb74] sm:$0xf]  ;;  %v800_v48 = vld [vmem:[%s9231_s28 + $0xb78] sm:$0xf] }
  0xf7   : > { %797 = vst [vmem:[%s9227_s25 + $0xb70] sm:$0xf] %v796_v46  ;;  %799 = vst [vmem:[%s9227_s25 + $0xb78] sm:$0xf] %v798_v47  ;;  %v802_v49 = vld [vmem:[%s9231_s28 + $0xb88] sm:$0xf] }
  0xf8   : > { %801 = vst [vmem:[%s9227_s25 + $0xb80] sm:$0xf] %v800_v48  ;;  %v804_v50 = vld [vmem:[%s9231_s28 + $0xb8c] sm:$0xf]  ;;  %v806_v51 = vld [vmem:[%s9231_s28 + $0xb90] sm:$0xf] }
  0xf9   : > { %803 = vst [vmem:[%s9227_s25 + $0xb88] sm:$0xf] %v802_v49  ;;  %805 = vst [vmem:[%s9227_s25 + $0xb90] sm:$0xf] %v804_v50  ;;  %v808_v52 = vld [vmem:[%s9231_s28 + $0xba0] sm:$0xf] }
  0xfa   : > { %807 = vst [vmem:[%s9227_s25 + $0xb98] sm:$0xf] %v806_v51  ;;  %v810_v53 = vld [vmem:[%s9231_s28 + $0xba4] sm:$0xf]  ;;  %v812_v54 = vld [vmem:[%s9231_s28 + $0xba8] sm:$0xf] }
  0xfb   : > { %809 = vst [vmem:[%s9227_s25 + $0xba0] sm:$0xf] %v808_v52  ;;  %811 = vst [vmem:[%s9227_s25 + $0xba8] sm:$0xf] %v810_v53  ;;  %v814_v55 = vld [vmem:[%s9231_s28 + $0xbb8] sm:$0xf] }
  0xfc   : > { %813 = vst [vmem:[%s9227_s25 + $0xbb0] sm:$0xf] %v812_v54  ;;  %v816_v56 = vld [vmem:[%s9231_s28 + $0xbbc] sm:$0xf]  ;;  %v818_v57 = vld [vmem:[%s9231_s28 + $0xbc0] sm:$0xf] }
  0xfd   : > { %815 = vst [vmem:[%s9227_s25 + $0xbb8] sm:$0xf] %v814_v55  ;;  %817 = vst [vmem:[%s9227_s25 + $0xbc0] sm:$0xf] %v816_v56  ;;  %v820_v58 = vld [vmem:[%s9231_s28 + $0xbd0] sm:$0xf] }
  0xfe   : > { %819 = vst [vmem:[%s9227_s25 + $0xbc8] sm:$0xf] %v818_v57  ;;  %v822_v59 = vld [vmem:[%s9231_s28 + $0xbd4] sm:$0xf]  ;;  %v824_v60 = vld [vmem:[%s9231_s28 + $0xbd8] sm:$0xf] }
  0xff   : > { %821 = vst [vmem:[%s9227_s25 + $0xbd0] sm:$0xf] %v820_v58  ;;  %823 = vst [vmem:[%s9227_s25 + $0xbd8] sm:$0xf] %v822_v59  ;;  %v826_v61 = vld [vmem:[%s9231_s28 + $0xbe8] sm:$0xf] }
 0x100   : > { %825 = vst [vmem:[%s9227_s25 + $0xbe0] sm:$0xf] %v824_v60  ;;  %v828_v62 = vld [vmem:[%s9231_s28 + $0xbec] sm:$0xf]  ;;  %v830_v63 = vld [vmem:[%s9231_s28 + $0xbf0] sm:$0xf] }
 0x101   : > { %827 = vst [vmem:[%s9227_s25 + $0xbe8] sm:$0xf] %v826_v61  ;;  %829 = vst [vmem:[%s9227_s25 + $0xbf0] sm:$0xf] %v828_v62  ;;  %v832_v0 = vld [vmem:[%s9231_s28 + $0xc00] sm:$0xf] }
 0x102   : > { %831 = vst [vmem:[%s9227_s25 + $0xbf8] sm:$0xf] %v830_v63  ;;  %v834_v1 = vld [vmem:[%s9231_s28 + $0xc04] sm:$0xf]  ;;  %v836_v2 = vld [vmem:[%s9231_s28 + $0xc08] sm:$0xf] }
 0x103   : > { %833 = vst [vmem:[%s9227_s25 + $0xc00] sm:$0xf] %v832_v0  ;;  %835 = vst [vmem:[%s9227_s25 + $0xc08] sm:$0xf] %v834_v1  ;;  %v838_v3 = vld [vmem:[%s9231_s28 + $0xc18] sm:$0xf] }
 0x104   : > { %837 = vst [vmem:[%s9227_s25 + $0xc10] sm:$0xf] %v836_v2  ;;  %v840_v4 = vld [vmem:[%s9231_s28 + $0xc1c] sm:$0xf]  ;;  %v842_v5 = vld [vmem:[%s9231_s28 + $0xc20] sm:$0xf] }
 0x105   : > { %839 = vst [vmem:[%s9227_s25 + $0xc18] sm:$0xf] %v838_v3  ;;  %841 = vst [vmem:[%s9227_s25 + $0xc20] sm:$0xf] %v840_v4  ;;  %v844_v6 = vld [vmem:[%s9231_s28 + $0xc30] sm:$0xf] }
 0x106   : > { %843 = vst [vmem:[%s9227_s25 + $0xc28] sm:$0xf] %v842_v5  ;;  %v846_v7 = vld [vmem:[%s9231_s28 + $0xc34] sm:$0xf]  ;;  %v848_v8 = vld [vmem:[%s9231_s28 + $0xc38] sm:$0xf] }
 0x107   : > { %845 = vst [vmem:[%s9227_s25 + $0xc30] sm:$0xf] %v844_v6  ;;  %847 = vst [vmem:[%s9227_s25 + $0xc38] sm:$0xf] %v846_v7  ;;  %v850_v9 = vld [vmem:[%s9231_s28 + $0xc48] sm:$0xf] }
 0x108   : > { %849 = vst [vmem:[%s9227_s25 + $0xc40] sm:$0xf] %v848_v8  ;;  %v852_v10 = vld [vmem:[%s9231_s28 + $0xc4c] sm:$0xf]  ;;  %v854_v11 = vld [vmem:[%s9231_s28 + $0xc50] sm:$0xf] }
 0x109   : > { %851 = vst [vmem:[%s9227_s25 + $0xc48] sm:$0xf] %v850_v9  ;;  %853 = vst [vmem:[%s9227_s25 + $0xc50] sm:$0xf] %v852_v10  ;;  %v856_v12 = vld [vmem:[%s9231_s28 + $0xc60] sm:$0xf] }
 0x10a   : > { %855 = vst [vmem:[%s9227_s25 + $0xc58] sm:$0xf] %v854_v11  ;;  %v858_v13 = vld [vmem:[%s9231_s28 + $0xc64] sm:$0xf]  ;;  %v860_v14 = vld [vmem:[%s9231_s28 + $0xc68] sm:$0xf] }
 0x10b   : > { %857 = vst [vmem:[%s9227_s25 + $0xc60] sm:$0xf] %v856_v12  ;;  %859 = vst [vmem:[%s9227_s25 + $0xc68] sm:$0xf] %v858_v13  ;;  %v862_v15 = vld [vmem:[%s9231_s28 + $0xc78] sm:$0xf] }
 0x10c   : > { %861 = vst [vmem:[%s9227_s25 + $0xc70] sm:$0xf] %v860_v14  ;;  %v864_v16 = vld [vmem:[%s9231_s28 + $0xc7c] sm:$0xf]  ;;  %v866_v17 = vld [vmem:[%s9231_s28 + $0xc80] sm:$0xf] }
 0x10d   : > { %863 = vst [vmem:[%s9227_s25 + $0xc78] sm:$0xf] %v862_v15  ;;  %865 = vst [vmem:[%s9227_s25 + $0xc80] sm:$0xf] %v864_v16  ;;  %v868_v18 = vld [vmem:[%s9231_s28 + $0xc90] sm:$0xf] }
 0x10e   : > { %867 = vst [vmem:[%s9227_s25 + $0xc88] sm:$0xf] %v866_v17  ;;  %v870_v19 = vld [vmem:[%s9231_s28 + $0xc94] sm:$0xf]  ;;  %v872_v20 = vld [vmem:[%s9231_s28 + $0xc98] sm:$0xf] }
 0x10f   : > { %869 = vst [vmem:[%s9227_s25 + $0xc90] sm:$0xf] %v868_v18  ;;  %871 = vst [vmem:[%s9227_s25 + $0xc98] sm:$0xf] %v870_v19  ;;  %v874_v21 = vld [vmem:[%s9231_s28 + $0xca8] sm:$0xf] }
 0x110   : > { %873 = vst [vmem:[%s9227_s25 + $0xca0] sm:$0xf] %v872_v20  ;;  %v876_v22 = vld [vmem:[%s9231_s28 + $0xcac] sm:$0xf]  ;;  %v878_v23 = vld [vmem:[%s9231_s28 + $0xcb0] sm:$0xf] }
 0x111   : > { %875 = vst [vmem:[%s9227_s25 + $0xca8] sm:$0xf] %v874_v21  ;;  %877 = vst [vmem:[%s9227_s25 + $0xcb0] sm:$0xf] %v876_v22  ;;  %v880_v24 = vld [vmem:[%s9231_s28 + $0xcc0] sm:$0xf] }
 0x112   : > { %879 = vst [vmem:[%s9227_s25 + $0xcb8] sm:$0xf] %v878_v23  ;;  %v882_v25 = vld [vmem:[%s9231_s28 + $0xcc4] sm:$0xf]  ;;  %v884_v26 = vld [vmem:[%s9231_s28 + $0xcc8] sm:$0xf] }
 0x113   : > { %881 = vst [vmem:[%s9227_s25 + $0xcc0] sm:$0xf] %v880_v24  ;;  %883 = vst [vmem:[%s9227_s25 + $0xcc8] sm:$0xf] %v882_v25  ;;  %v886_v27 = vld [vmem:[%s9231_s28 + $0xcd8] sm:$0xf] }
 0x114   : > { %885 = vst [vmem:[%s9227_s25 + $0xcd0] sm:$0xf] %v884_v26  ;;  %v888_v28 = vld [vmem:[%s9231_s28 + $0xcdc] sm:$0xf]  ;;  %v890_v29 = vld [vmem:[%s9231_s28 + $0xce0] sm:$0xf] }
 0x115   : > { %887 = vst [vmem:[%s9227_s25 + $0xcd8] sm:$0xf] %v886_v27  ;;  %889 = vst [vmem:[%s9227_s25 + $0xce0] sm:$0xf] %v888_v28  ;;  %v892_v30 = vld [vmem:[%s9231_s28 + $0xcf0] sm:$0xf] }
 0x116   : > { %891 = vst [vmem:[%s9227_s25 + $0xce8] sm:$0xf] %v890_v29  ;;  %v894_v31 = vld [vmem:[%s9231_s28 + $0xcf4] sm:$0xf]  ;;  %v896_v32 = vld [vmem:[%s9231_s28 + $0xcf8] sm:$0xf] }
 0x117   : > { %893 = vst [vmem:[%s9227_s25 + $0xcf0] sm:$0xf] %v892_v30  ;;  %895 = vst [vmem:[%s9227_s25 + $0xcf8] sm:$0xf] %v894_v31  ;;  %v898_v33 = vld [vmem:[%s9231_s28 + $0xd08] sm:$0xf] }
 0x118   : > { %897 = vst [vmem:[%s9227_s25 + $0xd00] sm:$0xf] %v896_v32  ;;  %v900_v34 = vld [vmem:[%s9231_s28 + $0xd0c] sm:$0xf]  ;;  %v902_v35 = vld [vmem:[%s9231_s28 + $0xd10] sm:$0xf] }
 0x119   : > { %899 = vst [vmem:[%s9227_s25 + $0xd08] sm:$0xf] %v898_v33  ;;  %901 = vst [vmem:[%s9227_s25 + $0xd10] sm:$0xf] %v900_v34  ;;  %v904_v36 = vld [vmem:[%s9231_s28 + $0xd20] sm:$0xf] }
 0x11a   : > { %903 = vst [vmem:[%s9227_s25 + $0xd18] sm:$0xf] %v902_v35  ;;  %v906_v37 = vld [vmem:[%s9231_s28 + $0xd24] sm:$0xf]  ;;  %v908_v38 = vld [vmem:[%s9231_s28 + $0xd28] sm:$0xf] }
 0x11b   : > { %905 = vst [vmem:[%s9227_s25 + $0xd20] sm:$0xf] %v904_v36  ;;  %907 = vst [vmem:[%s9227_s25 + $0xd28] sm:$0xf] %v906_v37  ;;  %v910_v39 = vld [vmem:[%s9231_s28 + $0xd38] sm:$0xf] }
 0x11c   : > { %909 = vst [vmem:[%s9227_s25 + $0xd30] sm:$0xf] %v908_v38  ;;  %v912_v40 = vld [vmem:[%s9231_s28 + $0xd3c] sm:$0xf]  ;;  %v914_v41 = vld [vmem:[%s9231_s28 + $0xd40] sm:$0xf] }
 0x11d   : > { %911 = vst [vmem:[%s9227_s25 + $0xd38] sm:$0xf] %v910_v39  ;;  %913 = vst [vmem:[%s9227_s25 + $0xd40] sm:$0xf] %v912_v40  ;;  %v916_v42 = vld [vmem:[%s9231_s28 + $0xd50] sm:$0xf] }
 0x11e   : > { %915 = vst [vmem:[%s9227_s25 + $0xd48] sm:$0xf] %v914_v41  ;;  %v918_v43 = vld [vmem:[%s9231_s28 + $0xd54] sm:$0xf]  ;;  %v920_v44 = vld [vmem:[%s9231_s28 + $0xd58] sm:$0xf] }
 0x11f   : > { %917 = vst [vmem:[%s9227_s25 + $0xd50] sm:$0xf] %v916_v42  ;;  %919 = vst [vmem:[%s9227_s25 + $0xd58] sm:$0xf] %v918_v43  ;;  %v922_v45 = vld [vmem:[%s9231_s28 + $0xd68] sm:$0xf] }
 0x120   : > { %921 = vst [vmem:[%s9227_s25 + $0xd60] sm:$0xf] %v920_v44  ;;  %v924_v46 = vld [vmem:[%s9231_s28 + $0xd6c] sm:$0xf]  ;;  %v926_v47 = vld [vmem:[%s9231_s28 + $0xd70] sm:$0xf] }
 0x121   : > { %923 = vst [vmem:[%s9227_s25 + $0xd68] sm:$0xf] %v922_v45  ;;  %925 = vst [vmem:[%s9227_s25 + $0xd70] sm:$0xf] %v924_v46  ;;  %v928_v48 = vld [vmem:[%s9231_s28 + $0xd80] sm:$0xf] }
 0x122   : > { %927 = vst [vmem:[%s9227_s25 + $0xd78] sm:$0xf] %v926_v47  ;;  %v930_v49 = vld [vmem:[%s9231_s28 + $0xd84] sm:$0xf]  ;;  %v932_v50 = vld [vmem:[%s9231_s28 + $0xd88] sm:$0xf] }
 0x123   : > { %929 = vst [vmem:[%s9227_s25 + $0xd80] sm:$0xf] %v928_v48  ;;  %931 = vst [vmem:[%s9227_s25 + $0xd88] sm:$0xf] %v930_v49  ;;  %v934_v51 = vld [vmem:[%s9231_s28 + $0xd98] sm:$0xf] }
 0x124   : > { %933 = vst [vmem:[%s9227_s25 + $0xd90] sm:$0xf] %v932_v50  ;;  %v936_v52 = vld [vmem:[%s9231_s28 + $0xd9c] sm:$0xf]  ;;  %v938_v53 = vld [vmem:[%s9231_s28 + $0xda0] sm:$0xf] }
 0x125   : > { %935 = vst [vmem:[%s9227_s25 + $0xd98] sm:$0xf] %v934_v51  ;;  %937 = vst [vmem:[%s9227_s25 + $0xda0] sm:$0xf] %v936_v52  ;;  %v940_v54 = vld [vmem:[%s9231_s28 + $0xdb0] sm:$0xf] }
 0x126   : > { %939 = vst [vmem:[%s9227_s25 + $0xda8] sm:$0xf] %v938_v53  ;;  %v942_v55 = vld [vmem:[%s9231_s28 + $0xdb4] sm:$0xf]  ;;  %v944_v56 = vld [vmem:[%s9231_s28 + $0xdb8] sm:$0xf] }
 0x127   : > { %941 = vst [vmem:[%s9227_s25 + $0xdb0] sm:$0xf] %v940_v54  ;;  %943 = vst [vmem:[%s9227_s25 + $0xdb8] sm:$0xf] %v942_v55  ;;  %v946_v57 = vld [vmem:[%s9231_s28 + $0xdc8] sm:$0xf] }
 0x128   : > { %945 = vst [vmem:[%s9227_s25 + $0xdc0] sm:$0xf] %v944_v56  ;;  %v948_v58 = vld [vmem:[%s9231_s28 + $0xdcc] sm:$0xf]  ;;  %v950_v59 = vld [vmem:[%s9231_s28 + $0xdd0] sm:$0xf] }
 0x129   : > { %947 = vst [vmem:[%s9227_s25 + $0xdc8] sm:$0xf] %v946_v57  ;;  %949 = vst [vmem:[%s9227_s25 + $0xdd0] sm:$0xf] %v948_v58  ;;  %v952_v60 = vld [vmem:[%s9231_s28 + $0xde0] sm:$0xf] }
 0x12a   : > { %951 = vst [vmem:[%s9227_s25 + $0xdd8] sm:$0xf] %v950_v59  ;;  %v954_v61 = vld [vmem:[%s9231_s28 + $0xde4] sm:$0xf]  ;;  %v956_v62 = vld [vmem:[%s9231_s28 + $0xde8] sm:$0xf] }
 0x12b   : > { %953 = vst [vmem:[%s9227_s25 + $0xde0] sm:$0xf] %v952_v60  ;;  %955 = vst [vmem:[%s9227_s25 + $0xde8] sm:$0xf] %v954_v61  ;;  %v958_v63 = vld [vmem:[%s9231_s28 + $0xdf8] sm:$0xf] }
 0x12c   : > { %957 = vst [vmem:[%s9227_s25 + $0xdf0] sm:$0xf] %v956_v62  ;;  %v960_v0 = vld [vmem:[%s9231_s28 + $0xdfc] sm:$0xf]  ;;  %v962_v1 = vld [vmem:[%s9231_s28 + $0xe00] sm:$0xf] }
 0x12d   : > { %959 = vst [vmem:[%s9227_s25 + $0xdf8] sm:$0xf] %v958_v63  ;;  %961 = vst [vmem:[%s9227_s25 + $0xe00] sm:$0xf] %v960_v0  ;;  %v964_v2 = vld [vmem:[%s9231_s28 + $0xe10] sm:$0xf] }
 0x12e   : > { %963 = vst [vmem:[%s9227_s25 + $0xe08] sm:$0xf] %v962_v1  ;;  %v966_v3 = vld [vmem:[%s9231_s28 + $0xe14] sm:$0xf]  ;;  %v968_v4 = vld [vmem:[%s9231_s28 + $0xe18] sm:$0xf] }
 0x12f   : > { %965 = vst [vmem:[%s9227_s25 + $0xe10] sm:$0xf] %v964_v2  ;;  %967 = vst [vmem:[%s9227_s25 + $0xe18] sm:$0xf] %v966_v3  ;;  %v970_v5 = vld [vmem:[%s9231_s28 + $0xe28] sm:$0xf] }
 0x130   : > { %969 = vst [vmem:[%s9227_s25 + $0xe20] sm:$0xf] %v968_v4  ;;  %v972_v6 = vld [vmem:[%s9231_s28 + $0xe2c] sm:$0xf]  ;;  %v974_v7 = vld [vmem:[%s9231_s28 + $0xe30] sm:$0xf] }
 0x131   : > { %971 = vst [vmem:[%s9227_s25 + $0xe28] sm:$0xf] %v970_v5  ;;  %973 = vst [vmem:[%s9227_s25 + $0xe30] sm:$0xf] %v972_v6  ;;  %v976_v8 = vld [vmem:[%s9231_s28 + $0xe40] sm:$0xf] }
 0x132   : > { %975 = vst [vmem:[%s9227_s25 + $0xe38] sm:$0xf] %v974_v7  ;;  %v978_v9 = vld [vmem:[%s9231_s28 + $0xe44] sm:$0xf]  ;;  %v980_v10 = vld [vmem:[%s9231_s28 + $0xe48] sm:$0xf] }
 0x133   : > { %977 = vst [vmem:[%s9227_s25 + $0xe40] sm:$0xf] %v976_v8  ;;  %979 = vst [vmem:[%s9227_s25 + $0xe48] sm:$0xf] %v978_v9  ;;  %v982_v11 = vld [vmem:[%s9231_s28 + $0xe58] sm:$0xf] }
 0x134   : > { %981 = vst [vmem:[%s9227_s25 + $0xe50] sm:$0xf] %v980_v10  ;;  %v984_v12 = vld [vmem:[%s9231_s28 + $0xe5c] sm:$0xf]  ;;  %v986_v13 = vld [vmem:[%s9231_s28 + $0xe60] sm:$0xf] }
 0x135   : > { %983 = vst [vmem:[%s9227_s25 + $0xe58] sm:$0xf] %v982_v11  ;;  %985 = vst [vmem:[%s9227_s25 + $0xe60] sm:$0xf] %v984_v12  ;;  %v988_v14 = vld [vmem:[%s9231_s28 + $0xe70] sm:$0xf] }
 0x136   : > { %987 = vst [vmem:[%s9227_s25 + $0xe68] sm:$0xf] %v986_v13  ;;  %v990_v15 = vld [vmem:[%s9231_s28 + $0xe74] sm:$0xf]  ;;  %v992_v16 = vld [vmem:[%s9231_s28 + $0xe78] sm:$0xf] }
 0x137   : > { %989 = vst [vmem:[%s9227_s25 + $0xe70] sm:$0xf] %v988_v14  ;;  %991 = vst [vmem:[%s9227_s25 + $0xe78] sm:$0xf] %v990_v15  ;;  %v994_v17 = vld [vmem:[%s9231_s28 + $0xe88] sm:$0xf] }
 0x138   : > { %993 = vst [vmem:[%s9227_s25 + $0xe80] sm:$0xf] %v992_v16  ;;  %v996_v18 = vld [vmem:[%s9231_s28 + $0xe8c] sm:$0xf]  ;;  %v998_v19 = vld [vmem:[%s9231_s28 + $0xe90] sm:$0xf] }
 0x139   : > { %995 = vst [vmem:[%s9227_s25 + $0xe88] sm:$0xf] %v994_v17  ;;  %997 = vst [vmem:[%s9227_s25 + $0xe90] sm:$0xf] %v996_v18  ;;  %v1000_v20 = vld [vmem:[%s9231_s28 + $0xea0] sm:$0xf] }
 0x13a   : > { %999 = vst [vmem:[%s9227_s25 + $0xe98] sm:$0xf] %v998_v19  ;;  %v1002_v21 = vld [vmem:[%s9231_s28 + $0xea4] sm:$0xf]  ;;  %v1004_v22 = vld [vmem:[%s9231_s28 + $0xea8] sm:$0xf] }
 0x13b   : > { %1001 = vst [vmem:[%s9227_s25 + $0xea0] sm:$0xf] %v1000_v20  ;;  %1003 = vst [vmem:[%s9227_s25 + $0xea8] sm:$0xf] %v1002_v21  ;;  %v1006_v23 = vld [vmem:[%s9231_s28 + $0xeb8] sm:$0xf] }
 0x13c   : > { %1005 = vst [vmem:[%s9227_s25 + $0xeb0] sm:$0xf] %v1004_v22  ;;  %v1008_v24 = vld [vmem:[%s9231_s28 + $0xebc] sm:$0xf]  ;;  %v1010_v25 = vld [vmem:[%s9231_s28 + $0xec0] sm:$0xf] }
 0x13d   : > { %1007 = vst [vmem:[%s9227_s25 + $0xeb8] sm:$0xf] %v1006_v23  ;;  %1009 = vst [vmem:[%s9227_s25 + $0xec0] sm:$0xf] %v1008_v24  ;;  %v1012_v26 = vld [vmem:[%s9231_s28 + $0xed0] sm:$0xf] }
 0x13e   : > { %1011 = vst [vmem:[%s9227_s25 + $0xec8] sm:$0xf] %v1010_v25  ;;  %v1014_v27 = vld [vmem:[%s9231_s28 + $0xed4] sm:$0xf]  ;;  %v1016_v28 = vld [vmem:[%s9231_s28 + $0xed8] sm:$0xf] }
 0x13f   : > { %1013 = vst [vmem:[%s9227_s25 + $0xed0] sm:$0xf] %v1012_v26  ;;  %1015 = vst [vmem:[%s9227_s25 + $0xed8] sm:$0xf] %v1014_v27  ;;  %v1018_v29 = vld [vmem:[%s9231_s28 + $0xee8] sm:$0xf] }
 0x140   : > { %1017 = vst [vmem:[%s9227_s25 + $0xee0] sm:$0xf] %v1016_v28  ;;  %v1020_v30 = vld [vmem:[%s9231_s28 + $0xeec] sm:$0xf]  ;;  %v1022_v31 = vld [vmem:[%s9231_s28 + $0xef0] sm:$0xf] }
 0x141   : > { %1019 = vst [vmem:[%s9227_s25 + $0xee8] sm:$0xf] %v1018_v29  ;;  %1021 = vst [vmem:[%s9227_s25 + $0xef0] sm:$0xf] %v1020_v30  ;;  %v1024_v32 = vld [vmem:[%s9231_s28 + $0xf00] sm:$0xf] }
 0x142   : > { %1023 = vst [vmem:[%s9227_s25 + $0xef8] sm:$0xf] %v1022_v31  ;;  %v1026_v33 = vld [vmem:[%s9231_s28 + $0xf04] sm:$0xf]  ;;  %v1028_v34 = vld [vmem:[%s9231_s28 + $0xf08] sm:$0xf] }
 0x143   : > { %1025 = vst [vmem:[%s9227_s25 + $0xf00] sm:$0xf] %v1024_v32  ;;  %1027 = vst [vmem:[%s9227_s25 + $0xf08] sm:$0xf] %v1026_v33  ;;  %v1030_v35 = vld [vmem:[%s9231_s28 + $0xf18] sm:$0xf] }
 0x144   : > { %1029 = vst [vmem:[%s9227_s25 + $0xf10] sm:$0xf] %v1028_v34  ;;  %v1032_v36 = vld [vmem:[%s9231_s28 + $0xf1c] sm:$0xf]  ;;  %v1034_v37 = vld [vmem:[%s9231_s28 + $0xf20] sm:$0xf] }
 0x145   : > { %1031 = vst [vmem:[%s9227_s25 + $0xf18] sm:$0xf] %v1030_v35  ;;  %1033 = vst [vmem:[%s9227_s25 + $0xf20] sm:$0xf] %v1032_v36  ;;  %v1036_v38 = vld [vmem:[%s9231_s28 + $0xf30] sm:$0xf] }
 0x146   : > { %1035 = vst [vmem:[%s9227_s25 + $0xf28] sm:$0xf] %v1034_v37  ;;  %v1038_v39 = vld [vmem:[%s9231_s28 + $0xf34] sm:$0xf]  ;;  %v1040_v40 = vld [vmem:[%s9231_s28 + $0xf38] sm:$0xf] }
 0x147   : > { %1037 = vst [vmem:[%s9227_s25 + $0xf30] sm:$0xf] %v1036_v38  ;;  %1039 = vst [vmem:[%s9227_s25 + $0xf38] sm:$0xf] %v1038_v39  ;;  %v1042_v41 = vld [vmem:[%s9231_s28 + $0xf48] sm:$0xf] }
 0x148   : > { %1041 = vst [vmem:[%s9227_s25 + $0xf40] sm:$0xf] %v1040_v40  ;;  %v1044_v42 = vld [vmem:[%s9231_s28 + $0xf4c] sm:$0xf]  ;;  %v1046_v43 = vld [vmem:[%s9231_s28 + $0xf50] sm:$0xf] }
 0x149   : > { %1043 = vst [vmem:[%s9227_s25 + $0xf48] sm:$0xf] %v1042_v41  ;;  %1045 = vst [vmem:[%s9227_s25 + $0xf50] sm:$0xf] %v1044_v42  ;;  %v1048_v44 = vld [vmem:[%s9231_s28 + $0xf60] sm:$0xf] }
 0x14a   : > { %1047 = vst [vmem:[%s9227_s25 + $0xf58] sm:$0xf] %v1046_v43  ;;  %v1050_v45 = vld [vmem:[%s9231_s28 + $0xf64] sm:$0xf]  ;;  %v1052_v46 = vld [vmem:[%s9231_s28 + $0xf68] sm:$0xf] }
 0x14b   : > { %1049 = vst [vmem:[%s9227_s25 + $0xf60] sm:$0xf] %v1048_v44  ;;  %1051 = vst [vmem:[%s9227_s25 + $0xf68] sm:$0xf] %v1050_v45  ;;  %v1054_v47 = vld [vmem:[%s9231_s28 + $0xf78] sm:$0xf] }
 0x14c   : > { %1053 = vst [vmem:[%s9227_s25 + $0xf70] sm:$0xf] %v1052_v46  ;;  %v1056_v48 = vld [vmem:[%s9231_s28 + $0xf7c] sm:$0xf]  ;;  %v1058_v49 = vld [vmem:[%s9231_s28 + $0xf80] sm:$0xf] }
 0x14d   : > { %1055 = vst [vmem:[%s9227_s25 + $0xf78] sm:$0xf] %v1054_v47  ;;  %1057 = vst [vmem:[%s9227_s25 + $0xf80] sm:$0xf] %v1056_v48  ;;  %v1060_v50 = vld [vmem:[%s9231_s28 + $0xf90] sm:$0xf] }
 0x14e   : > { %1059 = vst [vmem:[%s9227_s25 + $0xf88] sm:$0xf] %v1058_v49  ;;  %v1062_v51 = vld [vmem:[%s9231_s28 + $0xf94] sm:$0xf]  ;;  %v1064_v52 = vld [vmem:[%s9231_s28 + $0xf98] sm:$0xf] }
 0x14f   : > { %1061 = vst [vmem:[%s9227_s25 + $0xf90] sm:$0xf] %v1060_v50  ;;  %1063 = vst [vmem:[%s9227_s25 + $0xf98] sm:$0xf] %v1062_v51  ;;  %v1066_v53 = vld [vmem:[%s9231_s28 + $0xfa8] sm:$0xf] }
 0x150   : > { %1065 = vst [vmem:[%s9227_s25 + $0xfa0] sm:$0xf] %v1064_v52  ;;  %v1068_v54 = vld [vmem:[%s9231_s28 + $0xfac] sm:$0xf]  ;;  %v1070_v55 = vld [vmem:[%s9231_s28 + $0xfb0] sm:$0xf] }
 0x151   : > { %1067 = vst [vmem:[%s9227_s25 + $0xfa8] sm:$0xf] %v1066_v53  ;;  %1069 = vst [vmem:[%s9227_s25 + $0xfb0] sm:$0xf] %v1068_v54  ;;  %v1072_v56 = vld [vmem:[%s9231_s28 + $0xfc0] sm:$0xf] }
 0x152   : > { %1071 = vst [vmem:[%s9227_s25 + $0xfb8] sm:$0xf] %v1070_v55  ;;  %v1074_v57 = vld [vmem:[%s9231_s28 + $0xfc4] sm:$0xf]  ;;  %v1076_v58 = vld [vmem:[%s9231_s28 + $0xfc8] sm:$0xf] }
 0x153   : > { %1073 = vst [vmem:[%s9227_s25 + $0xfc0] sm:$0xf] %v1072_v56  ;;  %1075 = vst [vmem:[%s9227_s25 + $0xfc8] sm:$0xf] %v1074_v57  ;;  %v1078_v59 = vld [vmem:[%s9231_s28 + $0xfd8] sm:$0xf] }
 0x154   : > { %1077 = vst [vmem:[%s9227_s25 + $0xfd0] sm:$0xf] %v1076_v58  ;;  %v1080_v60 = vld [vmem:[%s9231_s28 + $0xfdc] sm:$0xf]  ;;  %v1082_v61 = vld [vmem:[%s9231_s28 + $0xfe0] sm:$0xf] }
 0x155   : > { %1079 = vst [vmem:[%s9227_s25 + $0xfd8] sm:$0xf] %v1078_v59  ;;  %1081 = vst [vmem:[%s9227_s25 + $0xfe0] sm:$0xf] %v1080_v60  ;;  %v1084_v62 = vld [vmem:[%s9231_s28 + $0xff0] sm:$0xf] }
 0x156   : > { %1083 = vst [vmem:[%s9227_s25 + $0xfe8] sm:$0xf] %v1082_v61  ;;  %v1086_v63 = vld [vmem:[%s9231_s28 + $0xff4] sm:$0xf]  ;;  %v1088_v0 = vld [vmem:[%s9231_s28 + $0xff8] sm:$0xf] }
 0x157   : > { %1085 = vst [vmem:[%s9227_s25 + $0xff0] sm:$0xf] %v1084_v62  ;;  %1087 = vst [vmem:[%s9227_s25 + $0xff8] sm:$0xf] %v1086_v63  ;;  %v1090_v1 = vld [vmem:[%s9231_s28 + $0x1008] sm:$0xf] }
 0x158   : > { %1089 = vst [vmem:[%s9227_s25 + $0x1000] sm:$0xf] %v1088_v0  ;;  %v1092_v2 = vld [vmem:[%s9231_s28 + $0x100c] sm:$0xf]  ;;  %v1094_v3 = vld [vmem:[%s9231_s28 + $0x1010] sm:$0xf] }
 0x159   : > { %1091 = vst [vmem:[%s9227_s25 + $0x1008] sm:$0xf] %v1090_v1  ;;  %1093 = vst [vmem:[%s9227_s25 + $0x1010] sm:$0xf] %v1092_v2  ;;  %v1096_v4 = vld [vmem:[%s9231_s28 + $0x1020] sm:$0xf] }
 0x15a   : > { %1095 = vst [vmem:[%s9227_s25 + $0x1018] sm:$0xf] %v1094_v3  ;;  %v1098_v5 = vld [vmem:[%s9231_s28 + $0x1024] sm:$0xf]  ;;  %v1100_v6 = vld [vmem:[%s9231_s28 + $0x1028] sm:$0xf] }
 0x15b   : > { %1097 = vst [vmem:[%s9227_s25 + $0x1020] sm:$0xf] %v1096_v4  ;;  %1099 = vst [vmem:[%s9227_s25 + $0x1028] sm:$0xf] %v1098_v5  ;;  %v1102_v7 = vld [vmem:[%s9231_s28 + $0x1038] sm:$0xf] }
 0x15c   : > { %1101 = vst [vmem:[%s9227_s25 + $0x1030] sm:$0xf] %v1100_v6  ;;  %v1104_v8 = vld [vmem:[%s9231_s28 + $0x103c] sm:$0xf]  ;;  %v1106_v9 = vld [vmem:[%s9231_s28 + $0x1040] sm:$0xf] }
 0x15d   : > { %1103 = vst [vmem:[%s9227_s25 + $0x1038] sm:$0xf] %v1102_v7  ;;  %1105 = vst [vmem:[%s9227_s25 + $0x1040] sm:$0xf] %v1104_v8  ;;  %v1108_v10 = vld [vmem:[%s9231_s28 + $0x1050] sm:$0xf] }
 0x15e   : > { %1107 = vst [vmem:[%s9227_s25 + $0x1048] sm:$0xf] %v1106_v9  ;;  %v1110_v11 = vld [vmem:[%s9231_s28 + $0x1054] sm:$0xf]  ;;  %v1112_v12 = vld [vmem:[%s9231_s28 + $0x1058] sm:$0xf] }
 0x15f   : > { %1109 = vst [vmem:[%s9227_s25 + $0x1050] sm:$0xf] %v1108_v10  ;;  %1111 = vst [vmem:[%s9227_s25 + $0x1058] sm:$0xf] %v1110_v11  ;;  %v1114_v13 = vld [vmem:[%s9231_s28 + $0x1068] sm:$0xf] }
 0x160   : > { %1113 = vst [vmem:[%s9227_s25 + $0x1060] sm:$0xf] %v1112_v12  ;;  %v1116_v14 = vld [vmem:[%s9231_s28 + $0x106c] sm:$0xf]  ;;  %v1118_v15 = vld [vmem:[%s9231_s28 + $0x1070] sm:$0xf] }
 0x161   : > { %1115 = vst [vmem:[%s9227_s25 + $0x1068] sm:$0xf] %v1114_v13  ;;  %1117 = vst [vmem:[%s9227_s25 + $0x1070] sm:$0xf] %v1116_v14  ;;  %v1120_v16 = vld [vmem:[%s9231_s28 + $0x1080] sm:$0xf] }
 0x162   : > { %1119 = vst [vmem:[%s9227_s25 + $0x1078] sm:$0xf] %v1118_v15  ;;  %v1122_v17 = vld [vmem:[%s9231_s28 + $0x1084] sm:$0xf]  ;;  %v1124_v18 = vld [vmem:[%s9231_s28 + $0x1088] sm:$0xf] }
 0x163   : > { %1121 = vst [vmem:[%s9227_s25 + $0x1080] sm:$0xf] %v1120_v16  ;;  %1123 = vst [vmem:[%s9227_s25 + $0x1088] sm:$0xf] %v1122_v17  ;;  %v1126_v19 = vld [vmem:[%s9231_s28 + $0x1098] sm:$0xf] }
 0x164   : > { %1125 = vst [vmem:[%s9227_s25 + $0x1090] sm:$0xf] %v1124_v18  ;;  %v1128_v20 = vld [vmem:[%s9231_s28 + $0x109c] sm:$0xf]  ;;  %v1130_v21 = vld [vmem:[%s9231_s28 + $0x10a0] sm:$0xf] }
 0x165   : > { %1127 = vst [vmem:[%s9227_s25 + $0x1098] sm:$0xf] %v1126_v19  ;;  %1129 = vst [vmem:[%s9227_s25 + $0x10a0] sm:$0xf] %v1128_v20  ;;  %v1132_v22 = vld [vmem:[%s9231_s28 + $0x10b0] sm:$0xf] }
 0x166   : > { %1131 = vst [vmem:[%s9227_s25 + $0x10a8] sm:$0xf] %v1130_v21  ;;  %v1134_v23 = vld [vmem:[%s9231_s28 + $0x10b4] sm:$0xf]  ;;  %v1136_v24 = vld [vmem:[%s9231_s28 + $0x10b8] sm:$0xf] }
 0x167   : > { %1133 = vst [vmem:[%s9227_s25 + $0x10b0] sm:$0xf] %v1132_v22  ;;  %1135 = vst [vmem:[%s9227_s25 + $0x10b8] sm:$0xf] %v1134_v23  ;;  %v1138_v25 = vld [vmem:[%s9231_s28 + $0x10c8] sm:$0xf] }
 0x168   : > { %1137 = vst [vmem:[%s9227_s25 + $0x10c0] sm:$0xf] %v1136_v24  ;;  %v1140_v26 = vld [vmem:[%s9231_s28 + $0x10cc] sm:$0xf]  ;;  %v1142_v27 = vld [vmem:[%s9231_s28 + $0x10d0] sm:$0xf] }
 0x169   : > { %1139 = vst [vmem:[%s9227_s25 + $0x10c8] sm:$0xf] %v1138_v25  ;;  %1141 = vst [vmem:[%s9227_s25 + $0x10d0] sm:$0xf] %v1140_v26  ;;  %v1144_v28 = vld [vmem:[%s9231_s28 + $0x10e0] sm:$0xf] }
 0x16a   : > { %1143 = vst [vmem:[%s9227_s25 + $0x10d8] sm:$0xf] %v1142_v27  ;;  %v1146_v29 = vld [vmem:[%s9231_s28 + $0x10e4] sm:$0xf]  ;;  %v1148_v30 = vld [vmem:[%s9231_s28 + $0x10e8] sm:$0xf] }
 0x16b   : > { %1145 = vst [vmem:[%s9227_s25 + $0x10e0] sm:$0xf] %v1144_v28  ;;  %1147 = vst [vmem:[%s9227_s25 + $0x10e8] sm:$0xf] %v1146_v29  ;;  %v1150_v31 = vld [vmem:[%s9231_s28 + $0x10f8] sm:$0xf] }
 0x16c   : > { %1149 = vst [vmem:[%s9227_s25 + $0x10f0] sm:$0xf] %v1148_v30  ;;  %v1152_v32 = vld [vmem:[%s9231_s28 + $0x10fc] sm:$0xf]  ;;  %v1154_v33 = vld [vmem:[%s9231_s28 + $0x1100] sm:$0xf] }
 0x16d   : > { %1151 = vst [vmem:[%s9227_s25 + $0x10f8] sm:$0xf] %v1150_v31  ;;  %1153 = vst [vmem:[%s9227_s25 + $0x1100] sm:$0xf] %v1152_v32  ;;  %v1156_v34 = vld [vmem:[%s9231_s28 + $0x1110] sm:$0xf] }
 0x16e   : > { %1155 = vst [vmem:[%s9227_s25 + $0x1108] sm:$0xf] %v1154_v33  ;;  %v1158_v35 = vld [vmem:[%s9231_s28 + $0x1114] sm:$0xf]  ;;  %v1160_v36 = vld [vmem:[%s9231_s28 + $0x1118] sm:$0xf] }
 0x16f   : > { %1157 = vst [vmem:[%s9227_s25 + $0x1110] sm:$0xf] %v1156_v34  ;;  %1159 = vst [vmem:[%s9227_s25 + $0x1118] sm:$0xf] %v1158_v35  ;;  %v1162_v37 = vld [vmem:[%s9231_s28 + $0x1128] sm:$0xf] }
 0x170   : > { %1161 = vst [vmem:[%s9227_s25 + $0x1120] sm:$0xf] %v1160_v36  ;;  %v1164_v38 = vld [vmem:[%s9231_s28 + $0x112c] sm:$0xf]  ;;  %v1166_v39 = vld [vmem:[%s9231_s28 + $0x1130] sm:$0xf] }
 0x171   : > { %1163 = vst [vmem:[%s9227_s25 + $0x1128] sm:$0xf] %v1162_v37  ;;  %1165 = vst [vmem:[%s9227_s25 + $0x1130] sm:$0xf] %v1164_v38  ;;  %v1168_v40 = vld [vmem:[%s9231_s28 + $0x1140] sm:$0xf] }
 0x172   : > { %1167 = vst [vmem:[%s9227_s25 + $0x1138] sm:$0xf] %v1166_v39  ;;  %v1170_v41 = vld [vmem:[%s9231_s28 + $0x1144] sm:$0xf]  ;;  %v1172_v42 = vld [vmem:[%s9231_s28 + $0x1148] sm:$0xf] }
 0x173   : > { %1169 = vst [vmem:[%s9227_s25 + $0x1140] sm:$0xf] %v1168_v40  ;;  %1171 = vst [vmem:[%s9227_s25 + $0x1148] sm:$0xf] %v1170_v41  ;;  %v1174_v43 = vld [vmem:[%s9231_s28 + $0x1158] sm:$0xf] }
 0x174   : > { %1173 = vst [vmem:[%s9227_s25 + $0x1150] sm:$0xf] %v1172_v42  ;;  %v1176_v44 = vld [vmem:[%s9231_s28 + $0x115c] sm:$0xf]  ;;  %v1178_v45 = vld [vmem:[%s9231_s28 + $0x1160] sm:$0xf] }
 0x175   : > { %1175 = vst [vmem:[%s9227_s25 + $0x1158] sm:$0xf] %v1174_v43  ;;  %1177 = vst [vmem:[%s9227_s25 + $0x1160] sm:$0xf] %v1176_v44  ;;  %v1180_v46 = vld [vmem:[%s9231_s28 + $0x1170] sm:$0xf] }
 0x176   : > { %1179 = vst [vmem:[%s9227_s25 + $0x1168] sm:$0xf] %v1178_v45  ;;  %v1182_v47 = vld [vmem:[%s9231_s28 + $0x1174] sm:$0xf]  ;;  %v1184_v48 = vld [vmem:[%s9231_s28 + $0x1178] sm:$0xf] }
 0x177   : > { %1181 = vst [vmem:[%s9227_s25 + $0x1170] sm:$0xf] %v1180_v46  ;;  %1183 = vst [vmem:[%s9227_s25 + $0x1178] sm:$0xf] %v1182_v47  ;;  %v1186_v49 = vld [vmem:[%s9231_s28 + $0x1188] sm:$0xf] }
 0x178   : > { %1185 = vst [vmem:[%s9227_s25 + $0x1180] sm:$0xf] %v1184_v48  ;;  %v1188_v50 = vld [vmem:[%s9231_s28 + $0x118c] sm:$0xf]  ;;  %v1190_v51 = vld [vmem:[%s9231_s28 + $0x1190] sm:$0xf] }
 0x179   : > { %1187 = vst [vmem:[%s9227_s25 + $0x1188] sm:$0xf] %v1186_v49  ;;  %1189 = vst [vmem:[%s9227_s25 + $0x1190] sm:$0xf] %v1188_v50  ;;  %v1192_v52 = vld [vmem:[%s9231_s28 + $0x11a0] sm:$0xf] }
 0x17a   : > { %1191 = vst [vmem:[%s9227_s25 + $0x1198] sm:$0xf] %v1190_v51  ;;  %v1194_v53 = vld [vmem:[%s9231_s28 + $0x11a4] sm:$0xf]  ;;  %v1196_v54 = vld [vmem:[%s9231_s28 + $0x11a8] sm:$0xf] }
 0x17b   : > { %1193 = vst [vmem:[%s9227_s25 + $0x11a0] sm:$0xf] %v1192_v52  ;;  %1195 = vst [vmem:[%s9227_s25 + $0x11a8] sm:$0xf] %v1194_v53  ;;  %v1198_v55 = vld [vmem:[%s9231_s28 + $0x11b8] sm:$0xf] }
 0x17c   : > { %1197 = vst [vmem:[%s9227_s25 + $0x11b0] sm:$0xf] %v1196_v54  ;;  %v1200_v56 = vld [vmem:[%s9231_s28 + $0x11bc] sm:$0xf]  ;;  %v1202_v57 = vld [vmem:[%s9231_s28 + $0x11c0] sm:$0xf] }
 0x17d   : > { %1199 = vst [vmem:[%s9227_s25 + $0x11b8] sm:$0xf] %v1198_v55  ;;  %1201 = vst [vmem:[%s9227_s25 + $0x11c0] sm:$0xf] %v1200_v56  ;;  %v1204_v58 = vld [vmem:[%s9231_s28 + $0x11d0] sm:$0xf] }
 0x17e   : > { %1203 = vst [vmem:[%s9227_s25 + $0x11c8] sm:$0xf] %v1202_v57  ;;  %v1206_v59 = vld [vmem:[%s9231_s28 + $0x11d4] sm:$0xf]  ;;  %v1208_v60 = vld [vmem:[%s9231_s28 + $0x11d8] sm:$0xf] }
 0x17f   : > { %1205 = vst [vmem:[%s9227_s25 + $0x11d0] sm:$0xf] %v1204_v58  ;;  %1207 = vst [vmem:[%s9227_s25 + $0x11d8] sm:$0xf] %v1206_v59  ;;  %v1210_v61 = vld [vmem:[%s9231_s28 + $0x11e8] sm:$0xf] }
 0x180   : > { %1209 = vst [vmem:[%s9227_s25 + $0x11e0] sm:$0xf] %v1208_v60  ;;  %v1212_v62 = vld [vmem:[%s9231_s28 + $0x11ec] sm:$0xf]  ;;  %v1214_v63 = vld [vmem:[%s9231_s28 + $0x11f0] sm:$0xf] }
 0x181   : > { %1211 = vst [vmem:[%s9227_s25 + $0x11e8] sm:$0xf] %v1210_v61  ;;  %1213 = vst [vmem:[%s9227_s25 + $0x11f0] sm:$0xf] %v1212_v62  ;;  %p1217_p0 = scmp.ge.s32.totalorder %s1216_s14, 2  ;;  %s60_s30 = sadd.s32 1, %s9239_s30  }
 0x182   : > { %1215 = vst [vmem:[%s9227_s25 + $0x11f8] sm:$0xf] %v1214_v63  ;;  %p57_p1 = scmp.ge.s32.totalorder %s60_s30, 2  }
 0x183   : > { %s11229_s14 = smov (%p1217_p0, %s1216_s14), 0 }
 0x184   : > { %s1219_s15 = smul.u32 12, %s11229_s14  ;;  %s8444_s16 = sshll.u32 %s11229_s14, 2 }
 0x185   : > { %s1222_s25 = scalar_lea.vmem [#allocation3], %s8444_s16   ;;  %s11225_s29 = smov %s11229_s14 }
 0x186   : > { %s1221_s28 = scalar_lea.vmem %s11214_s4, %s1219_s15   ;;  %59 = sbr.rel (!%p57_p1) target bundleno = 2 (0x2), region = 182 }
 0x18d   :  { %4776 = vsyncadd [#allocation4], 73728  ;;  %v9009_v0 = vld [vmem:[%s11210_s0 + $0x4] ss:$16 sps:$4 sm:$0xff]   ;;  %v9011_v1 = vld [vmem:[%s11210_s0] ss:$16 sps:$4 sm:$0xff]   ;;  %v4973_v26 = vlaneseq }
 0x18e   :  { %v9241_v2 = vmov 0   ;;  %v9012_v3 = vld [vmem:[%s11210_s0 + $0x24] ss:$16 sps:$4 sm:$0xff]   ;;  %4873 = vmatprep.subr.bf16.mxu1 %v9009_v0  ;;  %v9014_v5 = vld [vmem:[%s11210_s0 + $0x20] ss:$16 sps:$4 sm:$0xff]   ;;  %vm4860_vm0 = vcmask 1041408  }
 0x18f   :  { %4905 = vmatprep.mubr.bf16.mxu1 %v9241_v2  ;;  %9008 = vset.pattern.permute.xlu0 %v9241_v2  ;;  %v4787_v4 = vld [vmem:[%s11210_s0 + $0x40] sm:$0x33]  ;;  %v9020_v10 = vld [vmem:[%s11210_s0 + $0xc] ss:$16 sps:$4 sm:$0xff]   ;;  %v4790_v11 = vld [vmem:[%s11213_s3 + $0x8] sm:$0xf] }
 0x190   :  { %4874 = vmatpush1.bf16.msra.mxu1 %v9011_v1  ;;  %v8455_v6 = vcombine.high %v4787_v4, %v4787_v4  ;;  %v8454_v7 = vcombine.low %v4787_v4, %v4787_v4  ;;  %v4789_v8 = vld [vmem:[%s11213_s3] sm:$0xff]  ;;  %vm4856_vm1 = vcmask 293888   ;;  %v9018_v13 = vld [vmem:[%s11210_s0 + $0x8] ss:$16 sps:$4 sm:$0xff]   ;;  %v9023_v14 = vld [vmem:[%s11210_s0 + $0x2c] ss:$16 sps:$4 sm:$0xff]  }
 0x191   :  { %4875 = vmatprep.subr.bf16.mxu1 %v9012_v3  ;;  %4793 = vperm.xlu0 %9008, %v4789_v8   ;;  %v9017_v12 = vld [vmem:[%s11212_s2] sm:$0x3f]   ;;  %v4788_v15 = vld [vmem:[%s11210_s0 + $0x48] sm:$0x33]  ;;  %v9242_v24 = vmov 1966171168  }
 0x192   :  { %v4862_v9 = vsel %vm4860_vm0, %v8454_v7, 0  ;;  %v9021_v16 = vld [vmem:[%s11210_s0 + $0x28] ss:$16 sps:$4 sm:$0xff]   ;;  %v8457_v17 = vcombine.high %v4788_v15, %v4788_v15  ;;  %v8456_v18 = vcombine.low %v4788_v15, %v4788_v15  ;;  %v10556_v20 = vld [vmem:[%s11211_s1] sm:$0x1]  ;;  %v4971_v25 = vunpack.c.l.s4 %v9242_v24 }
 0x193   :  { %v10561_v21 = vld [vmem:[%s11215_s5] sm:$0xff]  ;;  %v10566_v22 = vld [vmem:[%s11215_s5 + $0x8] sm:$0xf]  ;;  %v10568_v29 = vshrl.u32 %v4973_v26, 7  ;;  %vm10575_vm2 = vcmp.lt.s32.totalorder %v4973_v26, 256 }
 0x194   :  { %4876 = vmatpush1.bf16.msra.mxu1 %v9014_v5  ;;  %v4868_v19 = vsel %vm4860_vm0, %v8456_v18, 0  ;;  %v4972_v28 = vunpack.c.0.s8 %v4971_v25 }
 0x195   :  { %8458 = vmatprep.subr.msk.bf16.mxu1 %vm4860_vm0, %v8455_v6  ;;  %4798 = vperm.xlu0 %9008, %v4790_v11  }
 0x196   :  { %v10571_v39 = vsub.s32 %v4972_v28, %v10568_v29 }
 0x198   :  { %4878 = vmatpush1.bf16.msra.mxu1 %v4862_v9 }
 0x199   :  { %4916 = vmatprep.subr.bf16.mxu1 %v9020_v10 }
 0x19b   :  { %8459 = vmatmul.mubr.msk.bf16.vlgmr.msra.gmra.mrb[0].mxu1 %vm4856_vm1, %v9017_v12 }
 0x19c   :  { %4917 = vmatpush1.bf16.msra.mxu1 %v9018_v13  ;;  %4948 = vmatprep.mubr.bf16.mxu1 %v9241_v2 }
 0x19d   :  { %4918 = vmatprep.subr.bf16.mxu1 %v9023_v14 }
 0x1a0   :  { %4919 = vmatpush1.bf16.msra.mxu1 %v9021_v16 }
 0x1a1   :  { %8460 = vmatprep.subr.msk.bf16.mxu1 %vm4860_vm0, %v8457_v17 }
 0x1a4   :  { %4921 = vmatpush1.bf16.msra.mxu1 %v4868_v19  ;;  %v9243_v19 = vmov 1983009808  }
 0x1a7   :  { %8461 = vmatmul.mubr.msk.bf16.vlgmr.msra.gmra.mrb[4].mxu1 %vm4856_vm1, %v9017_v12 }
 0x210   :  { %v4794_v23 = vpop.permute.xlu0 %4793 }
 0x214   :  { %v4799_v30 = vpop.permute.xlu0 %4798 }
 0x26e   :  { %v4907_v27 = vpop.f32.mrb[0].mxu1 }
 0x26f   :  { %v4908_v31 = vadd.f32 %v4907_v27, %v4794_v23  ;;  %v4909_v32 = vpop.f32.mrb[1].mxu1 }
 0x270   :  { %v4910_v33 = vadd.f32 %v4909_v32, %v4794_v23  ;;  %v4911_v34 = vpop.f32.mrb[2].mxu1 }
 0x271   :  { %v4959_v35 = vmax.f32 %v4908_v31, 0.0  ;;  %v4912_v36 = vadd.f32 %v4911_v34, %v4799_v30  ;;  %v4913_v37 = vpop.f32.mrb[3].mxu1 }
 0x272   :  { %v4960_v38 = vmax.f32 %v4910_v33, 0.0  ;;  %v4914_v40 = vadd.f32 %v4913_v37, %v4799_v30 }
 0x273   :  { %v4963_v41 = vmax.f32 %v4912_v36, 0.0 }
 0x274   :  { %v4969_v42 = vcombine.low %v4959_v35, %v4960_v38  ;;  %v5048_v43 = vcombine.high %v4959_v35, %v4960_v38  ;;  %v4964_v44 = vmax.f32 %v4914_v40, 0.0 }
 0x276   :  { %v4976_v45 = vrot.slane %v4969_v42, %v10571_v39  ;;  %v5055_v46 = vrot.slane %v5048_v43, %v10571_v39  ;;  %v5124_v47 = vcombine.low %v4963_v41, %v4964_v44 }
 0x278   :  { %v4983_v49 = vrot.slane %v4976_v45, %v10571_v39  ;;  %v5010_v50 = vcombine.high %v4976_v45, %v4976_v45  ;;  %v5062_v51 = vrot.slane %v5055_v46, %v10571_v39  ;;  %v5084_v52 = vcombine.high %v5055_v46, %v5055_v46 }
 0x279   :  { %v5131_v53 = vrot.slane %v5124_v47, %v10571_v39 }
 0x27a   :  { %4989 = vst.msk [vmem:[#allocation2] ss:$2 sm:$0x3] %vm10575_vm2, %v4983_v49  ;;  %v5017_v54 = vrot.slane %v5010_v50, %v10571_v39  ;;  %v5032_v55 = vcombine.high %v4983_v49, %v4983_v49  ;;  %5065 = vst.msk [vmem:[#allocation2 + $0x10] ss:$2 sm:$0x3] %vm10575_vm2, %v5062_v51  ;;  %v5091_v56 = vrot.slane %v5084_v52, %v10571_v39 }
 0x27b   :  { %v5106_v57 = vcombine.high %v5062_v51, %v5062_v51  ;;  %v4950_v58 = vpop.f32.mrb[4].mxu1  ;;  %v5138_v59 = vrot.slane %v5131_v53, %v10571_v39  ;;  %v5162_v60 = vcombine.high %v5131_v53, %v5131_v53 }
 0x27c   :  { %v4951_v61 = vadd.f32 %v4950_v58, %v4794_v23  ;;  %v4952_v62 = vpop.f32.mrb[5].mxu1  ;;  %5020 = vst.msk [vmem:[#allocation2 + $0x4] ss:$2 sm:$0x3] %vm10575_vm2, %v5017_v54  ;;  %v5040_v63 = vcombine.high %v5017_v54, %v5017_v54  ;;  %v5114_v0 = vcombine.high %v5091_v56, %v5091_v56 }
 0x27d   :  { %5035 = vst.msk [vmem:[#allocation2 + $0x8] ss:$2 sm:$0x3] %vm10575_vm2, %v5032_v55  ;;  %5094 = vst.msk [vmem:[#allocation2 + $0x14] ss:$2 sm:$0x3] %vm10575_vm2, %v5091_v56  ;;  %v4953_v1 = vadd.f32 %v4952_v62, %v4794_v23  ;;  %v5169_v4 = vrot.slane %v5162_v60, %v10571_v39  ;;  %v5184_v5 = vcombine.high %v5138_v59, %v5138_v59  ;;  %v5214_v23 = vunpack.c.l.s4 %v9243_v19 }
 0x27e   :  { %5109 = vst.msk [vmem:[#allocation2 + $0x18] ss:$2 sm:$0x3] %vm10575_vm2, %v5106_v57  ;;  %v4954_v3 = vpop.f32.mrb[6].mxu1  ;;  %v4961_v6 = vmax.f32 %v4951_v61, 0.0 }
 0x27f   :  { %5141 = vst.msk [vmem:[#allocation2 + $0x20] ss:$2 sm:$0x3] %vm10575_vm2, %v5138_v59  ;;  %v4955_v7 = vadd.f32 %v4954_v3, %v4799_v30  ;;  %v4956_v8 = vpop.f32.mrb[7].mxu1  ;;  %v4962_v9 = vmax.f32 %v4953_v1, 0.0  ;;  %v5192_v11 = vcombine.high %v5169_v4, %v5169_v4  ;;  %v5215_v38 = vunpack.c.0.s8 %v5214_v23 }
 0x280   :  { %5043 = vst.msk [vmem:[#allocation2 + $0xc] ss:$2 sm:$0x3] %vm10575_vm2, %v5040_v63  ;;  %5117 = vst.msk [vmem:[#allocation2 + $0x1c] ss:$2 sm:$0x3] %vm10575_vm2, %v5114_v0  ;;  %v4957_v10 = vadd.f32 %v4956_v8, %v4799_v30 }
 0x281   :  { %5172 = vst.msk [vmem:[#allocation2 + $0x24] ss:$2 sm:$0x3] %vm10575_vm2, %v5169_v4  ;;  %5187 = vst.msk [vmem:[#allocation2 + $0x28] ss:$2 sm:$0x3] %vm10575_vm2, %v5184_v5  ;;  %v4992_v13 = vcombine.low %v4961_v6, %v4962_v9  ;;  %v5066_v14 = vcombine.high %v4961_v6, %v4962_v9  ;;  %v5218_v43 = vsub.s32 %v5215_v38, %v10568_v29 }
 0x282   :  { %v4965_v12 = vmax.f32 %v4955_v7, 0.0  ;;  %v4966_v15 = vmax.f32 %v4957_v10, 0.0  ;;  %5195 = vst.msk [vmem:[#allocation2 + $0x2c] ss:$2 sm:$0x3] %vm10575_vm2, %v5192_v11 }
 0x283   :  { %v4999_v16 = vrot.slane %v4992_v13, %v10571_v39  ;;  %v5073_v17 = vrot.slane %v5066_v14, %v10571_v39 }
 0x284   :  { %v5144_v18 = vcombine.low %v4965_v12, %v4966_v15 }
 0x285   :  { %v5006_v24 = vrot.slane %v4999_v16, %v10571_v39  ;;  %v5021_v25 = vcombine.high %v4999_v16, %v4999_v16  ;;  %v5080_v26 = vrot.slane %v5073_v17, %v10571_v39  ;;  %v5095_v27 = vcombine.high %v5073_v17, %v5073_v17 }
 0x286   :  { %v5151_v28 = vrot.slane %v5144_v18, %v10571_v39 }
 0x287   :  { %5009 = vst.msk [vmem:[#allocation2 + $0x1] ss:$2 sm:$0x3] %vm10575_vm2, %v5006_v24  ;;  %v5028_v30 = vrot.slane %v5021_v25, %v10571_v39  ;;  %v5036_v31 = vcombine.high %v5006_v24, %v5006_v24  ;;  %5083 = vst.msk [vmem:[#allocation2 + $0x11] ss:$2 sm:$0x3] %vm10575_vm2, %v5080_v26  ;;  %v5102_v32 = vrot.slane %v5095_v27, %v10571_v39 }
 0x288   :  { %v5110_v33 = vcombine.high %v5080_v26, %v5080_v26  ;;  %v5158_v34 = vrot.slane %v5151_v28, %v10571_v39  ;;  %v5173_v35 = vcombine.high %v5151_v28, %v5151_v28 }
 0x289   :  { %5031 = vst.msk [vmem:[#allocation2 + $0x5] ss:$2 sm:$0x3] %vm10575_vm2, %v5028_v30  ;;  %5039 = vst.msk [vmem:[#allocation2 + $0x9] ss:$2 sm:$0x3] %vm10575_vm2, %v5036_v31  ;;  %v5044_v36 = vcombine.high %v5028_v30, %v5028_v30  ;;  %v5118_v37 = vcombine.high %v5102_v32, %v5102_v32 }
 0x28a   :  { %5105 = vst.msk [vmem:[#allocation2 + $0x15] ss:$2 sm:$0x3] %vm10575_vm2, %v5102_v32  ;;  %5113 = vst.msk [vmem:[#allocation2 + $0x19] ss:$2 sm:$0x3] %vm10575_vm2, %v5110_v33  ;;  %v5180_v40 = vrot.slane %v5173_v35, %v10571_v39  ;;  %v5188_v41 = vcombine.high %v5158_v34, %v5158_v34 }
 0x28b   :  { %5161 = vst.msk [vmem:[#allocation2 + $0x21] ss:$2 sm:$0x3] %vm10575_vm2, %v5158_v34  ;;  %5047 = vst.msk [vmem:[#allocation2 + $0xd] ss:$2 sm:$0x3] %vm10575_vm2, %v5044_v36 }
 0x28c   :  { %5121 = vst.msk [vmem:[#allocation2 + $0x1d] ss:$2 sm:$0x3] %vm10575_vm2, %v5118_v37  ;;  %5183 = vst.msk [vmem:[#allocation2 + $0x25] ss:$2 sm:$0x3] %vm10575_vm2, %v5180_v40  ;;  %v5196_v42 = vcombine.high %v5180_v40, %v5180_v40 }
 0x28d   :  { %5191 = vst.msk [vmem:[#allocation2 + $0x29] ss:$2 sm:$0x3] %vm10575_vm2, %v5188_v41 }
 0x28e   :  { %5199 = vst.msk [vmem:[#allocation2 + $0x2d] ss:$2 sm:$0x3] %vm10575_vm2, %v5196_v42 }
 0x290   :  { %v5200_v39 = vld [vmem:[#allocation2] sm:$0xff] }
 0x291   :  { %v5202_v44 = vld [vmem:[#allocation2 + $0x10] sm:$0xff]  ;;  %v5212_v45 = vcombine.high %v5200_v39, %v5200_v39  ;;  %v5219_v46 = vrot.slane %v5200_v39, %v5218_v43 }
 0x292   :  { %v5246_v47 = vcombine.high %v5202_v44, %v5202_v44  ;;  %v5253_v49 = vrot.slane %v5202_v44, %v5218_v43  ;;  %v5201_v50 = vld [vmem:[#allocation2 + $0x8] sm:$0xff] }
 0x293   :  { %v5203_v51 = vld [vmem:[#allocation2 + $0x18] sm:$0xff]  ;;  %v5226_v52 = vrot.slane %v5212_v45, %v5218_v43  ;;  %v5227_v53 = vcombine.high %v5219_v46, %v5219_v46  ;;  %v5229_v54 = vcombine.high %v5201_v50, %v5201_v50  ;;  %v5236_v55 = vrot.slane %v5201_v50, %v5218_v43  ;;  %v5204_v12 = vld [vmem:[#allocation2 + $0x20] sm:$0xff] }
 0x294   :  { %v5260_v56 = vrot.slane %v5246_v47, %v5218_v43  ;;  %v5261_v57 = vcombine.high %v5253_v49, %v5253_v49  ;;  %v5263_v58 = vcombine.high %v5203_v51, %v5203_v51  ;;  %v5270_v59 = vrot.slane %v5203_v51, %v5218_v43 }
 0x295   :  { %v5228_v60 = vcombine.high %v5226_v52, %v5226_v52  ;;  %v5243_v61 = vrot.slane %v5229_v54, %v5218_v43  ;;  %v5244_v48 = vcombine.high %v5236_v55, %v5236_v55  ;;  %v10644_v62 = vpack.c.bf16 %v5219_v46, %v5219_v46  ;;  %v5205_v13 = vld [vmem:[#allocation2 + $0x28] sm:$0xff] }
 0x296   :  { %v5262_v63 = vcombine.high %v5260_v56, %v5260_v56  ;;  %v5277_v0 = vrot.slane %v5263_v58, %v5218_v43  ;;  %v5278_v1 = vcombine.high %v5270_v59, %v5270_v59  ;;  %v10646_v3 = vpack.c.bf16 %v5227_v53, %v5227_v53 }
 0x297   :  { %v5245_v4 = vcombine.high %v5243_v61, %v5243_v61  ;;  %v10648_v5 = vpack.c.bf16 %v5226_v52, %v5226_v52  ;;  %v10650_v6 = vpack.c.bf16 %v5228_v60, %v5228_v60  ;;  %v10652_v7 = vpack.c.bf16 %v5236_v55, %v5236_v55 }
 0x298   :  { %v5279_v8 = vcombine.high %v5277_v0, %v5277_v0  ;;  %v10654_v9 = vpack.c.bf16 %v5244_v48, %v5244_v48  ;;  %v10656_v10 = vpack.c.bf16 %v5243_v61, %v5243_v61  ;;  %v10658_v11 = vpack.c.bf16 %v5253_v49, %v5253_v49 }
 0x299   :  { %v10660_v14 = vpack.c.bf16 %v5245_v4, %v5245_v4  ;;  %v10662_v15 = vpack.c.bf16 %v5261_v57, %v5261_v57  ;;  %v10664_v16 = vpack.c.bf16 %v5260_v56, %v5260_v56  ;;  %v10666_v17 = vpack.c.bf16 %v5262_v63, %v5262_v63 }
 0x29a   :  { %v10668_v18 = vpack.c.bf16 %v5270_v59, %v5270_v59  ;;  %v10670_v19 = vpack.c.bf16 %v5278_v1, %v5278_v1  ;;  %v10672_v23 = vpack.c.bf16 %v5277_v0, %v5277_v0  ;;  %v10674_v24 = vpack.c.bf16 %v5279_v8, %v5279_v8 }
 0x29b   :  { %v5280_v25 = vcombine.high %v5204_v12, %v5204_v12  ;;  %v5287_v26 = vrot.slane %v5204_v12, %v5218_v43  ;;  %v5297_v27 = vcombine.high %v5205_v13, %v5205_v13  ;;  %v5304_v28 = vrot.slane %v5205_v13, %v5218_v43 }
 0x29d   :  { %v5294_v30 = vrot.slane %v5280_v25, %v5218_v43  ;;  %v5295_v31 = vcombine.high %v5287_v26, %v5287_v26  ;;  %v5311_v32 = vrot.slane %v5297_v27, %v5218_v43  ;;  %v5312_v33 = vcombine.high %v5304_v28, %v5304_v28 }
 0x29e   :  { %v10676_v34 = vpack.c.bf16 %v5287_v26, %v5287_v26  ;;  %v10678_v35 = vpack.c.bf16 %v5304_v28, %v5304_v28 }
 0x29f   :  { %v5296_v36 = vcombine.high %v5294_v30, %v5294_v30  ;;  %v5313_v37 = vcombine.high %v5311_v32, %v5311_v32  ;;  %v10680_v38 = vpack.c.bf16 %v5295_v31, %v5295_v31  ;;  %v10682_v40 = vpack.c.bf16 %v5294_v30, %v5294_v30 }
 0x2a0   :  { %v10684_v41 = vpack.c.bf16 %v5312_v33, %v5312_v33  ;;  %v10686_v42 = vpack.c.bf16 %v5311_v32, %v5311_v32 }
 0x2a1   :  { %v10688_v39 = vpack.c.bf16 %v5296_v36, %v5296_v36  ;;  %v10690_v44 = vpack.c.bf16 %v5313_v37, %v5313_v37 }
 0x2a2   :  { %9221 = dma.done.wait [#allocation4], 73728 }
 0x2a3   :  { %9222 = vsyncadd [#allocation4], 4294893568  ;;  %5977 = vmatprep.mubr.bf16.mxu0 %v10646_v3  ;;  %6018 = vmatprep.mubr.bf16.mxu1 %v10650_v6  ;;  %v5370_v43 = vld [vmem:[#allocation3 + $0x8] sm:$0xff]  ;;  %v5369_v46 = vld [vmem:[#allocation3] sm:$0xff]  ;;  %vm6929_vm3 = vcmask 1043456   ;;  %vm9245_vm4 = vmmov 0  }
 0x2a4   :  { %v5418_v45 = vld [vmem:[#allocation3 + $0x188] sm:$0xff]  ;;  %5945 = vmatprep.subr.bf16.mxu0 %v5370_v43  ;;  %v5417_v47 = vld [vmem:[#allocation3 + $0x180] sm:$0xff]  ;;  %v5372_v51 = vld [vmem:[#allocation3 + $0x18] sm:$0xff]  ;;  %vm6925_vm5 = vcmask 64512   ;;  %vm7397_vm6 = vcmask 1040384   ;;  %vm7393_vm7 = vcmask 15360  }
 0x2a5   :  { %5986 = vmatprep.subr.bf16.mxu1 %v5418_v45  ;;  %v5373_v49 = vld [vmem:[#allocation3 + $0x20] sm:$0xff]  ;;  %5946 = vmatpush1.bf16.msra.mxu0 %v5369_v46  ;;  %v5420_v52 = vld [vmem:[#allocation3 + $0x198] sm:$0xff]  ;;  %v5375_v55 = vld [vmem:[#allocation3 + $0x30] sm:$0xff]  ;;  %s9246_s26 = smov [#allocation5]   ;;  %vm8327_vm8 = vcmask 41984  }
 0x2a6   :  { %v5421_v50 = vld [vmem:[#allocation3 + $0x1a0] sm:$0xff]  ;;  %5987 = vmatpush1.bf16.msra.mxu1 %v5417_v47  ;;  %5947 = vmatprep.subr.bf16.mxu0 %v5373_v49  ;;  %v5376_v53 = vld [vmem:[#allocation3 + $0x38] sm:$0xff]  ;;  %v5423_v56 = vld [vmem:[#allocation3 + $0x1b0] sm:$0xff]  ;;  %s8335_s4 = sshll.u32 %s9246_s26, 4  ;;  %s8336_s4 = int_to_ptr.vmem [resolvable:$true] %s8335_s4 }
 0x2a7   :  { %5988 = vmatprep.subr.bf16.mxu1 %v5421_v50  ;;  %v5424_v54 = vld [vmem:[#allocation3 + $0x1b8] sm:$0xff]  ;;  %v5379_v57 = vld [vmem:[#allocation3 + $0x50] sm:$0xff]  ;;  %v5378_v59 = vld [vmem:[#allocation3 + $0x48] sm:$0xff]  ;;  %s9183_s25 = scalar_lea.vmem %s8336_s4, 32  ;;  %p9188_p3 = scmp.lt.s32.totalorder %s8336_s4, %s8336_s4 }
 0x2a8   :  { %v5427_v58 = vld [vmem:[#allocation3 + $0x1d0] sm:$0xff]  ;;  %v5426_v60 = vld [vmem:[#allocation3 + $0x1c8] sm:$0xff]  ;;  %v5381_v63 = vld [vmem:[#allocation3 + $0x60] sm:$0xff]  ;;  %p9184_p2 = scmp.ne.s32.totalorder %s8336_s4, %s9183_s25  ;;  %p9189_p4 = scmp.lt.s32.totalorder %s9183_s25, %s9183_s25 }
 0x2a9   :  { %5948 = vmatpush1.bf16.msra.mxu0 %v5372_v51  ;;  %v5382_v61 = vld [vmem:[#allocation3 + $0x68] sm:$0xff]  ;;  %v5429_v0 = vld [vmem:[#allocation3 + $0x1e0] sm:$0xff]  ;;  %v5384_v8 = vld [vmem:[#allocation3 + $0x78] sm:$0xff] }
 0x2aa   :  { %5989 = vmatpush1.bf16.msra.mxu1 %v5420_v52  ;;  %5949 = vmatprep.subr.bf16.mxu0 %v5376_v53  ;;  %v5430_v48 = vld [vmem:[#allocation3 + $0x1e8] sm:$0xff]  ;;  %v5385_v1 = vld [vmem:[#allocation3 + $0x80] sm:$0xff]  ;;  %v5432_v12 = vld [vmem:[#allocation3 + $0x1f8] sm:$0xff]  ;;  %p9190_p5 = por %p9189_p4, %p9188_p3 }
 0x2ab   :  { %5990 = vmatprep.subr.bf16.mxu1 %v5424_v54  ;;  %v5433_v4 = vld [vmem:[#allocation3 + $0x200] sm:$0xff]  ;;  %v5388_v13 = vld [vmem:[#allocation3 + $0x98] sm:$0xff]  ;;  %v5387_v26 = vld [vmem:[#allocation3 + $0x90] sm:$0xff] }
 0x2ac   :  { %v5436_v25 = vld [vmem:[#allocation3 + $0x218] sm:$0xff]  ;;  %v5435_v27 = vld [vmem:[#allocation3 + $0x210] sm:$0xff]  ;;  %v5390_v31 = vld [vmem:[#allocation3 + $0xa8] sm:$0xff]  ;;  %p9191_p6 = pnand %p9190_p5, %p9184_p2 }
 0x2ad   :  { %5950 = vmatpush1.bf16.msra.mxu0 %v5375_v55  ;;  %v5391_v28 = vld [vmem:[#allocation3 + $0xb0] sm:$0xff]  ;;  %v5438_v32 = vld [vmem:[#allocation3 + $0x228] sm:$0xff]  ;;  %v5393_v37 = vld [vmem:[#allocation3 + $0xc0] sm:$0xff] }
 0x2ae   :  { %5991 = vmatpush1.bf16.msra.mxu1 %v5423_v56  ;;  %5951 = vmatprep.subr.bf16.mxu0 %v5379_v57  ;;  %v5439_v30 = vld [vmem:[#allocation3 + $0x230] sm:$0xff]  ;;  %v5394_v33 = vld [vmem:[#allocation3 + $0xc8] sm:$0xff]  ;;  %v5441_v43 = vld [vmem:[#allocation3 + $0x240] sm:$0xff] }
 0x2af   :  { %5992 = vmatprep.subr.bf16.mxu1 %v5427_v58  ;;  %v5442_v36 = vld [vmem:[#allocation3 + $0x248] sm:$0xff]  ;;  %v5397_v45 = vld [vmem:[#allocation3 + $0xe0] sm:$0xff]  ;;  %v5396_v47 = vld [vmem:[#allocation3 + $0xd8] sm:$0xff] }
 0x2b0   :  { %v5445_v46 = vld [vmem:[#allocation3 + $0x260] sm:$0xff]  ;;  %v5444_v49 = vld [vmem:[#allocation3 + $0x258] sm:$0xff]  ;;  %v5399_v52 = vld [vmem:[#allocation3 + $0xf0] sm:$0xff] }
 0x2b1   :  { %5952 = vmatpush1.bf16.msra.mxu0 %v5378_v59  ;;  %v5400_v50 = vld [vmem:[#allocation3 + $0xf8] sm:$0xff]  ;;  %v5447_v53 = vld [vmem:[#allocation3 + $0x270] sm:$0xff]  ;;  %v5402_v56 = vld [vmem:[#allocation3 + $0x108] sm:$0xff] }
 0x2b2   :  { %5993 = vmatpush1.bf16.msra.mxu1 %v5426_v60  ;;  %5953 = vmatprep.subr.bf16.mxu0 %v5382_v61  ;;  %v5448_v51 = vld [vmem:[#allocation3 + $0x278] sm:$0xff]  ;;  %v5403_v54 = vld [vmem:[#allocation3 + $0x110] sm:$0xff]  ;;  %v5450_v57 = vld [vmem:[#allocation3 + $0x288] sm:$0xff] }
 0x2b3   :  { %5994 = vmatprep.subr.bf16.mxu1 %v5430_v48  ;;  %v5451_v55 = vld [vmem:[#allocation3 + $0x290] sm:$0xff]  ;;  %v5406_v58 = vld [vmem:[#allocation3 + $0x128] sm:$0xff]  ;;  %v5405_v60 = vld [vmem:[#allocation3 + $0x120] sm:$0xff] }
 0x2b4   :  { %v5454_v59 = vld [vmem:[#allocation3 + $0x2a8] sm:$0xff]  ;;  %v5453_v61 = vld [vmem:[#allocation3 + $0x2a0] sm:$0xff] }
 0x2b5   :  { %5954 = vmatpush1.bf16.msra.mxu0 %v5381_v63  ;;  %v5409_v48 = vld [vmem:[#allocation3 + $0x140] sm:$0xff] }
 0x2b6   :  { %5995 = vmatpush1.bf16.msra.mxu1 %v5429_v0  ;;  %5955 = vmatprep.subr.bf16.mxu0 %v5385_v1  ;;  %v5457_v63 = vld [vmem:[#allocation3 + $0x2c0] sm:$0xff]  ;;  %v5408_v0 = vld [vmem:[#allocation3 + $0x138] sm:$0xff] }
 0x2b7   :  { %5996 = vmatprep.subr.bf16.mxu1 %v5433_v4  ;;  %v5456_v1 = vld [vmem:[#allocation3 + $0x2b8] sm:$0xff] }
 0x2b8   :  { %v5412_v4 = vld [vmem:[#allocation3 + $0x158] sm:$0xff] }
 0x2b9   :  { %5956 = vmatpush1.bf16.msra.mxu0 %v5384_v8  ;;  %v5460_v8 = vld [vmem:[#allocation3 + $0x2d8] sm:$0xff] }
 0x2ba   :  { %5997 = vmatpush1.bf16.msra.mxu1 %v5432_v12  ;;  %5957 = vmatprep.subr.bf16.mxu0 %v5388_v13  ;;  %v5411_v12 = vld [vmem:[#allocation3 + $0x150] sm:$0xff] }
 0x2bb   :  { %5998 = vmatprep.subr.bf16.mxu1 %v5436_v25  ;;  %v5459_v13 = vld [vmem:[#allocation3 + $0x2d0] sm:$0xff] }
 0x2bc   :  { %v5415_v25 = vld [vmem:[#allocation3 + $0x170] sm:$0xff] }
 0x2bd   :  { %5958 = vmatpush1.bf16.msra.mxu0 %v5387_v26  ;;  %v5463_v26 = vld [vmem:[#allocation3 + $0x2f0] sm:$0xff] }
 0x2be   :  { %5999 = vmatpush1.bf16.msra.mxu1 %v5435_v27  ;;  %5959 = vmatprep.subr.bf16.mxu0 %v5391_v28  ;;  %v5414_v27 = vld [vmem:[#allocation3 + $0x168] sm:$0xff] }
 0x2bf   :  { %6000 = vmatprep.subr.bf16.mxu1 %v5439_v30  ;;  %v5462_v28 = vld [vmem:[#allocation3 + $0x2e8] sm:$0xff] }
 0x2c0   :  { %v5466_v30 = vld [vmem:[#allocation3 + $0x308] sm:$0xff] }
 0x2c1   :  { %5960 = vmatpush1.bf16.msra.mxu0 %v5390_v31  ;;  %v5514_v31 = vld [vmem:[#allocation3 + $0x488] sm:$0xff] }
 0x2c2   :  { %6001 = vmatpush1.bf16.msra.mxu1 %v5438_v32  ;;  %5961 = vmatprep.subr.bf16.mxu0 %v5394_v33  ;;  %v5465_v32 = vld [vmem:[#allocation3 + $0x300] sm:$0xff] }
 0x2c3   :  { %6002 = vmatprep.subr.bf16.mxu1 %v5442_v36  ;;  %v5513_v33 = vld [vmem:[#allocation3 + $0x480] sm:$0xff] }
 0x2c4   :  { %v5469_v36 = vld [vmem:[#allocation3 + $0x320] sm:$0xff] }
 0x2c5   :  { %5962 = vmatpush1.bf16.msra.mxu0 %v5393_v37  ;;  %v5517_v37 = vld [vmem:[#allocation3 + $0x4a0] sm:$0xff] }
 0x2c6   :  { %6003 = vmatpush1.bf16.msra.mxu1 %v5441_v43  ;;  %5963 = vmatprep.subr.bf16.mxu0 %v5397_v45  ;;  %v5468_v43 = vld [vmem:[#allocation3 + $0x318] sm:$0xff] }
 0x2c7   :  { %6004 = vmatprep.subr.bf16.mxu1 %v5445_v46  ;;  %v5516_v45 = vld [vmem:[#allocation3 + $0x498] sm:$0xff] }
 0x2c8   :  { %v5472_v46 = vld [vmem:[#allocation3 + $0x338] sm:$0xff] }
 0x2c9   :  { %5964 = vmatpush1.bf16.msra.mxu0 %v5396_v47  ;;  %v5520_v47 = vld [vmem:[#allocation3 + $0x4b8] sm:$0xff] }
 0x2ca   :  { %6005 = vmatpush1.bf16.msra.mxu1 %v5444_v49  ;;  %5965 = vmatprep.subr.bf16.mxu0 %v5400_v50  ;;  %v5471_v49 = vld [vmem:[#allocation3 + $0x330] sm:$0xff] }
 0x2cb   :  { %6006 = vmatprep.subr.bf16.mxu1 %v5448_v51  ;;  %v5519_v50 = vld [vmem:[#allocation3 + $0x4b0] sm:$0xff] }
 0x2cc   :  { %v5475_v51 = vld [vmem:[#allocation3 + $0x350] sm:$0xff] }
 0x2cd   :  { %5966 = vmatpush1.bf16.msra.mxu0 %v5399_v52  ;;  %v5523_v52 = vld [vmem:[#allocation3 + $0x4d0] sm:$0xff] }
 0x2ce   :  { %6007 = vmatpush1.bf16.msra.mxu1 %v5447_v53  ;;  %5967 = vmatprep.subr.bf16.mxu0 %v5403_v54  ;;  %v5474_v53 = vld [vmem:[#allocation3 + $0x348] sm:$0xff] }
 0x2cf   :  { %6008 = vmatprep.subr.bf16.mxu1 %v5451_v55  ;;  %v5522_v54 = vld [vmem:[#allocation3 + $0x4c8] sm:$0xff] }
 0x2d0   :  { %v5478_v55 = vld [vmem:[#allocation3 + $0x368] sm:$0xff] }
 0x2d1   :  { %5968 = vmatpush1.bf16.msra.mxu0 %v5402_v56  ;;  %v5526_v56 = vld [vmem:[#allocation3 + $0x4e8] sm:$0xff] }
 0x2d2   :  { %6009 = vmatpush1.bf16.msra.mxu1 %v5450_v57  ;;  %5969 = vmatprep.subr.bf16.mxu0 %v5406_v58  ;;  %v5477_v57 = vld [vmem:[#allocation3 + $0x360] sm:$0xff] }
 0x2d3   :  { %6010 = vmatprep.subr.bf16.mxu1 %v5454_v59  ;;  %v5525_v58 = vld [vmem:[#allocation3 + $0x4e0] sm:$0xff] }
 0x2d4   :  { %v5481_v59 = vld [vmem:[#allocation3 + $0x380] sm:$0xff] }
 0x2d5   :  { %5970 = vmatpush1.bf16.msra.mxu0 %v5405_v60  ;;  %v5529_v60 = vld [vmem:[#allocation3 + $0x500] sm:$0xff] }
 0x2d6   :  { %6011 = vmatpush1.bf16.msra.mxu1 %v5453_v61  ;;  %5971 = vmatprep.subr.bf16.mxu0 %v5409_v48  ;;  %v5480_v61 = vld [vmem:[#allocation3 + $0x378] sm:$0xff] }
 0x2d7   :  { %6012 = vmatprep.subr.bf16.mxu1 %v5457_v63  ;;  %v5528_v48 = vld [vmem:[#allocation3 + $0x4f8] sm:$0xff] }
 0x2d8   :  { %v5484_v63 = vld [vmem:[#allocation3 + $0x398] sm:$0xff] }
 0x2d9   :  { %5972 = vmatpush1.bf16.msra.mxu0 %v5408_v0  ;;  %v5532_v0 = vld [vmem:[#allocation3 + $0x518] sm:$0xff] }
 0x2da   :  { %6013 = vmatpush1.bf16.msra.mxu1 %v5456_v1  ;;  %5973 = vmatprep.subr.bf16.mxu0 %v5412_v4  ;;  %v5483_v1 = vld [vmem:[#allocation3 + $0x390] sm:$0xff] }
 0x2db   :  { %6014 = vmatprep.subr.bf16.mxu1 %v5460_v8  ;;  %v5531_v4 = vld [vmem:[#allocation3 + $0x510] sm:$0xff] }
 0x2dc   :  { %v5487_v8 = vld [vmem:[#allocation3 + $0x3b0] sm:$0xff] }
 0x2dd   :  { %5974 = vmatpush1.bf16.msra.mxu0 %v5411_v12  ;;  %v5535_v12 = vld [vmem:[#allocation3 + $0x530] sm:$0xff] }
 0x2de   :  { %6015 = vmatpush1.bf16.msra.mxu1 %v5459_v13  ;;  %5975 = vmatprep.subr.bf16.mxu0 %v5415_v25  ;;  %v5486_v13 = vld [vmem:[#allocation3 + $0x3a8] sm:$0xff] }
 0x2df   :  { %6016 = vmatprep.subr.bf16.mxu1 %v5463_v26  ;;  %v5534_v25 = vld [vmem:[#allocation3 + $0x528] sm:$0xff] }
 0x2e0   :  { %v5490_v26 = vld [vmem:[#allocation3 + $0x3c8] sm:$0xff] }
 0x2e1   :  { %5976 = vmatpush1.bf16.msra.mxu0 %v5414_v27  ;;  %v5538_v27 = vld [vmem:[#allocation3 + $0x548] sm:$0xff] }
 0x2e2   :  { %6017 = vmatpush1.bf16.msra.mxu1 %v5462_v28  ;;  %6027 = vmatprep.subr.bf16.mxu0 %v5466_v30  ;;  %v5489_v28 = vld [vmem:[#allocation3 + $0x3c0] sm:$0xff] }
 0x2e3   :  { %6068 = vmatprep.subr.bf16.mxu1 %v5514_v31  ;;  %v5537_v30 = vld [vmem:[#allocation3 + $0x540] sm:$0xff] }
 0x2e4   :  { %5978 = vmatmul.mubr.bf16.vlgmr.msra.gmra.mrb[0].mxu0 %v10644_v62  ;;  %v5493_v31 = vld [vmem:[#allocation3 + $0x3e0] sm:$0xff] }
 0x2e5   :  { %6019 = vmatmul.mubr.bf16.vlgmr.msra.gmra.mrb[8].mxu1 %v10648_v5  ;;  %6028 = vmatpush1.bf16.msra.mxu0 %v5465_v32  ;;  %v5541_v32 = vld [vmem:[#allocation3 + $0x560] sm:$0xff] }
 0x2e6   :  { %6069 = vmatpush1.bf16.msra.mxu1 %v5513_v33  ;;  %6029 = vmatprep.subr.bf16.mxu0 %v5469_v36  ;;  %v5492_v33 = vld [vmem:[#allocation3 + $0x3d8] sm:$0xff] }
 0x2e7   :  { %6070 = vmatprep.subr.bf16.mxu1 %v5517_v37  ;;  %6059 = vmatprep.mubr.bf16.mxu0 %v10654_v9  ;;  %v5540_v36 = vld [vmem:[#allocation3 + $0x558] sm:$0xff] }
 0x2e8   :  { %6100 = vmatprep.mubr.bf16.mxu1 %v10660_v14  ;;  %v5496_v37 = vld [vmem:[#allocation3 + $0x3f8] sm:$0xff] }
 0x2e9   :  { %6030 = vmatpush1.bf16.msra.mxu0 %v5468_v43  ;;  %v5544_v43 = vld [vmem:[#allocation3 + $0x578] sm:$0xff] }
 0x2ea   :  { %6071 = vmatpush1.bf16.msra.mxu1 %v5516_v45  ;;  %6031 = vmatprep.subr.bf16.mxu0 %v5472_v46  ;;  %v5495_v45 = vld [vmem:[#allocation3 + $0x3f0] sm:$0xff] }
 0x2eb   :  { %6072 = vmatprep.subr.bf16.mxu1 %v5520_v47  ;;  %v5543_v46 = vld [vmem:[#allocation3 + $0x570] sm:$0xff] }
 0x2ec   :  { %v5499_v47 = vld [vmem:[#allocation3 + $0x410] sm:$0xff] }
 0x2ed   :  { %6032 = vmatpush1.bf16.msra.mxu0 %v5471_v49  ;;  %v5547_v49 = vld [vmem:[#allocation3 + $0x590] sm:$0xff] }
 0x2ee   :  { %6073 = vmatpush1.bf16.msra.mxu1 %v5519_v50  ;;  %6033 = vmatprep.subr.bf16.mxu0 %v5475_v51  ;;  %v5498_v50 = vld [vmem:[#allocation3 + $0x408] sm:$0xff] }
 0x2ef   :  { %6074 = vmatprep.subr.bf16.mxu1 %v5523_v52  ;;  %v5546_v51 = vld [vmem:[#allocation3 + $0x588] sm:$0xff] }
 0x2f0   :  { %v5502_v52 = vld [vmem:[#allocation3 + $0x428] sm:$0xff] }
 0x2f1   :  { %6034 = vmatpush1.bf16.msra.mxu0 %v5474_v53  ;;  %v5550_v53 = vld [vmem:[#allocation3 + $0x5a8] sm:$0xff] }
 0x2f2   :  { %6075 = vmatpush1.bf16.msra.mxu1 %v5522_v54  ;;  %6035 = vmatprep.subr.bf16.mxu0 %v5478_v55  ;;  %v5501_v54 = vld [vmem:[#allocation3 + $0x420] sm:$0xff] }
 0x2f3   :  { %6076 = vmatprep.subr.bf16.mxu1 %v5526_v56  ;;  %v5549_v55 = vld [vmem:[#allocation3 + $0x5a0] sm:$0xff] }
 0x2f4   :  { %v5505_v56 = vld [vmem:[#allocation3 + $0x440] sm:$0xff] }
 0x2f5   :  { %6036 = vmatpush1.bf16.msra.mxu0 %v5477_v57  ;;  %v5553_v57 = vld [vmem:[#allocation3 + $0x5c0] sm:$0xff] }
 0x2f6   :  { %6077 = vmatpush1.bf16.msra.mxu1 %v5525_v58  ;;  %6037 = vmatprep.subr.bf16.mxu0 %v5481_v59  ;;  %v5504_v58 = vld [vmem:[#allocation3 + $0x438] sm:$0xff] }
 0x2f7   :  { %6078 = vmatprep.subr.bf16.mxu1 %v5529_v60  ;;  %v5552_v59 = vld [vmem:[#allocation3 + $0x5b8] sm:$0xff] }
 0x2f8   :  { %v5508_v60 = vld [vmem:[#allocation3 + $0x458] sm:$0xff] }
 0x2f9   :  { %6038 = vmatpush1.bf16.msra.mxu0 %v5480_v61  ;;  %v5556_v61 = vld [vmem:[#allocation3 + $0x5d8] sm:$0xff] }
 0x2fa   :  { %6079 = vmatpush1.bf16.msra.mxu1 %v5528_v48  ;;  %6039 = vmatprep.subr.bf16.mxu0 %v5484_v63  ;;  %v5507_v48 = vld [vmem:[#allocation3 + $0x450] sm:$0xff] }
 0x2fb   :  { %6080 = vmatprep.subr.bf16.mxu1 %v5532_v0  ;;  %v5555_v63 = vld [vmem:[#allocation3 + $0x5d0] sm:$0xff] }
 0x2fc   :  { %v5511_v0 = vld [vmem:[#allocation3 + $0x470] sm:$0xff] }
 0x2fd   :  { %6040 = vmatpush1.bf16.msra.mxu0 %v5483_v1  ;;  %v5559_v1 = vld [vmem:[#allocation3 + $0x5f0] sm:$0xff] }
 0x2fe   :  { %6081 = vmatpush1.bf16.msra.mxu1 %v5531_v4  ;;  %6041 = vmatprep.subr.bf16.mxu0 %v5487_v8  ;;  %v5510_v4 = vld [vmem:[#allocation3 + $0x468] sm:$0xff] }
 0x2ff   :  { %6082 = vmatprep.subr.bf16.mxu1 %v5535_v12  ;;  %v5558_v8 = vld [vmem:[#allocation3 + $0x5e8] sm:$0xff] }
 0x300   :  { %v5562_v12 = vld [vmem:[#allocation3 + $0x608] sm:$0xff] }
 0x301   :  { %6042 = vmatpush1.bf16.msra.mxu0 %v5486_v13  ;;  %v5610_v13 = vld [vmem:[#allocation3 + $0x788] sm:$0xff] }
 0x302   :  { %6083 = vmatpush1.bf16.msra.mxu1 %v5534_v25  ;;  %6043 = vmatprep.subr.bf16.mxu0 %v5490_v26  ;;  %v5561_v25 = vld [vmem:[#allocation3 + $0x600] sm:$0xff] }
 0x303   :  { %6084 = vmatprep.subr.bf16.mxu1 %v5538_v27  ;;  %v5609_v26 = vld [vmem:[#allocation3 + $0x780] sm:$0xff] }
 0x304   :  { %v5565_v27 = vld [vmem:[#allocation3 + $0x620] sm:$0xff] }
 0x305   :  { %6044 = vmatpush1.bf16.msra.mxu0 %v5489_v28  ;;  %v5613_v28 = vld [vmem:[#allocation3 + $0x7a0] sm:$0xff] }
 0x306   :  { %6085 = vmatpush1.bf16.msra.mxu1 %v5537_v30  ;;  %6045 = vmatprep.subr.bf16.mxu0 %v5493_v31  ;;  %v5564_v30 = vld [vmem:[#allocation3 + $0x618] sm:$0xff] }
 0x307   :  { %6086 = vmatprep.subr.bf16.mxu1 %v5541_v32  ;;  %v5612_v31 = vld [vmem:[#allocation3 + $0x798] sm:$0xff] }
 0x308   :  { %v5568_v32 = vld [vmem:[#allocation3 + $0x638] sm:$0xff] }
 0x309   :  { %6046 = vmatpush1.bf16.msra.mxu0 %v5492_v33  ;;  %v5616_v33 = vld [vmem:[#allocation3 + $0x7b8] sm:$0xff] }
 0x30a   :  { %6087 = vmatpush1.bf16.msra.mxu1 %v5540_v36  ;;  %6047 = vmatprep.subr.bf16.mxu0 %v5496_v37  ;;  %v5567_v36 = vld [vmem:[#allocation3 + $0x630] sm:$0xff] }
 0x30b   :  { %6088 = vmatprep.subr.bf16.mxu1 %v5544_v43  ;;  %v5615_v37 = vld [vmem:[#allocation3 + $0x7b0] sm:$0xff] }
 0x30c   :  { %v5571_v43 = vld [vmem:[#allocation3 + $0x650] sm:$0xff] }
 0x30d   :  { %6048 = vmatpush1.bf16.msra.mxu0 %v5495_v45  ;;  %v5619_v45 = vld [vmem:[#allocation3 + $0x7d0] sm:$0xff] }
 0x30e   :  { %6089 = vmatpush1.bf16.msra.mxu1 %v5543_v46  ;;  %6049 = vmatprep.subr.bf16.mxu0 %v5499_v47  ;;  %v5570_v46 = vld [vmem:[#allocation3 + $0x648] sm:$0xff] }
 0x30f   :  { %6090 = vmatprep.subr.bf16.mxu1 %v5547_v49  ;;  %v5618_v47 = vld [vmem:[#allocation3 + $0x7c8] sm:$0xff] }
 0x310   :  { %v5574_v49 = vld [vmem:[#allocation3 + $0x668] sm:$0xff] }
 0x311   :  { %6050 = vmatpush1.bf16.msra.mxu0 %v5498_v50  ;;  %v5622_v50 = vld [vmem:[#allocation3 + $0x7e8] sm:$0xff] }
 0x312   :  { %6091 = vmatpush1.bf16.msra.mxu1 %v5546_v51  ;;  %6051 = vmatprep.subr.bf16.mxu0 %v5502_v52  ;;  %v5573_v51 = vld [vmem:[#allocation3 + $0x660] sm:$0xff] }
 0x313   :  { %6092 = vmatprep.subr.bf16.mxu1 %v5550_v53  ;;  %v5621_v52 = vld [vmem:[#allocation3 + $0x7e0] sm:$0xff] }
 0x314   :  { %v5577_v53 = vld [vmem:[#allocation3 + $0x680] sm:$0xff] }
 0x315   :  { %6052 = vmatpush1.bf16.msra.mxu0 %v5501_v54  ;;  %v5625_v54 = vld [vmem:[#allocation3 + $0x800] sm:$0xff] }
 0x316   :  { %6093 = vmatpush1.bf16.msra.mxu1 %v5549_v55  ;;  %6053 = vmatprep.subr.bf16.mxu0 %v5505_v56  ;;  %v5576_v55 = vld [vmem:[#allocation3 + $0x678] sm:$0xff] }
 0x317   :  { %6094 = vmatprep.subr.bf16.mxu1 %v5553_v57  ;;  %v5624_v56 = vld [vmem:[#allocation3 + $0x7f8] sm:$0xff] }
 0x318   :  { %v5580_v57 = vld [vmem:[#allocation3 + $0x698] sm:$0xff] }
 0x319   :  { %6054 = vmatpush1.bf16.msra.mxu0 %v5504_v58  ;;  %v5628_v58 = vld [vmem:[#allocation3 + $0x818] sm:$0xff] }
 0x31a   :  { %6095 = vmatpush1.bf16.msra.mxu1 %v5552_v59  ;;  %6055 = vmatprep.subr.bf16.mxu0 %v5508_v60  ;;  %v5579_v59 = vld [vmem:[#allocation3 + $0x690] sm:$0xff] }
 0x31b   :  { %6096 = vmatprep.subr.bf16.mxu1 %v5556_v61  ;;  %v5627_v60 = vld [vmem:[#allocation3 + $0x810] sm:$0xff] }
 0x31c   :  { %v5583_v61 = vld [vmem:[#allocation3 + $0x6b0] sm:$0xff] }
 0x31d   :  { %6056 = vmatpush1.bf16.msra.mxu0 %v5507_v48  ;;  %v5631_v48 = vld [vmem:[#allocation3 + $0x830] sm:$0xff] }
 0x31e   :  { %6097 = vmatpush1.bf16.msra.mxu1 %v5555_v63  ;;  %6057 = vmatprep.subr.bf16.mxu0 %v5511_v0  ;;  %v5582_v63 = vld [vmem:[#allocation3 + $0x6a8] sm:$0xff] }
 0x31f   :  { %6098 = vmatprep.subr.bf16.mxu1 %v5559_v1  ;;  %v5630_v0 = vld [vmem:[#allocation3 + $0x828] sm:$0xff] }
 0x320   :  { %v5586_v1 = vld [vmem:[#allocation3 + $0x6c8] sm:$0xff] }
 0x321   :  { %6058 = vmatpush1.bf16.msra.mxu0 %v5510_v4  ;;  %v5634_v4 = vld [vmem:[#allocation3 + $0x848] sm:$0xff] }
 0x322   :  { %6099 = vmatpush1.bf16.msra.mxu1 %v5558_v8  ;;  %6109 = vmatprep.subr.bf16.mxu0 %v5562_v12  ;;  %v5585_v8 = vld [vmem:[#allocation3 + $0x6c0] sm:$0xff] }
 0x323   :  { %6150 = vmatprep.subr.bf16.mxu1 %v5610_v13  ;;  %v5633_v12 = vld [vmem:[#allocation3 + $0x840] sm:$0xff] }
 0x324   :  { %6060 = vmatmul.mubr.bf16.vlgmr.msra.gmra.mrb[4].mxu0 %v10652_v7  ;;  %v5589_v13 = vld [vmem:[#allocation3 + $0x6e0] sm:$0xff] }
 0x325   :  { %6101 = vmatmul.mubr.bf16.vlgmr.msra.gmra.mrb[12].mxu1 %v10656_v10  ;;  %6110 = vmatpush1.bf16.msra.mxu0 %v5561_v25  ;;  %v5637_v25 = vld [vmem:[#allocation3 + $0x860] sm:$0xff] }
 0x326   :  { %6151 = vmatpush1.bf16.msra.mxu1 %v5609_v26  ;;  %6111 = vmatprep.subr.bf16.mxu0 %v5565_v27  ;;  %v5588_v26 = vld [vmem:[#allocation3 + $0x6d8] sm:$0xff] }
 0x327   :  { %6152 = vmatprep.subr.bf16.mxu1 %v5613_v28  ;;  %6141 = vmatprep.mubr.bf16.mxu0 %v10662_v15  ;;  %v5636_v27 = vld [vmem:[#allocation3 + $0x858] sm:$0xff] }
 0x328   :  { %6182 = vmatprep.mubr.bf16.mxu1 %v10666_v17  ;;  %v5592_v28 = vld [vmem:[#allocation3 + $0x6f8] sm:$0xff] }
 0x329   :  { %6112 = vmatpush1.bf16.msra.mxu0 %v5564_v30  ;;  %v5640_v30 = vld [vmem:[#allocation3 + $0x878] sm:$0xff] }
 0x32a   :  { %6153 = vmatpush1.bf16.msra.mxu1 %v5612_v31  ;;  %6113 = vmatprep.subr.bf16.mxu0 %v5568_v32  ;;  %v5591_v31 = vld [vmem:[#allocation3 + $0x6f0] sm:$0xff] }
 0x32b   :  { %6154 = vmatprep.subr.bf16.mxu1 %v5616_v33  ;;  %v5639_v32 = vld [vmem:[#allocation3 + $0x870] sm:$0xff] }
 0x32c   :  { %v5595_v33 = vld [vmem:[#allocation3 + $0x710] sm:$0xff] }
 0x32d   :  { %6114 = vmatpush1.bf16.msra.mxu0 %v5567_v36  ;;  %v5643_v36 = vld [vmem:[#allocation3 + $0x890] sm:$0xff] }
 0x32e   :  { %6155 = vmatpush1.bf16.msra.mxu1 %v5615_v37  ;;  %6115 = vmatprep.subr.bf16.mxu0 %v5571_v43  ;;  %v5594_v37 = vld [vmem:[#allocation3 + $0x708] sm:$0xff] }
 0x32f   :  { %6156 = vmatprep.subr.bf16.mxu1 %v5619_v45  ;;  %v5642_v43 = vld [vmem:[#allocation3 + $0x888] sm:$0xff] }
 0x330   :  { %v5598_v45 = vld [vmem:[#allocation3 + $0x728] sm:$0xff] }
 0x331   :  { %6116 = vmatpush1.bf16.msra.mxu0 %v5570_v46  ;;  %v5646_v46 = vld [vmem:[#allocation3 + $0x8a8] sm:$0xff] }
 0x332   :  { %6157 = vmatpush1.bf16.msra.mxu1 %v5618_v47  ;;  %6117 = vmatprep.subr.bf16.mxu0 %v5574_v49  ;;  %v5597_v47 = vld [vmem:[#allocation3 + $0x720] sm:$0xff] }
 0x333   :  { %6158 = vmatprep.subr.bf16.mxu1 %v5622_v50  ;;  %v5645_v49 = vld [vmem:[#allocation3 + $0x8a0] sm:$0xff] }
 0x334   :  { %v5601_v50 = vld [vmem:[#allocation3 + $0x740] sm:$0xff] }
 0x335   :  { %6118 = vmatpush1.bf16.msra.mxu0 %v5573_v51  ;;  %v5649_v51 = vld [vmem:[#allocation3 + $0x8c0] sm:$0xff] }
 0x336   :  { %6159 = vmatpush1.bf16.msra.mxu1 %v5621_v52  ;;  %6119 = vmatprep.subr.bf16.mxu0 %v5577_v53  ;;  %v5600_v52 = vld [vmem:[#allocation3 + $0x738] sm:$0xff] }
 0x337   :  { %6160 = vmatprep.subr.bf16.mxu1 %v5625_v54  ;;  %v5648_v53 = vld [vmem:[#allocation3 + $0x8b8] sm:$0xff] }
 0x338   :  { %v5604_v54 = vld [vmem:[#allocation3 + $0x758] sm:$0xff] }
 0x339   :  { %6120 = vmatpush1.bf16.msra.mxu0 %v5576_v55  ;;  %v5652_v55 = vld [vmem:[#allocation3 + $0x8d8] sm:$0xff] }
 0x33a   :  { %6161 = vmatpush1.bf16.msra.mxu1 %v5624_v56  ;;  %6121 = vmatprep.subr.bf16.mxu0 %v5580_v57  ;;  %v5603_v56 = vld [vmem:[#allocation3 + $0x750] sm:$0xff] }
 0x33b   :  { %6162 = vmatprep.subr.bf16.mxu1 %v5628_v58  ;;  %v5651_v57 = vld [vmem:[#allocation3 + $0x8d0] sm:$0xff] }
 0x33c   :  { %v5607_v58 = vld [vmem:[#allocation3 + $0x770] sm:$0xff] }
 0x33d   :  { %6122 = vmatpush1.bf16.msra.mxu0 %v5579_v59  ;;  %v5655_v59 = vld [vmem:[#allocation3 + $0x8f0] sm:$0xff] }
 0x33e   :  { %6163 = vmatpush1.bf16.msra.mxu1 %v5627_v60  ;;  %6123 = vmatprep.subr.bf16.mxu0 %v5583_v61  ;;  %v5606_v60 = vld [vmem:[#allocation3 + $0x768] sm:$0xff] }
 0x33f   :  { %6164 = vmatprep.subr.bf16.mxu1 %v5631_v48  ;;  %v5654_v61 = vld [vmem:[#allocation3 + $0x8e8] sm:$0xff] }
 0x340   :  { %v5658_v48 = vld [vmem:[#allocation3 + $0x908] sm:$0xff] }
 0x341   :  { %6124 = vmatpush1.bf16.msra.mxu0 %v5582_v63  ;;  %v5706_v63 = vld [vmem:[#allocation3 + $0xa88] sm:$0xff] }
 0x342   :  { %6165 = vmatpush1.bf16.msra.mxu1 %v5630_v0  ;;  %6125 = vmatprep.subr.bf16.mxu0 %v5586_v1  ;;  %v5657_v0 = vld [vmem:[#allocation3 + $0x900] sm:$0xff] }
 0x343   :  { %6166 = vmatprep.subr.bf16.mxu1 %v5634_v4  ;;  %v5705_v1 = vld [vmem:[#allocation3 + $0xa80] sm:$0xff] }
 0x344   :  { %v5661_v4 = vld [vmem:[#allocation3 + $0x920] sm:$0xff] }
 0x345   :  { %6126 = vmatpush1.bf16.msra.mxu0 %v5585_v8  ;;  %v5709_v8 = vld [vmem:[#allocation3 + $0xaa0] sm:$0xff] }
 0x346   :  { %6167 = vmatpush1.bf16.msra.mxu1 %v5633_v12  ;;  %6127 = vmatprep.subr.bf16.mxu0 %v5589_v13  ;;  %v5660_v12 = vld [vmem:[#allocation3 + $0x918] sm:$0xff] }
 0x347   :  { %6168 = vmatprep.subr.bf16.mxu1 %v5637_v25  ;;  %v5708_v13 = vld [vmem:[#allocation3 + $0xa98] sm:$0xff] }
 0x348   :  { %v5664_v25 = vld [vmem:[#allocation3 + $0x938] sm:$0xff] }
 0x349   :  { %6128 = vmatpush1.bf16.msra.mxu0 %v5588_v26  ;;  %v5712_v26 = vld [vmem:[#allocation3 + $0xab8] sm:$0xff] }
 0x34a   :  { %6169 = vmatpush1.bf16.msra.mxu1 %v5636_v27  ;;  %6129 = vmatprep.subr.bf16.mxu0 %v5592_v28  ;;  %v5663_v27 = vld [vmem:[#allocation3 + $0x930] sm:$0xff] }
 0x34b   :  { %6170 = vmatprep.subr.bf16.mxu1 %v5640_v30  ;;  %v5711_v28 = vld [vmem:[#allocation3 + $0xab0] sm:$0xff] }
 0x34c   :  { %v5667_v30 = vld [vmem:[#allocation3 + $0x950] sm:$0xff] }
 0x34d   :  { %6130 = vmatpush1.bf16.msra.mxu0 %v5591_v31  ;;  %v5715_v31 = vld [vmem:[#allocation3 + $0xad0] sm:$0xff] }
 0x34e   :  { %6171 = vmatpush1.bf16.msra.mxu1 %v5639_v32  ;;  %6131 = vmatprep.subr.bf16.mxu0 %v5595_v33  ;;  %v5666_v32 = vld [vmem:[#allocation3 + $0x948] sm:$0xff] }
 0x34f   :  { %6172 = vmatprep.subr.bf16.mxu1 %v5643_v36  ;;  %v5714_v33 = vld [vmem:[#allocation3 + $0xac8] sm:$0xff] }
 0x350   :  { %v5670_v36 = vld [vmem:[#allocation3 + $0x968] sm:$0xff] }
 0x351   :  { %6132 = vmatpush1.bf16.msra.mxu0 %v5594_v37  ;;  %v5718_v37 = vld [vmem:[#allocation3 + $0xae8] sm:$0xff] }
 0x352   :  { %6173 = vmatpush1.bf16.msra.mxu1 %v5642_v43  ;;  %6133 = vmatprep.subr.bf16.mxu0 %v5598_v45  ;;  %v5669_v43 = vld [vmem:[#allocation3 + $0x960] sm:$0xff] }
 0x353   :  { %6174 = vmatprep.subr.bf16.mxu1 %v5646_v46  ;;  %v5717_v45 = vld [vmem:[#allocation3 + $0xae0] sm:$0xff] }
 0x354   :  { %v5673_v46 = vld [vmem:[#allocation3 + $0x980] sm:$0xff] }
 0x355   :  { %6134 = vmatpush1.bf16.msra.mxu0 %v5597_v47  ;;  %v5721_v47 = vld [vmem:[#allocation3 + $0xb00] sm:$0xff] }
 0x356   :  { %6175 = vmatpush1.bf16.msra.mxu1 %v5645_v49  ;;  %6135 = vmatprep.subr.bf16.mxu0 %v5601_v50  ;;  %v5672_v49 = vld [vmem:[#allocation3 + $0x978] sm:$0xff] }
 0x357   :  { %6176 = vmatprep.subr.bf16.mxu1 %v5649_v51  ;;  %v5720_v50 = vld [vmem:[#allocation3 + $0xaf8] sm:$0xff] }
 0x358   :  { %v5676_v51 = vld [vmem:[#allocation3 + $0x998] sm:$0xff] }
 0x359   :  { %6136 = vmatpush1.bf16.msra.mxu0 %v5600_v52  ;;  %v5724_v52 = vld [vmem:[#allocation3 + $0xb18] sm:$0xff] }
 0x35a   :  { %6177 = vmatpush1.bf16.msra.mxu1 %v5648_v53  ;;  %6137 = vmatprep.subr.bf16.mxu0 %v5604_v54  ;;  %v5675_v53 = vld [vmem:[#allocation3 + $0x990] sm:$0xff] }
 0x35b   :  { %6178 = vmatprep.subr.bf16.mxu1 %v5652_v55  ;;  %v5723_v54 = vld [vmem:[#allocation3 + $0xb10] sm:$0xff] }
 0x35c   :  { %v5679_v55 = vld [vmem:[#allocation3 + $0x9b0] sm:$0xff] }
 0x35d   :  { %6138 = vmatpush1.bf16.msra.mxu0 %v5603_v56  ;;  %v5727_v56 = vld [vmem:[#allocation3 + $0xb30] sm:$0xff] }
 0x35e   :  { %6179 = vmatpush1.bf16.msra.mxu1 %v5651_v57  ;;  %6139 = vmatprep.subr.bf16.mxu0 %v5607_v58  ;;  %v5678_v57 = vld [vmem:[#allocation3 + $0x9a8] sm:$0xff] }
 0x35f   :  { %6180 = vmatprep.subr.bf16.mxu1 %v5655_v59  ;;  %v5726_v58 = vld [vmem:[#allocation3 + $0xb28] sm:$0xff] }
 0x360   :  { %v5682_v59 = vld [vmem:[#allocation3 + $0x9c8] sm:$0xff] }
 0x361   :  { %6140 = vmatpush1.bf16.msra.mxu0 %v5606_v60  ;;  %v5730_v60 = vld [vmem:[#allocation3 + $0xb48] sm:$0xff] }
 0x362   :  { %6181 = vmatpush1.bf16.msra.mxu1 %v5654_v61  ;;  %6191 = vmatprep.subr.bf16.mxu0 %v5658_v48  ;;  %v5681_v61 = vld [vmem:[#allocation3 + $0x9c0] sm:$0xff] }
 0x363   :  { %6232 = vmatprep.subr.bf16.mxu1 %v5706_v63  ;;  %v5729_v48 = vld [vmem:[#allocation3 + $0xb40] sm:$0xff] }
 0x364   :  { %6142 = vmatmul.mubr.bf16.vlgmr.msra.gmra.mrb[8].mxu0 %v10658_v11  ;;  %v5685_v63 = vld [vmem:[#allocation3 + $0x9e0] sm:$0xff] }
 0x365   :  { %6183 = vmatmul.mubr.bf16.vlgmr.msra.gmra.mrb[16].mxu1 %v10664_v16  ;;  %6192 = vmatpush1.bf16.msra.mxu0 %v5657_v0  ;;  %v5733_v0 = vld [vmem:[#allocation3 + $0xb60] sm:$0xff] }
 0x366   :  { %6233 = vmatpush1.bf16.msra.mxu1 %v5705_v1  ;;  %6193 = vmatprep.subr.bf16.mxu0 %v5661_v4  ;;  %v5684_v1 = vld [vmem:[#allocation3 + $0x9d8] sm:$0xff] }
 0x367   :  { %6234 = vmatprep.subr.bf16.mxu1 %v5709_v8  ;;  %6223 = vmatprep.mubr.bf16.mxu0 %v10670_v19  ;;  %v5732_v4 = vld [vmem:[#allocation3 + $0xb58] sm:$0xff] }
 0x368   :  { %6264 = vmatprep.mubr.bf16.mxu1 %v10674_v24  ;;  %v5688_v8 = vld [vmem:[#allocation3 + $0x9f8] sm:$0xff] }
 0x369   :  { %6194 = vmatpush1.bf16.msra.mxu0 %v5660_v12  ;;  %v5736_v12 = vld [vmem:[#allocation3 + $0xb78] sm:$0xff] }
 0x36a   :  { %6235 = vmatpush1.bf16.msra.mxu1 %v5708_v13  ;;  %6195 = vmatprep.subr.bf16.mxu0 %v5664_v25  ;;  %v5687_v13 = vld [vmem:[#allocation3 + $0x9f0] sm:$0xff] }
 0x36b   :  { %6236 = vmatprep.subr.bf16.mxu1 %v5712_v26  ;;  %v5735_v25 = vld [vmem:[#allocation3 + $0xb70] sm:$0xff] }
 0x36c   :  { %v5691_v26 = vld [vmem:[#allocation3 + $0xa10] sm:$0xff] }
 0x36d   :  { %6196 = vmatpush1.bf16.msra.mxu0 %v5663_v27  ;;  %v5739_v27 = vld [vmem:[#allocation3 + $0xb90] sm:$0xff] }
 0x36e   :  { %6237 = vmatpush1.bf16.msra.mxu1 %v5711_v28  ;;  %6197 = vmatprep.subr.bf16.mxu0 %v5667_v30  ;;  %v5690_v28 = vld [vmem:[#allocation3 + $0xa08] sm:$0xff] }
 0x36f   :  { %6238 = vmatprep.subr.bf16.mxu1 %v5715_v31  ;;  %v5738_v30 = vld [vmem:[#allocation3 + $0xb88] sm:$0xff] }
 0x370   :  { %v5694_v31 = vld [vmem:[#allocation3 + $0xa28] sm:$0xff] }
 0x371   :  { %6198 = vmatpush1.bf16.msra.mxu0 %v5666_v32  ;;  %v5742_v32 = vld [vmem:[#allocation3 + $0xba8] sm:$0xff] }
 0x372   :  { %6239 = vmatpush1.bf16.msra.mxu1 %v5714_v33  ;;  %6199 = vmatprep.subr.bf16.mxu0 %v5670_v36  ;;  %v5693_v33 = vld [vmem:[#allocation3 + $0xa20] sm:$0xff] }
 0x373   :  { %6240 = vmatprep.subr.bf16.mxu1 %v5718_v37  ;;  %v5741_v36 = vld [vmem:[#allocation3 + $0xba0] sm:$0xff] }
 0x374   :  { %v5697_v37 = vld [vmem:[#allocation3 + $0xa40] sm:$0xff] }
 0x375   :  { %6200 = vmatpush1.bf16.msra.mxu0 %v5669_v43  ;;  %v5745_v43 = vld [vmem:[#allocation3 + $0xbc0] sm:$0xff] }
 0x376   :  { %6241 = vmatpush1.bf16.msra.mxu1 %v5717_v45  ;;  %6201 = vmatprep.subr.bf16.mxu0 %v5673_v46  ;;  %v5696_v45 = vld [vmem:[#allocation3 + $0xa38] sm:$0xff] }
 0x377   :  { %6242 = vmatprep.subr.bf16.mxu1 %v5721_v47  ;;  %v5744_v46 = vld [vmem:[#allocation3 + $0xbb8] sm:$0xff] }
 0x378   :  { %v5700_v47 = vld [vmem:[#allocation3 + $0xa58] sm:$0xff] }
 0x379   :  { %6202 = vmatpush1.bf16.msra.mxu0 %v5672_v49  ;;  %v5748_v49 = vld [vmem:[#allocation3 + $0xbd8] sm:$0xff] }
 0x37a   :  { %6243 = vmatpush1.bf16.msra.mxu1 %v5720_v50  ;;  %6203 = vmatprep.subr.bf16.mxu0 %v5676_v51  ;;  %v5699_v50 = vld [vmem:[#allocation3 + $0xa50] sm:$0xff] }
 0x37b   :  { %6244 = vmatprep.subr.bf16.mxu1 %v5724_v52  ;;  %v5747_v51 = vld [vmem:[#allocation3 + $0xbd0] sm:$0xff] }
 0x37c   :  { %v5703_v52 = vld [vmem:[#allocation3 + $0xa70] sm:$0xff] }
 0x37d   :  { %6204 = vmatpush1.bf16.msra.mxu0 %v5675_v53  ;;  %v5751_v53 = vld [vmem:[#allocation3 + $0xbf0] sm:$0xff] }
 0x37e   :  { %6245 = vmatpush1.bf16.msra.mxu1 %v5723_v54  ;;  %6205 = vmatprep.subr.bf16.mxu0 %v5679_v55  ;;  %v5702_v54 = vld [vmem:[#allocation3 + $0xa68] sm:$0xff] }
 0x37f   :  { %6246 = vmatprep.subr.bf16.mxu1 %v5727_v56  ;;  %v5750_v55 = vld [vmem:[#allocation3 + $0xbe8] sm:$0xff] }
 0x380   :  { %v5754_v56 = vld [vmem:[#allocation3 + $0xc08] sm:$0xff] }
 0x381   :  { %6206 = vmatpush1.bf16.msra.mxu0 %v5678_v57  ;;  %v5802_v57 = vld [vmem:[#allocation3 + $0xd88] sm:$0xff] }
 0x382   :  { %6247 = vmatpush1.bf16.msra.mxu1 %v5726_v58  ;;  %6207 = vmatprep.subr.bf16.mxu0 %v5682_v59  ;;  %v5753_v58 = vld [vmem:[#allocation3 + $0xc00] sm:$0xff] }
 0x383   :  { %6248 = vmatprep.subr.bf16.mxu1 %v5730_v60  ;;  %v5801_v59 = vld [vmem:[#allocation3 + $0xd80] sm:$0xff] }
 0x384   :  { %v5757_v60 = vld [vmem:[#allocation3 + $0xc20] sm:$0xff] }
 0x385   :  { %6208 = vmatpush1.bf16.msra.mxu0 %v5681_v61  ;;  %v5805_v61 = vld [vmem:[#allocation3 + $0xda0] sm:$0xff] }
 0x386   :  { %6249 = vmatpush1.bf16.msra.mxu1 %v5729_v48  ;;  %6209 = vmatprep.subr.bf16.mxu0 %v5685_v63  ;;  %v5756_v48 = vld [vmem:[#allocation3 + $0xc18] sm:$0xff] }
 0x387   :  { %6250 = vmatprep.subr.bf16.mxu1 %v5733_v0  ;;  %v5804_v63 = vld [vmem:[#allocation3 + $0xd98] sm:$0xff] }
 0x388   :  { %v5760_v0 = vld [vmem:[#allocation3 + $0xc38] sm:$0xff] }
 0x389   :  { %6210 = vmatpush1.bf16.msra.mxu0 %v5684_v1  ;;  %v5808_v1 = vld [vmem:[#allocation3 + $0xdb8] sm:$0xff] }
 0x38a   :  { %6251 = vmatpush1.bf16.msra.mxu1 %v5732_v4  ;;  %6211 = vmatprep.subr.bf16.mxu0 %v5688_v8  ;;  %v5759_v4 = vld [vmem:[#allocation3 + $0xc30] sm:$0xff] }
 0x38b   :  { %6252 = vmatprep.subr.bf16.mxu1 %v5736_v12  ;;  %v5807_v8 = vld [vmem:[#allocation3 + $0xdb0] sm:$0xff] }
 0x38c   :  { %v5763_v12 = vld [vmem:[#allocation3 + $0xc50] sm:$0xff] }
 0x38d   :  { %6212 = vmatpush1.bf16.msra.mxu0 %v5687_v13  ;;  %v5811_v13 = vld [vmem:[#allocation3 + $0xdd0] sm:$0xff] }
 0x38e   :  { %6253 = vmatpush1.bf16.msra.mxu1 %v5735_v25  ;;  %6213 = vmatprep.subr.bf16.mxu0 %v5691_v26  ;;  %v5762_v25 = vld [vmem:[#allocation3 + $0xc48] sm:$0xff] }
 0x38f   :  { %6254 = vmatprep.subr.bf16.mxu1 %v5739_v27  ;;  %v5810_v26 = vld [vmem:[#allocation3 + $0xdc8] sm:$0xff] }
 0x390   :  { %v5766_v27 = vld [vmem:[#allocation3 + $0xc68] sm:$0xff] }
 0x391   :  { %6214 = vmatpush1.bf16.msra.mxu0 %v5690_v28  ;;  %v5814_v28 = vld [vmem:[#allocation3 + $0xde8] sm:$0xff] }
 0x392   :  { %6255 = vmatpush1.bf16.msra.mxu1 %v5738_v30  ;;  %6215 = vmatprep.subr.bf16.mxu0 %v5694_v31  ;;  %v5765_v30 = vld [vmem:[#allocation3 + $0xc60] sm:$0xff] }
 0x393   :  { %6256 = vmatprep.subr.bf16.mxu1 %v5742_v32  ;;  %v5813_v31 = vld [vmem:[#allocation3 + $0xde0] sm:$0xff] }
 0x394   :  { %v5769_v32 = vld [vmem:[#allocation3 + $0xc80] sm:$0xff] }
 0x395   :  { %6216 = vmatpush1.bf16.msra.mxu0 %v5693_v33  ;;  %v5817_v33 = vld [vmem:[#allocation3 + $0xe00] sm:$0xff] }
 0x396   :  { %6257 = vmatpush1.bf16.msra.mxu1 %v5741_v36  ;;  %6217 = vmatprep.subr.bf16.mxu0 %v5697_v37  ;;  %v5768_v36 = vld [vmem:[#allocation3 + $0xc78] sm:$0xff] }
 0x397   :  { %6258 = vmatprep.subr.bf16.mxu1 %v5745_v43  ;;  %v5816_v37 = vld [vmem:[#allocation3 + $0xdf8] sm:$0xff] }
 0x399   :  { %6218 = vmatpush1.bf16.msra.mxu0 %v5696_v45 }
 0x39a   :  { %6259 = vmatpush1.bf16.msra.mxu1 %v5744_v46  ;;  %6219 = vmatprep.subr.bf16.mxu0 %v5700_v47  ;;  %v5772_v46 = vld [vmem:[#allocation3 + $0xc98] sm:$0xff] }
 0x39b   :  { %6260 = vmatprep.subr.bf16.mxu1 %v5748_v49  ;;  %v5820_v47 = vld [vmem:[#allocation3 + $0xe18] sm:$0xff] }
 0x39d   :  { %6220 = vmatpush1.bf16.msra.mxu0 %v5699_v50 }
 0x39e   :  { %6261 = vmatpush1.bf16.msra.mxu1 %v5747_v51  ;;  %6221 = vmatprep.subr.bf16.mxu0 %v5703_v52 }
 0x39f   :  { %6262 = vmatprep.subr.bf16.mxu1 %v5751_v53 }
 0x3a1   :  { %6222 = vmatpush1.bf16.msra.mxu0 %v5702_v54 }
 0x3a2   :  { %6263 = vmatpush1.bf16.msra.mxu1 %v5750_v55  ;;  %6273 = vmatprep.subr.bf16.mxu0 %v5754_v56  ;;  %v5771_v56 = vld [vmem:[#allocation3 + $0xc90] sm:$0xff] }
 0x3a3   :  { %6314 = vmatprep.subr.bf16.mxu1 %v5802_v57  ;;  %v5819_v57 = vld [vmem:[#allocation3 + $0xe10] sm:$0xff] }
 0x3a4   :  { %6224 = vmatmul.mubr.bf16.vlgmr.msra.gmra.mrb[12].mxu0 %v10668_v18 }
 0x3a5   :  { %6265 = vmatmul.mubr.bf16.vlgmr.msra.gmra.mrb[20].mxu1 %v10672_v23  ;;  %6274 = vmatpush1.bf16.msra.mxu0 %v5753_v58 }
 0x3a6   :  { %6315 = vmatpush1.bf16.msra.mxu1 %v5801_v59  ;;  %6275 = vmatprep.subr.bf16.mxu0 %v5757_v60  ;;  %v5775_v59 = vld [vmem:[#allocation3 + $0xcb0] sm:$0xff] }
 0x3a7   :  { %6316 = vmatprep.subr.bf16.mxu1 %v5805_v61  ;;  %6305 = vmatprep.mubr.bf16.mxu0 %v10680_v38  ;;  %v5823_v60 = vld [vmem:[#allocation3 + $0xe30] sm:$0xff]  ;;  %v5774_v61 = vld [vmem:[#allocation3 + $0xca8] sm:$0xff] }
 0x3a8   :  { %6346 = vmatprep.mubr.bf16.mxu1 %v10688_v39 }
 0x3a9   :  { %6276 = vmatpush1.bf16.msra.mxu0 %v5756_v48  ;;  %v5822_v48 = vld [vmem:[#allocation3 + $0xe28] sm:$0xff] }
 0x3aa   :  { %6317 = vmatpush1.bf16.msra.mxu1 %v5804_v63  ;;  %6277 = vmatprep.subr.bf16.mxu0 %v5760_v0  ;;  %v5778_v63 = vld [vmem:[#allocation3 + $0xcc8] sm:$0xff] }
 0x3ab   :  { %6318 = vmatprep.subr.bf16.mxu1 %v5808_v1  ;;  %v5826_v0 = vld [vmem:[#allocation3 + $0xe48] sm:$0xff]  ;;  %v5777_v1 = vld [vmem:[#allocation3 + $0xcc0] sm:$0xff] }
 0x3ad   :  { %6278 = vmatpush1.bf16.msra.mxu0 %v5759_v4  ;;  %v5825_v4 = vld [vmem:[#allocation3 + $0xe40] sm:$0xff] }
 0x3ae   :  { %6319 = vmatpush1.bf16.msra.mxu1 %v5807_v8  ;;  %6279 = vmatprep.subr.bf16.mxu0 %v5763_v12  ;;  %v5781_v8 = vld [vmem:[#allocation3 + $0xce0] sm:$0xff] }
 0x3af   :  { %6320 = vmatprep.subr.bf16.mxu1 %v5811_v13  ;;  %v5829_v12 = vld [vmem:[#allocation3 + $0xe60] sm:$0xff]  ;;  %v5780_v13 = vld [vmem:[#allocation3 + $0xcd8] sm:$0xff] }
 0x3b1   :  { %6280 = vmatpush1.bf16.msra.mxu0 %v5762_v25  ;;  %v5828_v25 = vld [vmem:[#allocation3 + $0xe58] sm:$0xff] }
 0x3b2   :  { %6321 = vmatpush1.bf16.msra.mxu1 %v5810_v26  ;;  %6281 = vmatprep.subr.bf16.mxu0 %v5766_v27  ;;  %v5784_v26 = vld [vmem:[#allocation3 + $0xcf8] sm:$0xff] }
 0x3b3   :  { %6322 = vmatprep.subr.bf16.mxu1 %v5814_v28  ;;  %v5832_v27 = vld [vmem:[#allocation3 + $0xe78] sm:$0xff]  ;;  %v5783_v28 = vld [vmem:[#allocation3 + $0xcf0] sm:$0xff] }
 0x3b5   :  { %6282 = vmatpush1.bf16.msra.mxu0 %v5765_v30  ;;  %v5831_v30 = vld [vmem:[#allocation3 + $0xe70] sm:$0xff] }
 0x3b6   :  { %6323 = vmatpush1.bf16.msra.mxu1 %v5813_v31  ;;  %6283 = vmatprep.subr.bf16.mxu0 %v5769_v32  ;;  %v5787_v31 = vld [vmem:[#allocation3 + $0xd10] sm:$0xff] }
 0x3b7   :  { %6324 = vmatprep.subr.bf16.mxu1 %v5817_v33  ;;  %v5979_v43 = vpop.f32.mrb[0].mxu0  ;;  %v5835_v32 = vld [vmem:[#allocation3 + $0xe90] sm:$0xff]  ;;  %v5786_v33 = vld [vmem:[#allocation3 + $0xd08] sm:$0xff] }
 0x3b8   :  { %v6020_v45 = vpop.f32.mrb[8].mxu1  ;;  %v5981_v50 = vpop.f32.mrb[1].mxu0 }
 0x3b9   :  { %v10710_v49 = vadd.f32 %v6020_v45, %v5979_v43  ;;  %v6022_v51 = vpop.f32.mrb[9].mxu1  ;;  %v5983_v53 = vpop.f32.mrb[2].mxu0  ;;  %6284 = vmatpush1.bf16.msra.mxu0 %v5768_v36  ;;  %v5834_v36 = vld [vmem:[#allocation3 + $0xe88] sm:$0xff]  ;;  %v5789_v45 = vld [vmem:[#allocation3 + $0xd20] sm:$0xff] }
 0x3ba   :  { %v10712_v52 = vadd.f32 %v6022_v51, %v5981_v50  ;;  %6325 = vmatpush1.bf16.msra.mxu1 %v5816_v37  ;;  %v6024_v54 = vpop.f32.mrb[10].mxu1  ;;  %v5984_v55 = vpop.f32.mrb[3].mxu0  ;;  %6285 = vmatprep.subr.bf16.mxu0 %v5772_v46  ;;  %v5790_v37 = vld [vmem:[#allocation3 + $0xd28] sm:$0xff]  ;;  %v5837_v46 = vld [vmem:[#allocation3 + $0xea0] sm:$0xff]  ;;  %v5792_v51 = vld [vmem:[#allocation3 + $0xd38] sm:$0xff] }
 0x3bb   :  { %6326 = vmatprep.subr.bf16.mxu1 %v5820_v47  ;;  %v6025_v58 = vpop.f32.mrb[11].mxu1  ;;  %v5838_v43 = vld [vmem:[#allocation3 + $0xea8] sm:$0xff]  ;;  %v5793_v47 = vld [vmem:[#allocation3 + $0xd40] sm:$0xff]  ;;  %v5840_v53 = vld [vmem:[#allocation3 + $0xeb8] sm:$0xff] }
 0x3bc   :  { %v5841_v50 = vld [vmem:[#allocation3 + $0xec0] sm:$0xff]  ;;  %v5796_v54 = vld [vmem:[#allocation3 + $0xd58] sm:$0xff]  ;;  %v5799_v58 = vld [vmem:[#allocation3 + $0xd70] sm:$0xff] }
 0x3bd   :  { %6286 = vmatpush1.bf16.msra.mxu0 %v5771_v56  ;;  %v5844_v55 = vld [vmem:[#allocation3 + $0xed8] sm:$0xff]  ;;  %v5795_v56 = vld [vmem:[#allocation3 + $0xd50] sm:$0xff] }
 0x3be   :  { %6327 = vmatpush1.bf16.msra.mxu1 %v5819_v57  ;;  %6287 = vmatprep.subr.bf16.mxu0 %v5775_v59  ;;  %v5843_v57 = vld [vmem:[#allocation3 + $0xed0] sm:$0xff] }
 0x3bf   :  { %6328 = vmatprep.subr.bf16.mxu1 %v5823_v60  ;;  %v5847_v59 = vld [vmem:[#allocation3 + $0xef0] sm:$0xff]  ;;  %v5798_v60 = vld [vmem:[#allocation3 + $0xd68] sm:$0xff] }
 0x3c1   :  { %6288 = vmatpush1.bf16.msra.mxu0 %v5774_v61  ;;  %v5846_v61 = vld [vmem:[#allocation3 + $0xee8] sm:$0xff] }
 0x3c2   :  { %6329 = vmatpush1.bf16.msra.mxu1 %v5822_v48  ;;  %6289 = vmatprep.subr.bf16.mxu0 %v5778_v63  ;;  %v5850_v48 = vld [vmem:[#allocation3 + $0xf08] sm:$0xff] }
 0x3c3   :  { %6330 = vmatprep.subr.bf16.mxu1 %v5826_v0  ;;  %v5898_v63 = vld [vmem:[#allocation3 + $0x1088] sm:$0xff]  ;;  %v5849_v0 = vld [vmem:[#allocation3 + $0xf00] sm:$0xff] }
 0x3c5   :  { %6290 = vmatpush1.bf16.msra.mxu0 %v5777_v1  ;;  %v5897_v1 = vld [vmem:[#allocation3 + $0x1080] sm:$0xff] }
 0x3c6   :  { %6331 = vmatpush1.bf16.msra.mxu1 %v5825_v4  ;;  %6291 = vmatprep.subr.bf16.mxu0 %v5781_v8  ;;  %v5853_v4 = vld [vmem:[#allocation3 + $0xf20] sm:$0xff] }
 0x3c7   :  { %6332 = vmatprep.subr.bf16.mxu1 %v5829_v12  ;;  %v5901_v8 = vld [vmem:[#allocation3 + $0x10a0] sm:$0xff]  ;;  %v5852_v12 = vld [vmem:[#allocation3 + $0xf18] sm:$0xff] }
 0x3c9   :  { %6292 = vmatpush1.bf16.msra.mxu0 %v5780_v13  ;;  %v5900_v13 = vld [vmem:[#allocation3 + $0x1098] sm:$0xff] }
 0x3ca   :  { %6333 = vmatpush1.bf16.msra.mxu1 %v5828_v25  ;;  %6293 = vmatprep.subr.bf16.mxu0 %v5784_v26  ;;  %v5856_v25 = vld [vmem:[#allocation3 + $0xf38] sm:$0xff] }
 0x3cb   :  { %6334 = vmatprep.subr.bf16.mxu1 %v5832_v27  ;;  %v5904_v26 = vld [vmem:[#allocation3 + $0x10b8] sm:$0xff]  ;;  %v5855_v27 = vld [vmem:[#allocation3 + $0xf30] sm:$0xff] }
 0x3cd   :  { %6294 = vmatpush1.bf16.msra.mxu0 %v5783_v28  ;;  %v5903_v28 = vld [vmem:[#allocation3 + $0x10b0] sm:$0xff] }
 0x3ce   :  { %6335 = vmatpush1.bf16.msra.mxu1 %v5831_v30  ;;  %6295 = vmatprep.subr.bf16.mxu0 %v5787_v31  ;;  %v5859_v30 = vld [vmem:[#allocation3 + $0xf50] sm:$0xff] }
 0x3cf   :  { %6336 = vmatprep.subr.bf16.mxu1 %v5835_v32  ;;  %v5907_v31 = vld [vmem:[#allocation3 + $0x10d0] sm:$0xff]  ;;  %v5858_v32 = vld [vmem:[#allocation3 + $0xf48] sm:$0xff] }
 0x3d1   :  { %6296 = vmatpush1.bf16.msra.mxu0 %v5786_v33  ;;  %v5906_v33 = vld [vmem:[#allocation3 + $0x10c8] sm:$0xff] }
 0x3d2   :  { %6337 = vmatpush1.bf16.msra.mxu1 %v5834_v36  ;;  %6297 = vmatprep.subr.bf16.mxu0 %v5790_v37  ;;  %v5862_v36 = vld [vmem:[#allocation3 + $0xf68] sm:$0xff] }
 0x3d3   :  { %6338 = vmatprep.subr.bf16.mxu1 %v5838_v43  ;;  %v5910_v37 = vld [vmem:[#allocation3 + $0x10e8] sm:$0xff]  ;;  %v5861_v43 = vld [vmem:[#allocation3 + $0xf60] sm:$0xff] }
 0x3d5   :  { %6298 = vmatpush1.bf16.msra.mxu0 %v5789_v45  ;;  %v5909_v45 = vld [vmem:[#allocation3 + $0x10e0] sm:$0xff] }
 0x3d6   :  { %6339 = vmatpush1.bf16.msra.mxu1 %v5837_v46  ;;  %6299 = vmatprep.subr.bf16.mxu0 %v5793_v47  ;;  %v5865_v46 = vld [vmem:[#allocation3 + $0xf80] sm:$0xff] }
 0x3d7   :  { %6340 = vmatprep.subr.bf16.mxu1 %v5841_v50  ;;  %v5913_v47 = vld [vmem:[#allocation3 + $0x1100] sm:$0xff]  ;;  %v5864_v50 = vld [vmem:[#allocation3 + $0xf78] sm:$0xff] }
 0x3d9   :  { %6300 = vmatpush1.bf16.msra.mxu0 %v5792_v51  ;;  %v5912_v51 = vld [vmem:[#allocation3 + $0x10f8] sm:$0xff] }
 0x3da   :  { %6341 = vmatpush1.bf16.msra.mxu1 %v5840_v53  ;;  %6301 = vmatprep.subr.bf16.mxu0 %v5796_v54 }
 0x3db   :  { %6342 = vmatprep.subr.bf16.mxu1 %v5844_v55  ;;  %v5868_v55 = vld [vmem:[#allocation3 + $0xf98] sm:$0xff] }
 0x3dd   :  { %6302 = vmatpush1.bf16.msra.mxu0 %v5795_v56  ;;  %v5916_v56 = vld [vmem:[#allocation3 + $0x1118] sm:$0xff] }
 0x3de   :  { %6343 = vmatpush1.bf16.msra.mxu1 %v5843_v57  ;;  %6303 = vmatprep.subr.bf16.mxu0 %v5799_v58 }
 0x3df   :  { %6344 = vmatprep.subr.bf16.mxu1 %v5847_v59 }
 0x3e1   :  { %6304 = vmatpush1.bf16.msra.mxu0 %v5798_v60 }
 0x3e2   :  { %6345 = vmatpush1.bf16.msra.mxu1 %v5846_v61  ;;  %6355 = vmatprep.subr.bf16.mxu0 %v5850_v48 }
 0x3e3   :  { %6396 = vmatprep.subr.bf16.mxu1 %v5898_v63 }
 0x3e4   :  { %6306 = vmatmul.mubr.bf16.vlgmr.msra.gmra.mrb[16].mxu0 %v10676_v34 }
 0x3e5   :  { %6347 = vmatmul.mubr.bf16.vlgmr.msra.gmra.mrb[24].mxu1 %v10682_v40  ;;  %6356 = vmatpush1.bf16.msra.mxu0 %v5849_v0 }
 0x3e6   :  { %6397 = vmatpush1.bf16.msra.mxu1 %v5897_v1  ;;  %6357 = vmatprep.subr.bf16.mxu0 %v5853_v4  ;;  %v5867_v1 = vld [vmem:[#allocation3 + $0xf90] sm:$0xff] }
 0x3e7   :  { %6398 = vmatprep.subr.bf16.mxu1 %v5901_v8  ;;  %6387 = vmatprep.mubr.bf16.mxu0 %v10684_v41  ;;  %v5915_v4 = vld [vmem:[#allocation3 + $0x1110] sm:$0xff] }
 0x3e8   :  { %6428 = vmatprep.mubr.bf16.mxu1 %v10690_v44 }
 0x3e9   :  { %6358 = vmatpush1.bf16.msra.mxu0 %v5852_v12 }
 0x3ea   :  { %6399 = vmatpush1.bf16.msra.mxu1 %v5900_v13  ;;  %6359 = vmatprep.subr.bf16.mxu0 %v5856_v25  ;;  %v5871_v13 = vld [vmem:[#allocation3 + $0xfb0] sm:$0xff]  ;;  %v5918_v25 = vld [vmem:[#allocation3 + $0x1128] sm:$0xff] }
 0x3eb   :  { %6400 = vmatprep.subr.bf16.mxu1 %v5904_v26  ;;  %v5874_v26 = vld [vmem:[#allocation3 + $0xfc8] sm:$0xff] }
 0x3ed   :  { %6360 = vmatpush1.bf16.msra.mxu0 %v5855_v27  ;;  %v5922_v27 = vld [vmem:[#allocation3 + $0x1148] sm:$0xff] }
 0x3ee   :  { %6401 = vmatpush1.bf16.msra.mxu1 %v5903_v28  ;;  %6361 = vmatprep.subr.bf16.mxu0 %v5859_v30  ;;  %v5873_v28 = vld [vmem:[#allocation3 + $0xfc0] sm:$0xff] }
 0x3ef   :  { %6402 = vmatprep.subr.bf16.mxu1 %v5907_v31  ;;  %v5921_v30 = vld [vmem:[#allocation3 + $0x1140] sm:$0xff] }
 0x3f0   :  { %v5877_v31 = vld [vmem:[#allocation3 + $0xfe0] sm:$0xff] }
 0x3f1   :  { %6362 = vmatpush1.bf16.msra.mxu0 %v5858_v32  ;;  %v5925_v32 = vld [vmem:[#allocation3 + $0x1160] sm:$0xff] }
 0x3f2   :  { %6403 = vmatpush1.bf16.msra.mxu1 %v5906_v33  ;;  %6363 = vmatprep.subr.bf16.mxu0 %v5862_v36  ;;  %v5876_v33 = vld [vmem:[#allocation3 + $0xfd8] sm:$0xff] }
 0x3f3   :  { %6404 = vmatprep.subr.bf16.mxu1 %v5910_v37  ;;  %v5924_v36 = vld [vmem:[#allocation3 + $0x1158] sm:$0xff] }
 0x3f4   :  { %v5880_v37 = vld [vmem:[#allocation3 + $0xff8] sm:$0xff] }
 0x3f5   :  { %6364 = vmatpush1.bf16.msra.mxu0 %v5861_v43  ;;  %v5928_v43 = vld [vmem:[#allocation3 + $0x1178] sm:$0xff] }
 0x3f6   :  { %6405 = vmatpush1.bf16.msra.mxu1 %v5909_v45  ;;  %6365 = vmatprep.subr.bf16.mxu0 %v5865_v46  ;;  %v5879_v45 = vld [vmem:[#allocation3 + $0xff0] sm:$0xff] }
 0x3f7   :  { %6406 = vmatprep.subr.bf16.mxu1 %v5913_v47  ;;  %v6061_v53 = vpop.f32.mrb[4].mxu0  ;;  %v5927_v46 = vld [vmem:[#allocation3 + $0x1170] sm:$0xff] }
 0x3f8   :  { %v6102_v54 = vpop.f32.mrb[12].mxu1  ;;  %v6062_v57 = vadd.f32 %v6061_v53, %v10710_v49  ;;  %v6063_v58 = vpop.f32.mrb[5].mxu0  ;;  %v5919_v49 = vld [vmem:[#allocation3 + $0x1130] sm:$0xff]  ;;  %v5930_v53 = vld [vmem:[#allocation3 + $0x1188] sm:$0xff] }
 0x3f9   :  { %v6104_v59 = vpop.f32.mrb[13].mxu1  ;;  %v6064_v60 = vadd.f32 %v6063_v58, %v10712_v52  ;;  %v6065_v61 = vpop.f32.mrb[6].mxu0  ;;  %6366 = vmatpush1.bf16.msra.mxu0 %v5864_v50  ;;  %v5870_v52 = vld [vmem:[#allocation3 + $0xfa8] sm:$0xff]  ;;  %v5883_v47 = vld [vmem:[#allocation3 + $0x1010] sm:$0xff]  ;;  %v5889_v58 = vld [vmem:[#allocation3 + $0x1040] sm:$0xff] }
 0x3fa   :  { %6407 = vmatpush1.bf16.msra.mxu1 %v5912_v51  ;;  %v6106_v48 = vpop.f32.mrb[14].mxu1  ;;  %v10720_v63 = vadd.f32 %v6102_v54, %v6062_v57  ;;  %v6066_v0 = vpop.f32.mrb[7].mxu0  ;;  %6367 = vmatprep.subr.bf16.mxu0 %v5868_v55  ;;  %v5931_v50 = vld [vmem:[#allocation3 + $0x1190] sm:$0xff]  ;;  %v5882_v51 = vld [vmem:[#allocation3 + $0x1008] sm:$0xff]  ;;  %v5933_v57 = vld [vmem:[#allocation3 + $0x11a0] sm:$0xff] }
 0x3fb   :  { %6408 = vmatprep.subr.bf16.mxu1 %v5916_v56  ;;  %v6107_v8 = vpop.f32.mrb[15].mxu1  ;;  %v10722_v12 = vadd.f32 %v6104_v59, %v6064_v60  ;;  %v5886_v54 = vld [vmem:[#allocation3 + $0x1028] sm:$0xff]  ;;  %v5885_v56 = vld [vmem:[#allocation3 + $0x1020] sm:$0xff]  ;;  %v5888_v60 = vld [vmem:[#allocation3 + $0x1038] sm:$0xff] }
 0x3fc   :  { %v5934_v55 = vld [vmem:[#allocation3 + $0x11a8] sm:$0xff]  ;;  %v5937_v59 = vld [vmem:[#allocation3 + $0x11c0] sm:$0xff]  ;;  %v5936_v61 = vld [vmem:[#allocation3 + $0x11b8] sm:$0xff] }
 0x3fd   :  { %6368 = vmatpush1.bf16.msra.mxu0 %v5867_v1  ;;  %v5892_v48 = vld [vmem:[#allocation3 + $0x1058] sm:$0xff]  ;;  %v5891_v1 = vld [vmem:[#allocation3 + $0x1050] sm:$0xff] }
 0x3fe   :  { %6409 = vmatpush1.bf16.msra.mxu1 %v5915_v4  ;;  %6369 = vmatprep.subr.bf16.mxu0 %v5871_v13  ;;  %v5940_v0 = vld [vmem:[#allocation3 + $0x11d8] sm:$0xff]  ;;  %v5939_v4 = vld [vmem:[#allocation3 + $0x11d0] sm:$0xff] }
 0x3ff   :  { %6410 = vmatprep.subr.bf16.mxu1 %v5919_v49  ;;  %v5895_v8 = vld [vmem:[#allocation3 + $0x1070] sm:$0xff]  ;;  %v5894_v49 = vld [vmem:[#allocation3 + $0x1068] sm:$0xff] }
 0x400   :  { %v5943_v13 = vld [vmem:[#allocation3 + $0x11f0] sm:$0xff] }
 0x401   :  { %6370 = vmatpush1.bf16.msra.mxu0 %v5870_v52  ;;  %v5942_v52 = vld [vmem:[#allocation3 + $0x11e8] sm:$0xff] }
 0x402   :  { %6411 = vmatpush1.bf16.msra.mxu1 %v5918_v25  ;;  %6371 = vmatprep.subr.bf16.mxu0 %v5874_v26  ;;  %v5395_v25 = vld [vmem:[#allocation3 + $0xd0] sm:$0xff] }
 0x403   :  { %6412 = vmatprep.subr.bf16.mxu1 %v5922_v27  ;;  %v5443_v26 = vld [vmem:[#allocation3 + $0x250] sm:$0xff] }
 0x404   :  { %v5371_v27 = vld [vmem:[#allocation3 + $0x10] sm:$0xff] }
 0x405   :  { %6372 = vmatpush1.bf16.msra.mxu0 %v5873_v28  ;;  %v5419_v28 = vld [vmem:[#allocation3 + $0x190] sm:$0xff] }
 0x406   :  { %6413 = vmatpush1.bf16.msra.mxu1 %v5921_v30  ;;  %6373 = vmatprep.subr.bf16.mxu0 %v5877_v31  ;;  %v5398_v30 = vld [vmem:[#allocation3 + $0xe8] sm:$0xff] }
 0x407   :  { %6414 = vmatprep.subr.bf16.mxu1 %v5925_v32  ;;  %v5446_v31 = vld [vmem:[#allocation3 + $0x268] sm:$0xff] }
 0x408   :  { %v5374_v32 = vld [vmem:[#allocation3 + $0x28] sm:$0xff] }
 0x409   :  { %6374 = vmatpush1.bf16.msra.mxu0 %v5876_v33  ;;  %v5422_v33 = vld [vmem:[#allocation3 + $0x1a8] sm:$0xff] }
 0x40a   :  { %6415 = vmatpush1.bf16.msra.mxu1 %v5924_v36  ;;  %6375 = vmatprep.subr.bf16.mxu0 %v5880_v37  ;;  %v5401_v36 = vld [vmem:[#allocation3 + $0x100] sm:$0xff] }
 0x40b   :  { %6416 = vmatprep.subr.bf16.mxu1 %v5928_v43  ;;  %v5449_v37 = vld [vmem:[#allocation3 + $0x280] sm:$0xff] }
 0x40c   :  { %v5377_v43 = vld [vmem:[#allocation3 + $0x40] sm:$0xff] }
 0x40d   :  { %6376 = vmatpush1.bf16.msra.mxu0 %v5879_v45  ;;  %v5425_v45 = vld [vmem:[#allocation3 + $0x1c0] sm:$0xff] }
 0x40e   :  { %6417 = vmatpush1.bf16.msra.mxu1 %v5927_v46  ;;  %6377 = vmatprep.subr.bf16.mxu0 %v5883_v47  ;;  %v5404_v46 = vld [vmem:[#allocation3 + $0x118] sm:$0xff] }
 0x40f   :  { %6418 = vmatprep.subr.bf16.mxu1 %v5931_v50  ;;  %v5452_v47 = vld [vmem:[#allocation3 + $0x298] sm:$0xff] }
 0x410   :  { %v5380_v50 = vld [vmem:[#allocation3 + $0x58] sm:$0xff] }
 0x411   :  { %6378 = vmatpush1.bf16.msra.mxu0 %v5882_v51  ;;  %v5428_v51 = vld [vmem:[#allocation3 + $0x1d8] sm:$0xff] }
 0x412   :  { %6419 = vmatpush1.bf16.msra.mxu1 %v5930_v53  ;;  %6379 = vmatprep.subr.bf16.mxu0 %v5886_v54  ;;  %v5407_v53 = vld [vmem:[#allocation3 + $0x130] sm:$0xff] }
 0x413   :  { %6420 = vmatprep.subr.bf16.mxu1 %v5934_v55  ;;  %v5455_v54 = vld [vmem:[#allocation3 + $0x2b0] sm:$0xff]  ;;  %v5410_v55 = vld [vmem:[#allocation3 + $0x148] sm:$0xff] }
 0x415   :  { %6380 = vmatpush1.bf16.msra.mxu0 %v5885_v56  ;;  %v5458_v56 = vld [vmem:[#allocation3 + $0x2c8] sm:$0xff] }
 0x416   :  { %6421 = vmatpush1.bf16.msra.mxu1 %v5933_v57  ;;  %6381 = vmatprep.subr.bf16.mxu0 %v5889_v58  ;;  %v5386_v57 = vld [vmem:[#allocation3 + $0x88] sm:$0xff] }
 0x417   :  { %6422 = vmatprep.subr.bf16.mxu1 %v5937_v59  ;;  %v5434_v58 = vld [vmem:[#allocation3 + $0x208] sm:$0xff] }
 0x419   :  { %6382 = vmatpush1.bf16.msra.mxu0 %v5888_v60 }
 0x41a   :  { %6423 = vmatpush1.bf16.msra.mxu1 %v5936_v61  ;;  %6383 = vmatprep.subr.bf16.mxu0 %v5892_v48  ;;  %v5413_v61 = vld [vmem:[#allocation3 + $0x160] sm:$0xff] }
 0x41b   :  { %6424 = vmatprep.subr.bf16.mxu1 %v5940_v0  ;;  %v5461_v48 = vld [vmem:[#allocation3 + $0x2e0] sm:$0xff] }
 0x41d   :  { %6384 = vmatpush1.bf16.msra.mxu0 %v5891_v1 }
 0x41e   :  { %6425 = vmatpush1.bf16.msra.mxu1 %v5939_v4  ;;  %6385 = vmatprep.subr.bf16.mxu0 %v5895_v8 }
 0x41f   :  { %6426 = vmatprep.subr.bf16.mxu1 %v5943_v13 }
 0x421   :  { %6386 = vmatpush1.bf16.msra.mxu0 %v5894_v49 }
 0x422   :  { %6427 = vmatpush1.bf16.msra.mxu1 %v5942_v52  ;;  %8596 = vmatprep.subr.bf16.mxu0 %v5395_v25 }
 0x423   :  { %8618 = vmatprep.subr.bf16.mxu1 %v5443_v26  ;;  %v5389_v26 = vld [vmem:[#allocation3 + $0xa0] sm:$0xff] }
 0x424   :  { %6388 = vmatmul.mubr.bf16.vlgmr.msra.gmra.mrb[20].mxu0 %v10678_v35 }
 0x425   :  { %6429 = vmatmul.mubr.bf16.vlgmr.msra.gmra.mrb[28].mxu1 %v10686_v42  ;;  %8597 = vmatpush3.bf16.msra.mxu0 %v5371_v27  ;;  %v5437_v27 = vld [vmem:[#allocation3 + $0x220] sm:$0xff] }
 0x426   :  { %8619 = vmatpush3.bf16.msra.mxu1 %v5419_v28  ;;  %8598 = vmatprep.subr.bf16.mxu0 %v5398_v30 }
 0x427   :  { %8620 = vmatprep.subr.bf16.mxu1 %v5446_v31  ;;  %6469 = vmatprep.mubr.bf16.mxu0 %v10646_v3  ;;  %v5383_v3 = vld [vmem:[#allocation3 + $0x70] sm:$0xff]  ;;  %v5416_v31 = vld [vmem:[#allocation3 + $0x178] sm:$0xff] }
 0x428   :  { %6509 = vmatprep.mubr.bf16.mxu1 %v10650_v6  ;;  %v5431_v6 = vld [vmem:[#allocation3 + $0x1f0] sm:$0xff] }
 0x429   :  { %8599 = vmatpush3.bf16.msra.mxu0 %v5374_v32  ;;  %v5440_v32 = vld [vmem:[#allocation3 + $0x238] sm:$0xff] }
 0x42a   :  { %8621 = vmatpush3.bf16.msra.mxu1 %v5422_v33  ;;  %8600 = vmatprep.subr.bf16.mxu0 %v5401_v36  ;;  %v5491_v33 = vld [vmem:[#allocation3 + $0x3d0] sm:$0xff] }
 0x42b   :  { %8622 = vmatprep.subr.bf16.mxu1 %v5449_v37  ;;  %v5539_v36 = vld [vmem:[#allocation3 + $0x550] sm:$0xff] }
 0x42c   :  { %v5467_v37 = vld [vmem:[#allocation3 + $0x310] sm:$0xff] }
 0x42d   :  { %8601 = vmatpush3.bf16.msra.mxu0 %v5377_v43  ;;  %v5515_v43 = vld [vmem:[#allocation3 + $0x490] sm:$0xff] }
 0x42e   :  { %8623 = vmatpush3.bf16.msra.mxu1 %v5425_v45  ;;  %8602 = vmatprep.subr.bf16.mxu0 %v5404_v46  ;;  %v5494_v45 = vld [vmem:[#allocation3 + $0x3e8] sm:$0xff] }
 0x42f   :  { %8624 = vmatprep.subr.bf16.mxu1 %v5452_v47  ;;  %v5542_v46 = vld [vmem:[#allocation3 + $0x568] sm:$0xff] }
 0x430   :  { %v5470_v47 = vld [vmem:[#allocation3 + $0x328] sm:$0xff] }
 0x431   :  { %8603 = vmatpush3.bf16.msra.mxu0 %v5380_v50  ;;  %v5518_v50 = vld [vmem:[#allocation3 + $0x4a8] sm:$0xff] }
 0x432   :  { %8625 = vmatpush3.bf16.msra.mxu1 %v5428_v51  ;;  %8604 = vmatprep.subr.bf16.mxu0 %v5407_v53  ;;  %v5497_v51 = vld [vmem:[#allocation3 + $0x400] sm:$0xff] }
 0x433   :  { %8626 = vmatprep.subr.bf16.mxu1 %v5455_v54  ;;  %v5545_v53 = vld [vmem:[#allocation3 + $0x580] sm:$0xff] }
 0x434   :  { %v5473_v54 = vld [vmem:[#allocation3 + $0x340] sm:$0xff] }
 0x435   :  { %8605 = vmatpush3.bf16.msra.mxu0 %v5383_v3  ;;  %v5500_v3 = vld [vmem:[#allocation3 + $0x418] sm:$0xff] }
 0x436   :  { %8627 = vmatpush3.bf16.msra.mxu1 %v5431_v6  ;;  %8606 = vmatprep.subr.bf16.mxu0 %v5410_v55  ;;  %v5476_v6 = vld [vmem:[#allocation3 + $0x358] sm:$0xff] }
 0x437   :  { %8628 = vmatprep.subr.bf16.mxu1 %v5458_v56  ;;  %v6143_v59 = vpop.f32.mrb[8].mxu0  ;;  %v5524_v55 = vld [vmem:[#allocation3 + $0x4d8] sm:$0xff]  ;;  %v5503_v56 = vld [vmem:[#allocation3 + $0x430] sm:$0xff] }
 0x438   :  { %v6184_v60 = vpop.f32.mrb[16].mxu1  ;;  %v6144_v0 = vadd.f32 %v6143_v59, %v10720_v63  ;;  %v6145_v1 = vpop.f32.mrb[9].mxu0  ;;  %v5464_v63 = vld [vmem:[#allocation3 + $0x2f8] sm:$0xff]  ;;  %v5554_v59 = vld [vmem:[#allocation3 + $0x5c8] sm:$0xff] }
 0x439   :  { %v6186_v4 = vpop.f32.mrb[17].mxu1  ;;  %v6146_v8 = vadd.f32 %v6145_v1, %v10722_v12  ;;  %v6147_v13 = vpop.f32.mrb[10].mxu0  ;;  %8607 = vmatpush3.bf16.msra.mxu0 %v5386_v57  ;;  %v5392_v12 = vld [vmem:[#allocation3 + $0xb8] sm:$0xff]  ;;  %v5551_v57 = vld [vmem:[#allocation3 + $0x5b0] sm:$0xff]  ;;  %v5485_v1 = vld [vmem:[#allocation3 + $0x3a0] sm:$0xff] }
 0x43a   :  { %8629 = vmatpush3.bf16.msra.mxu1 %v5434_v58  ;;  %v6188_v49 = vpop.f32.mrb[18].mxu1  ;;  %v10730_v52 = vadd.f32 %v6184_v60, %v6144_v0  ;;  %v6148_v25 = vpop.f32.mrb[11].mxu0  ;;  %8608 = vmatprep.subr.bf16.mxu0 %v5413_v61  ;;  %v5506_v58 = vld [vmem:[#allocation3 + $0x448] sm:$0xff]  ;;  %v5557_v0 = vld [vmem:[#allocation3 + $0x5e0] sm:$0xff]  ;;  %v5560_v13 = vld [vmem:[#allocation3 + $0x5f8] sm:$0xff] }
 0x43b   :  { %8630 = vmatprep.subr.bf16.mxu1 %v5461_v48  ;;  %v6189_v28 = vpop.f32.mrb[19].mxu1  ;;  %v10732_v30 = vadd.f32 %v6186_v4, %v6146_v8  ;;  %v5482_v60 = vld [vmem:[#allocation3 + $0x388] sm:$0xff]  ;;  %v5509_v48 = vld [vmem:[#allocation3 + $0x460] sm:$0xff]  ;;  %v5512_v8 = vld [vmem:[#allocation3 + $0x478] sm:$0xff] }
 0x43c   :  { %v5530_v61 = vld [vmem:[#allocation3 + $0x508] sm:$0xff]  ;;  %v5533_v4 = vld [vmem:[#allocation3 + $0x520] sm:$0xff]  ;;  %v5488_v49 = vld [vmem:[#allocation3 + $0x3b8] sm:$0xff] }
 0x43d   :  { %8609 = vmatpush3.bf16.msra.mxu0 %v5389_v26  ;;  %v5536_v25 = vld [vmem:[#allocation3 + $0x538] sm:$0xff]  ;;  %v5587_v26 = vld [vmem:[#allocation3 + $0x6d0] sm:$0xff] }
 0x43e   :  { %8631 = vmatpush3.bf16.msra.mxu1 %v5437_v27  ;;  %8610 = vmatprep.subr.bf16.mxu0 %v5416_v31  ;;  %v5635_v27 = vld [vmem:[#allocation3 + $0x850] sm:$0xff] }
 0x43f   :  { %8632 = vmatprep.subr.bf16.mxu1 %v5464_v63  ;;  %v5563_v28 = vld [vmem:[#allocation3 + $0x610] sm:$0xff]  ;;  %v5590_v63 = vld [vmem:[#allocation3 + $0x6e8] sm:$0xff] }
 0x440   :  { %v5611_v31 = vld [vmem:[#allocation3 + $0x790] sm:$0xff] }
 0x441   :  { %8611 = vmatpush3.bf16.msra.mxu0 %v5392_v12  ;;  %v5638_v12 = vld [vmem:[#allocation3 + $0x868] sm:$0xff] }
 0x442   :  { %8633 = vmatpush3.bf16.msra.mxu1 %v5440_v32  ;;  %8640 = vmatprep.subr.bf16.mxu0 %v5491_v33  ;;  %v5566_v32 = vld [vmem:[#allocation3 + $0x628] sm:$0xff] }
 0x443   :  { %8662 = vmatprep.subr.bf16.mxu1 %v5539_v36  ;;  %v5614_v33 = vld [vmem:[#allocation3 + $0x7a8] sm:$0xff]  ;;  %v5593_v36 = vld [vmem:[#allocation3 + $0x700] sm:$0xff] }
 0x444   :  { %6470 = vmatmul.mubr.bf16.vlgmr.msra.gmra.mrb[24].mxu0 %v10644_v62  ;;  %v5521_v62 = vld [vmem:[#allocation3 + $0x4c0] sm:$0xff] }
 0x445   :  { %6510 = vmatmul.mubr.bf16.vlgmr.msra.gmra.mrb[32].mxu1 %v10648_v5  ;;  %8641 = vmatpush3.bf16.msra.mxu0 %v5467_v37  ;;  %v5548_v5 = vld [vmem:[#allocation3 + $0x598] sm:$0xff]  ;;  %v5641_v37 = vld [vmem:[#allocation3 + $0x880] sm:$0xff] }
 0x446   :  { %8663 = vmatpush3.bf16.msra.mxu1 %v5515_v43  ;;  %8642 = vmatprep.subr.bf16.mxu0 %v5494_v45  ;;  %v5569_v43 = vld [vmem:[#allocation3 + $0x640] sm:$0xff]  ;;  %v5596_v45 = vld [vmem:[#allocation3 + $0x718] sm:$0xff] }
 0x447   :  { %8664 = vmatprep.subr.bf16.mxu1 %v5542_v46  ;;  %6549 = vmatprep.mubr.bf16.mxu0 %v10654_v9  ;;  %v5479_v9 = vld [vmem:[#allocation3 + $0x370] sm:$0xff]  ;;  %v5572_v46 = vld [vmem:[#allocation3 + $0x658] sm:$0xff] }
 0x448   :  { %6589 = vmatprep.mubr.bf16.mxu1 %v10660_v14  ;;  %v5527_v14 = vld [vmem:[#allocation3 + $0x4f0] sm:$0xff] }
 0x449   :  { %8643 = vmatpush3.bf16.msra.mxu0 %v5470_v47  ;;  %v5620_v47 = vld [vmem:[#allocation3 + $0x7d8] sm:$0xff] }
 0x44a   :  { %8665 = vmatpush3.bf16.msra.mxu1 %v5518_v50  ;;  %8644 = vmatprep.subr.bf16.mxu0 %v5497_v51  ;;  %v5599_v50 = vld [vmem:[#allocation3 + $0x730] sm:$0xff] }
 0x44b   :  { %8666 = vmatprep.subr.bf16.mxu1 %v5545_v53  ;;  %v5647_v51 = vld [vmem:[#allocation3 + $0x8b0] sm:$0xff]  ;;  %v5602_v53 = vld [vmem:[#allocation3 + $0x748] sm:$0xff] }
 0x44d   :  { %8645 = vmatpush3.bf16.msra.mxu0 %v5473_v54  ;;  %v5650_v54 = vld [vmem:[#allocation3 + $0x8c8] sm:$0xff] }
 0x44e   :  { %8667 = vmatpush3.bf16.msra.mxu1 %v5521_v62  ;;  %8646 = vmatprep.subr.bf16.mxu0 %v5500_v3  ;;  %v5578_v62 = vld [vmem:[#allocation3 + $0x688] sm:$0xff] }
 0x44f   :  { %8668 = vmatprep.subr.bf16.mxu1 %v5548_v5  ;;  %v5626_v3 = vld [vmem:[#allocation3 + $0x808] sm:$0xff] }
 0x451   :  { %8647 = vmatpush3.bf16.msra.mxu0 %v5476_v6 }
 0x452   :  { %8669 = vmatpush3.bf16.msra.mxu1 %v5524_v55  ;;  %8648 = vmatprep.subr.bf16.mxu0 %v5503_v56  ;;  %v5605_v55 = vld [vmem:[#allocation3 + $0x760] sm:$0xff] }
 0x453   :  { %8670 = vmatprep.subr.bf16.mxu1 %v5551_v57  ;;  %v5653_v56 = vld [vmem:[#allocation3 + $0x8e0] sm:$0xff] }
 0x455   :  { %8649 = vmatpush3.bf16.msra.mxu0 %v5479_v9 }
 0x456   :  { %8671 = vmatpush3.bf16.msra.mxu1 %v5527_v14  ;;  %8650 = vmatprep.subr.bf16.mxu0 %v5506_v58 }
 0x457   :  { %8672 = vmatprep.subr.bf16.mxu1 %v5554_v59 }
 0x459   :  { %8651 = vmatpush3.bf16.msra.mxu0 %v5482_v60 }
 0x45a   :  { %8673 = vmatpush3.bf16.msra.mxu1 %v5530_v61  ;;  %8652 = vmatprep.subr.bf16.mxu0 %v5509_v48 }
 0x45b   :  { %8674 = vmatprep.subr.bf16.mxu1 %v5557_v0  ;;  %v5581_v0 = vld [vmem:[#allocation3 + $0x6a0] sm:$0xff] }
 0x45d   :  { %8653 = vmatpush3.bf16.msra.mxu0 %v5485_v1  ;;  %v5629_v1 = vld [vmem:[#allocation3 + $0x820] sm:$0xff] }
 0x45e   :  { %8675 = vmatpush3.bf16.msra.mxu1 %v5533_v4  ;;  %8654 = vmatprep.subr.bf16.mxu0 %v5512_v8 }
 0x45f   :  { %8676 = vmatprep.subr.bf16.mxu1 %v5560_v13  ;;  %v5608_v13 = vld [vmem:[#allocation3 + $0x778] sm:$0xff] }
 0x461   :  { %8655 = vmatpush3.bf16.msra.mxu0 %v5488_v49  ;;  %v5632_v49 = vld [vmem:[#allocation3 + $0x838] sm:$0xff] }
 0x462   :  { %8677 = vmatpush3.bf16.msra.mxu1 %v5536_v25  ;;  %8684 = vmatprep.subr.bf16.mxu0 %v5587_v26  ;;  %v5683_v25 = vld [vmem:[#allocation3 + $0x9d0] sm:$0xff] }
 0x463   :  { %8706 = vmatprep.subr.bf16.mxu1 %v5635_v27  ;;  %v5731_v26 = vld [vmem:[#allocation3 + $0xb50] sm:$0xff] }
 0x464   :  { %6550 = vmatmul.mubr.bf16.vlgmr.msra.gmra.mrb[28].mxu0 %v10652_v7  ;;  %v5617_v7 = vld [vmem:[#allocation3 + $0x7c0] sm:$0xff]  ;;  %v5659_v27 = vld [vmem:[#allocation3 + $0x910] sm:$0xff] }
 0x465   :  { %6590 = vmatmul.mubr.bf16.vlgmr.msra.gmra.mrb[36].mxu1 %v10656_v10  ;;  %8685 = vmatpush3.bf16.msra.mxu0 %v5563_v28  ;;  %v5644_v10 = vld [vmem:[#allocation3 + $0x898] sm:$0xff]  ;;  %v5707_v28 = vld [vmem:[#allocation3 + $0xa90] sm:$0xff] }
 0x466   :  { %8707 = vmatpush3.bf16.msra.mxu1 %v5611_v31  ;;  %8686 = vmatprep.subr.bf16.mxu0 %v5590_v63  ;;  %v5686_v31 = vld [vmem:[#allocation3 + $0x9e8] sm:$0xff] }
 0x467   :  { %8708 = vmatprep.subr.bf16.mxu1 %v5638_v12  ;;  %6629 = vmatprep.mubr.bf16.mxu0 %v10662_v15  ;;  %v5575_v15 = vld [vmem:[#allocation3 + $0x670] sm:$0xff]  ;;  %v5734_v63 = vld [vmem:[#allocation3 + $0xb68] sm:$0xff] }
 0x468   :  { %6669 = vmatprep.mubr.bf16.mxu1 %v10666_v17  ;;  %v5623_v17 = vld [vmem:[#allocation3 + $0x7f0] sm:$0xff]  ;;  %v5662_v12 = vld [vmem:[#allocation3 + $0x928] sm:$0xff] }
 0x469   :  { %8687 = vmatpush3.bf16.msra.mxu0 %v5566_v32  ;;  %v5710_v32 = vld [vmem:[#allocation3 + $0xaa8] sm:$0xff] }
 0x46a   :  { %8709 = vmatpush3.bf16.msra.mxu1 %v5614_v33  ;;  %8688 = vmatprep.subr.bf16.mxu0 %v5593_v36  ;;  %v5689_v33 = vld [vmem:[#allocation3 + $0xa00] sm:$0xff] }
 0x46b   :  { %8710 = vmatprep.subr.bf16.mxu1 %v5641_v37  ;;  %v5737_v36 = vld [vmem:[#allocation3 + $0xb80] sm:$0xff] }
 0x46c   :  { %v5665_v37 = vld [vmem:[#allocation3 + $0x940] sm:$0xff] }
 0x46d   :  { %8689 = vmatpush3.bf16.msra.mxu0 %v5569_v43  ;;  %v5692_v43 = vld [vmem:[#allocation3 + $0xa18] sm:$0xff] }
 0x46e   :  { %8711 = vmatpush3.bf16.msra.mxu1 %v5617_v7  ;;  %8690 = vmatprep.subr.bf16.mxu0 %v5596_v45  ;;  %v5668_v7 = vld [vmem:[#allocation3 + $0x958] sm:$0xff] }
 0x46f   :  { %8712 = vmatprep.subr.bf16.mxu1 %v5644_v10  ;;  %v5716_v45 = vld [vmem:[#allocation3 + $0xad8] sm:$0xff]  ;;  %v5695_v10 = vld [vmem:[#allocation3 + $0xa30] sm:$0xff] }
 0x471   :  { %8691 = vmatpush3.bf16.msra.mxu0 %v5572_v46  ;;  %v5743_v46 = vld [vmem:[#allocation3 + $0xbb0] sm:$0xff] }
 0x472   :  { %8713 = vmatpush3.bf16.msra.mxu1 %v5620_v47  ;;  %8692 = vmatprep.subr.bf16.mxu0 %v5599_v50  ;;  %v5698_v47 = vld [vmem:[#allocation3 + $0xa48] sm:$0xff] }
 0x473   :  { %8714 = vmatprep.subr.bf16.mxu1 %v5647_v51  ;;  %v5746_v50 = vld [vmem:[#allocation3 + $0xbc8] sm:$0xff] }
 0x474   :  { %v5674_v51 = vld [vmem:[#allocation3 + $0x988] sm:$0xff] }
 0x475   :  { %8693 = vmatpush3.bf16.msra.mxu0 %v5575_v15  ;;  %v5722_v15 = vld [vmem:[#allocation3 + $0xb08] sm:$0xff] }
 0x476   :  { %8715 = vmatpush3.bf16.msra.mxu1 %v5623_v17  ;;  %8694 = vmatprep.subr.bf16.mxu0 %v5602_v53  ;;  %v5701_v17 = vld [vmem:[#allocation3 + $0xa60] sm:$0xff] }
 0x477   :  { %8716 = vmatprep.subr.bf16.mxu1 %v5650_v54  ;;  %v6225_v5 = vpop.f32.mrb[12].mxu0  ;;  %v5749_v53 = vld [vmem:[#allocation3 + $0xbe0] sm:$0xff] }
 0x478   :  { %v6266_v6 = vpop.f32.mrb[20].mxu1  ;;  %v6226_v57 = vadd.f32 %v6225_v5, %v10730_v52  ;;  %v6227_v9 = vpop.f32.mrb[13].mxu0  ;;  %v5656_v52 = vld [vmem:[#allocation3 + $0x8f8] sm:$0xff]  ;;  %v5677_v54 = vld [vmem:[#allocation3 + $0x9a0] sm:$0xff] }
 0x479   :  { %v6268_v14 = vpop.f32.mrb[21].mxu1  ;;  %v6228_v58 = vadd.f32 %v6227_v9, %v10732_v30  ;;  %v6229_v59 = vpop.f32.mrb[14].mxu0  ;;  %8695 = vmatpush3.bf16.msra.mxu0 %v5578_v62  ;;  %v5584_v30 = vld [vmem:[#allocation3 + $0x6b8] sm:$0xff]  ;;  %v5725_v62 = vld [vmem:[#allocation3 + $0xb20] sm:$0xff]  ;;  %v5755_v9 = vld [vmem:[#allocation3 + $0xc10] sm:$0xff] }
 0x47a   :  { %8717 = vmatpush3.bf16.msra.mxu1 %v5626_v3  ;;  %v6270_v60 = vpop.f32.mrb[22].mxu1  ;;  %v10744_v61 = vadd.f32 %v6266_v6, %v6226_v57  ;;  %v6230_v48 = vpop.f32.mrb[15].mxu0  ;;  %8696 = vmatprep.subr.bf16.mxu0 %v5605_v55  ;;  %v5704_v3 = vld [vmem:[#allocation3 + $0xa78] sm:$0xff]  ;;  %v5827_v57 = vld [vmem:[#allocation3 + $0xe50] sm:$0xff]  ;;  %v5830_v59 = vld [vmem:[#allocation3 + $0xe68] sm:$0xff] }
 0x47b   :  { %8718 = vmatprep.subr.bf16.mxu1 %v5653_v56  ;;  %v6271_v4 = vpop.f32.mrb[23].mxu1  ;;  %v10746_v8 = vadd.f32 %v6268_v14, %v6228_v58  ;;  %v5752_v5 = vld [vmem:[#allocation3 + $0xbf8] sm:$0xff]  ;;  %v5779_v56 = vld [vmem:[#allocation3 + $0xcd0] sm:$0xff]  ;;  %v5782_v58 = vld [vmem:[#allocation3 + $0xce8] sm:$0xff] }
 0x47c   :  { %v5680_v6 = vld [vmem:[#allocation3 + $0x9b8] sm:$0xff]  ;;  %v5803_v14 = vld [vmem:[#allocation3 + $0xd90] sm:$0xff]  ;;  %v5758_v60 = vld [vmem:[#allocation3 + $0xc28] sm:$0xff] }
 0x47d   :  { %8697 = vmatpush3.bf16.msra.mxu0 %v5581_v0  ;;  %v5728_v55 = vld [vmem:[#allocation3 + $0xb38] sm:$0xff]  ;;  %v5806_v48 = vld [vmem:[#allocation3 + $0xda8] sm:$0xff]  ;;  %v5785_v0 = vld [vmem:[#allocation3 + $0xd00] sm:$0xff] }
 0x47e   :  { %8719 = vmatpush3.bf16.msra.mxu1 %v5629_v1  ;;  %8698 = vmatprep.subr.bf16.mxu0 %v5608_v13  ;;  %v5833_v1 = vld [vmem:[#allocation3 + $0xe80] sm:$0xff]  ;;  %v5788_v13 = vld [vmem:[#allocation3 + $0xd18] sm:$0xff] }
 0x47f   :  { %8720 = vmatprep.subr.bf16.mxu1 %v5656_v52  ;;  %v5761_v4 = vld [vmem:[#allocation3 + $0xc40] sm:$0xff]  ;;  %v5764_v52 = vld [vmem:[#allocation3 + $0xc58] sm:$0xff] }
 0x481   :  { %8699 = vmatpush3.bf16.msra.mxu0 %v5584_v30  ;;  %v5812_v30 = vld [vmem:[#allocation3 + $0xdd8] sm:$0xff] }
 0x482   :  { %8721 = vmatpush3.bf16.msra.mxu1 %v5632_v49  ;;  %8728 = vmatprep.subr.bf16.mxu0 %v5683_v25  ;;  %v5791_v49 = vld [vmem:[#allocation3 + $0xd30] sm:$0xff] }
 0x483   :  { %8750 = vmatprep.subr.bf16.mxu1 %v5731_v26  ;;  %v5839_v25 = vld [vmem:[#allocation3 + $0xeb0] sm:$0xff]  ;;  %v5794_v26 = vld [vmem:[#allocation3 + $0xd48] sm:$0xff] }
 0x484   :  { %6630 = vmatmul.mubr.bf16.vlgmr.msra.gmra.mrb[32].mxu0 %v10658_v11  ;;  %v5713_v11 = vld [vmem:[#allocation3 + $0xac0] sm:$0xff] }
 0x485   :  { %6670 = vmatmul.mubr.bf16.vlgmr.msra.gmra.mrb[40].mxu1 %v10664_v16  ;;  %8729 = vmatpush3.bf16.msra.mxu0 %v5659_v27  ;;  %v5740_v16 = vld [vmem:[#allocation3 + $0xb98] sm:$0xff]  ;;  %v5842_v27 = vld [vmem:[#allocation3 + $0xec8] sm:$0xff] }
 0x486   :  { %8751 = vmatpush3.bf16.msra.mxu1 %v5707_v28  ;;  %8730 = vmatprep.subr.bf16.mxu0 %v5686_v31  ;;  %v5770_v28 = vld [vmem:[#allocation3 + $0xc88] sm:$0xff] }
 0x487   :  { %8752 = vmatprep.subr.bf16.mxu1 %v5734_v63  ;;  %6709 = vmatprep.mubr.bf16.mxu0 %v10670_v19  ;;  %v5671_v19 = vld [vmem:[#allocation3 + $0x970] sm:$0xff]  ;;  %v5818_v31 = vld [vmem:[#allocation3 + $0xe08] sm:$0xff] }
 0x488   :  { %6749 = vmatprep.mubr.bf16.mxu1 %v10674_v24  ;;  %v5719_v24 = vld [vmem:[#allocation3 + $0xaf0] sm:$0xff] }
 0x489   :  { %8731 = vmatpush3.bf16.msra.mxu0 %v5662_v12 }
 0x48a   :  { %8753 = vmatpush3.bf16.msra.mxu1 %v5710_v32  ;;  %8732 = vmatprep.subr.bf16.mxu0 %v5689_v33  ;;  %v5797_v32 = vld [vmem:[#allocation3 + $0xd60] sm:$0xff] }
 0x48b   :  { %8754 = vmatprep.subr.bf16.mxu1 %v5737_v36  ;;  %v5845_v33 = vld [vmem:[#allocation3 + $0xee0] sm:$0xff] }
 0x48d   :  { %8733 = vmatpush3.bf16.msra.mxu0 %v5665_v37 }
 0x48e   :  { %8755 = vmatpush3.bf16.msra.mxu1 %v5713_v11  ;;  %8734 = vmatprep.subr.bf16.mxu0 %v5692_v43 }
 0x48f   :  { %8756 = vmatprep.subr.bf16.mxu1 %v5740_v16 }
 0x491   :  { %8735 = vmatpush3.bf16.msra.mxu0 %v5668_v7 }
 0x492   :  { %8757 = vmatpush3.bf16.msra.mxu1 %v5716_v45  ;;  %8736 = vmatprep.subr.bf16.mxu0 %v5695_v10 }
 0x493   :  { %8758 = vmatprep.subr.bf16.mxu1 %v5743_v46  ;;  %v5773_v46 = vld [vmem:[#allocation3 + $0xca0] sm:$0xff] }
 0x495   :  { %8737 = vmatpush3.bf16.msra.mxu0 %v5671_v19  ;;  %v5821_v19 = vld [vmem:[#allocation3 + $0xe20] sm:$0xff] }
 0x496   :  { %8759 = vmatpush3.bf16.msra.mxu1 %v5719_v24  ;;  %8738 = vmatprep.subr.bf16.mxu0 %v5698_v47 }
 0x497   :  { %8760 = vmatprep.subr.bf16.mxu1 %v5746_v50  ;;  %v5800_v50 = vld [vmem:[#allocation3 + $0xd78] sm:$0xff] }
 0x499   :  { %8739 = vmatpush3.bf16.msra.mxu0 %v5674_v51  ;;  %v5824_v51 = vld [vmem:[#allocation3 + $0xe38] sm:$0xff] }
 0x49a   :  { %8761 = vmatpush3.bf16.msra.mxu1 %v5722_v15  ;;  %8740 = vmatprep.subr.bf16.mxu0 %v5701_v17  ;;  %v5875_v15 = vld [vmem:[#allocation3 + $0xfd0] sm:$0xff] }
 0x49b   :  { %8762 = vmatprep.subr.bf16.mxu1 %v5749_v53  ;;  %v5923_v17 = vld [vmem:[#allocation3 + $0x1150] sm:$0xff] }
 0x49c   :  { %v5851_v53 = vld [vmem:[#allocation3 + $0xf10] sm:$0xff] }
 0x49d   :  { %8741 = vmatpush3.bf16.msra.mxu0 %v5677_v54  ;;  %v5899_v54 = vld [vmem:[#allocation3 + $0x1090] sm:$0xff] }
 0x49e   :  { %8763 = vmatpush3.bf16.msra.mxu1 %v5725_v62  ;;  %8742 = vmatprep.subr.bf16.mxu0 %v5704_v3  ;;  %v5878_v62 = vld [vmem:[#allocation3 + $0xfe8] sm:$0xff] }
 0x49f   :  { %8764 = vmatprep.subr.bf16.mxu1 %v5752_v5  ;;  %v5926_v3 = vld [vmem:[#allocation3 + $0x1168] sm:$0xff] }
 0x4a0   :  { %v5854_v5 = vld [vmem:[#allocation3 + $0xf28] sm:$0xff] }
 0x4a1   :  { %8743 = vmatpush3.bf16.msra.mxu0 %v5680_v6  ;;  %v5902_v6 = vld [vmem:[#allocation3 + $0x10a8] sm:$0xff] }
 0x4a2   :  { %8765 = vmatpush3.bf16.msra.mxu1 %v5728_v55  ;;  %8772 = vmatprep.subr.bf16.mxu0 %v5779_v56  ;;  %v5881_v55 = vld [vmem:[#allocation3 + $0x1000] sm:$0xff] }
 0x4a3   :  { %8794 = vmatprep.subr.bf16.mxu1 %v5827_v57  ;;  %v5929_v56 = vld [vmem:[#allocation3 + $0x1180] sm:$0xff] }
 0x4a4   :  { %6710 = vmatmul.mubr.bf16.vlgmr.msra.gmra.mrb[36].mxu0 %v10668_v18  ;;  %v5809_v18 = vld [vmem:[#allocation3 + $0xdc0] sm:$0xff] }
 0x4a5   :  { %6750 = vmatmul.mubr.bf16.vlgmr.msra.gmra.mrb[44].mxu1 %v10672_v23  ;;  %8773 = vmatpush3.bf16.msra.mxu0 %v5755_v9  ;;  %v5836_v23 = vld [vmem:[#allocation3 + $0xe98] sm:$0xff]  ;;  %v5857_v57 = vld [vmem:[#allocation3 + $0xf40] sm:$0xff] }
 0x4a6   :  { %8795 = vmatpush3.bf16.msra.mxu1 %v5803_v14  ;;  %8774 = vmatprep.subr.bf16.mxu0 %v5782_v58  ;;  %v5884_v9 = vld [vmem:[#allocation3 + $0x1018] sm:$0xff] }
 0x4a7   :  { %8796 = vmatprep.subr.bf16.mxu1 %v5830_v59  ;;  %6789 = vmatprep.mubr.bf16.mxu0 %v10680_v38  ;;  %v5767_v38 = vld [vmem:[#allocation3 + $0xc70] sm:$0xff]  ;;  %v5860_v14 = vld [vmem:[#allocation3 + $0xf58] sm:$0xff] }
 0x4a8   :  { %6829 = vmatprep.mubr.bf16.mxu1 %v10688_v39  ;;  %v5815_v39 = vld [vmem:[#allocation3 + $0xdf0] sm:$0xff]  ;;  %v5908_v58 = vld [vmem:[#allocation3 + $0x10d8] sm:$0xff] }
 0x4a9   :  { %8775 = vmatpush3.bf16.msra.mxu0 %v5758_v60  ;;  %v5887_v59 = vld [vmem:[#allocation3 + $0x1030] sm:$0xff] }
 0x4aa   :  { %8797 = vmatpush3.bf16.msra.mxu1 %v5806_v48  ;;  %8776 = vmatprep.subr.bf16.mxu0 %v5785_v0  ;;  %v5935_v60 = vld [vmem:[#allocation3 + $0x11b0] sm:$0xff]  ;;  %v5890_v48 = vld [vmem:[#allocation3 + $0x1048] sm:$0xff] }
 0x4ab   :  { %8798 = vmatprep.subr.bf16.mxu1 %v5833_v1  ;;  %v5938_v0 = vld [vmem:[#allocation3 + $0x11c8] sm:$0xff] }
 0x4ac   :  { %v5866_v1 = vld [vmem:[#allocation3 + $0xf88] sm:$0xff] }
 0x4ad   :  { %8777 = vmatpush3.bf16.msra.mxu0 %v5761_v4  ;;  %v5914_v4 = vld [vmem:[#allocation3 + $0x1108] sm:$0xff] }
 0x4ae   :  { %8799 = vmatpush3.bf16.msra.mxu1 %v5809_v18  ;;  %8778 = vmatprep.subr.bf16.mxu0 %v5788_v13  ;;  %v5893_v18 = vld [vmem:[#allocation3 + $0x1060] sm:$0xff] }
 0x4af   :  { %8800 = vmatprep.subr.bf16.mxu1 %v5836_v23  ;;  %v5941_v13 = vld [vmem:[#allocation3 + $0x11e0] sm:$0xff] }
 0x4b0   :  { %v5869_v23 = vld [vmem:[#allocation3 + $0xfa0] sm:$0xff] }
 0x4b1   :  { %8779 = vmatpush3.bf16.msra.mxu0 %v5764_v52  ;;  %v5917_v52 = vld [vmem:[#allocation3 + $0x1120] sm:$0xff] }
 0x4b2   :  { %8801 = vmatpush3.bf16.msra.mxu1 %v5812_v30  ;;  %8780 = vmatprep.subr.bf16.mxu0 %v5791_v49  ;;  %v5896_v30 = vld [vmem:[#allocation3 + $0x1078] sm:$0xff] }
 0x4b3   :  { %8802 = vmatprep.subr.bf16.mxu1 %v5839_v25  ;;  %v5944_v49 = vld [vmem:[#allocation3 + $0x11f8] sm:$0xff] }
 0x4b4   :  { %v5872_v25 = vld [vmem:[#allocation3 + $0xfb8] sm:$0xff] }
 0x4b5   :  { %8781 = vmatpush3.bf16.msra.mxu0 %v5767_v38  ;;  %v5920_v38 = vld [vmem:[#allocation3 + $0x1138] sm:$0xff] }
 0x4b6   :  { %8803 = vmatpush3.bf16.msra.mxu1 %v5815_v39  ;;  %8782 = vmatprep.subr.bf16.mxu0 %v5794_v26  ;;  %v8463_v39 = vcombine.high %v10561_v21, %v10561_v21  ;;  %v8462_v26 = vcombine.low %v10561_v21, %v10561_v21 }
 0x4b7   :  { %8804 = vmatprep.subr.bf16.mxu1 %v5842_v27  ;;  %v6307_v63 = vpop.f32.mrb[16].mxu0  ;;  %v8464_v27 = vcombine.low %v10566_v22, %v10566_v22 }
 0x4b8   :  { %v6348_v12 = vpop.f32.mrb[24].mxu1  ;;  %v6308_v36 = vadd.f32 %v6307_v63, %v10744_v61  ;;  %v6309_v37 = vpop.f32.mrb[17].mxu0  ;;  %v5848_v61 = vld [vmem:[#allocation3 + $0xef8] sm:$0xff] }
 0x4b9   :  { %v6350_v11 = vpop.f32.mrb[25].mxu1  ;;  %v6310_v43 = vadd.f32 %v6309_v37, %v10746_v8  ;;  %v6311_v16 = vpop.f32.mrb[18].mxu0  ;;  %8783 = vmatpush3.bf16.msra.mxu0 %v5770_v28  ;;  %v5776_v8 = vld [vmem:[#allocation3 + $0xcb8] sm:$0xff]  ;;  %v6931_v28 = vsel %vm6929_vm3, %v8462_v26, 0  ;;  %v6937_v63 = vsel %vm6929_vm3, %v8464_v27, 0 }
 0x4ba   :  { %8805 = vmatpush3.bf16.msra.mxu1 %v5818_v31  ;;  %v6352_v7 = vpop.f32.mrb[26].mxu1  ;;  %v10758_v45 = vadd.f32 %v6348_v12, %v6308_v36  ;;  %v6312_v10 = vpop.f32.mrb[19].mxu0  ;;  %8784 = vmatprep.subr.bf16.mxu0 %v5797_v32  ;;  %v9244_v31 = vmov 0.0  }
 0x4bb   :  { %8806 = vmatprep.subr.bf16.mxu1 %v5845_v33  ;;  %v6353_v24 = vpop.f32.mrb[27].mxu1  ;;  %v10760_v47 = vadd.f32 %v6350_v11, %v6310_v43  ;;  %v9034_v7 = vld [vmem:[%s11217_s7 + $0x4] ss:$12 sps:$4 sm:$0xff]  }
 0x4bc   :  { %v9035_v10 = vld [vmem:[%s11217_s7 + $0x18] ss:$12 sps:$4 sm:$0xff]  }
 0x4bd   :  { %8785 = vmatpush3.bf16.msra.mxu0 %v5773_v46  ;;  %v9040_v46 = vld [vmem:[%s11217_s7 + $0x34] ss:$12 sps:$4 sm:$0xff]   ;;  %v9043_v24 = vld [vmem:[%s11217_s7 + $0x4c] ss:$12 sps:$4 sm:$0xff]  }
 0x4be   :  { %8807 = vmatpush3.bf16.msra.mxu1 %v5821_v19  ;;  %8786 = vmatprep.subr.bf16.mxu0 %v5800_v50  ;;  %v9038_v19 = vld [vmem:[%s11217_s7 + $0x30] ss:$12 sps:$4 sm:$0xff]  }
 0x4bf   :  { %8808 = vmatprep.subr.bf16.mxu1 %v5848_v61 }
 0x4c1   :  { %8787 = vmatpush3.bf16.msra.mxu0 %v5776_v8 }
 0x4c2   :  { %8809 = vmatpush3.bf16.msra.mxu1 %v5824_v51  ;;  %8816 = vmatprep.subr.bf16.mxu0 %v5875_v15  ;;  %v9046_v15 = vld [vmem:[%s11217_s7 + $0x64] ss:$12 sps:$4 sm:$0xff]  }
 0x4c3   :  { %8838 = vmatprep.subr.bf16.mxu1 %v5923_v17 }
 0x4c4   :  { %6790 = vmatmul.mubr.bf16.vlgmr.msra.gmra.mrb[40].mxu0 %v10676_v34  ;;  %v5905_v34 = vld [vmem:[#allocation3 + $0x10c0] sm:$0xff] }
 0x4c5   :  { %6830 = vmatmul.mubr.bf16.vlgmr.msra.gmra.mrb[48].mxu1 %v10682_v40  ;;  %8817 = vmatpush3.bf16.msra.mxu0 %v5851_v53  ;;  %v5932_v40 = vld [vmem:[#allocation3 + $0x1198] sm:$0xff] }
 0x4c6   :  { %8839 = vmatpush3.bf16.msra.mxu1 %v5899_v54  ;;  %8818 = vmatprep.subr.bf16.mxu0 %v5878_v62 }
 0x4c7   :  { %8840 = vmatprep.subr.bf16.mxu1 %v5926_v3  ;;  %6869 = vmatprep.mubr.bf16.mxu0 %v10684_v41  ;;  %v5863_v41 = vld [vmem:[#allocation3 + $0xf70] sm:$0xff] }
 0x4c8   :  { %6909 = vmatprep.mubr.bf16.mxu1 %v10690_v44  ;;  %v5911_v44 = vld [vmem:[#allocation3 + $0x10f0] sm:$0xff] }
 0x4c9   :  { %8819 = vmatpush3.bf16.msra.mxu0 %v5854_v5  ;;  %v9044_v3 = vld [vmem:[%s11217_s7 + $0x60] ss:$12 sps:$4 sm:$0xff]  }
 0x4ca   :  { %8841 = vmatpush3.bf16.msra.mxu1 %v5902_v6  ;;  %8820 = vmatprep.subr.bf16.mxu0 %v5881_v55 }
 0x4cb   :  { %8842 = vmatprep.subr.bf16.mxu1 %v5929_v56  ;;  %v9049_v56 = vld [vmem:[%s11217_s7 + $0x7c] ss:$12 sps:$4 sm:$0xff]  }
 0x4cd   :  { %8821 = vmatpush3.bf16.msra.mxu0 %v5857_v57  ;;  %v9047_v57 = vld [vmem:[%s11217_s7 + $0x78] ss:$12 sps:$4 sm:$0xff]  }
 0x4ce   :  { %8843 = vmatpush3.bf16.msra.mxu1 %v5905_v34  ;;  %8822 = vmatprep.subr.bf16.mxu0 %v5884_v9  ;;  %v9052_v34 = vld [vmem:[%s11217_s7 + $0x94] ss:$12 sps:$4 sm:$0xff]   ;;  %v9050_v9 = vld [vmem:[%s11217_s7 + $0x90] ss:$12 sps:$4 sm:$0xff]  }
 0x4cf   :  { %8844 = vmatprep.subr.bf16.mxu1 %v5932_v40  ;;  %v9059_v40 = vld [vmem:[%s11217_s7 + $0xc8] ss:$12 sps:$4 sm:$0xff]  }
 0x4d1   :  { %8823 = vmatpush3.bf16.msra.mxu0 %v5860_v14  ;;  %v9060_v14 = vld [vmem:[%s11217_s7 + $0x8] ss:$12 sps:$4 sm:$0xff]  }
 0x4d2   :  { %8845 = vmatpush3.bf16.msra.mxu1 %v5908_v58  ;;  %8824 = vmatprep.subr.bf16.mxu0 %v5887_v59  ;;  %v9055_v58 = vld [vmem:[%s11217_s7 + $0xac] ss:$12 sps:$4 sm:$0xff]  }
 0x4d3   :  { %8846 = vmatprep.subr.bf16.mxu1 %v5935_v60  ;;  %v9064_v59 = vld [vmem:[%s11217_s7 + $0xe0] ss:$12 sps:$4 sm:$0xff]  }
 0x4d4   :  { %v9065_v60 = vld [vmem:[%s11217_s7 + $0x20] ss:$12 sps:$4 sm:$0xff]  }
 0x4d5   :  { %8825 = vmatpush3.bf16.msra.mxu0 %v5863_v41  ;;  %v9053_v41 = vld [vmem:[%s11217_s7 + $0xa8] ss:$12 sps:$4 sm:$0xff]  }
 0x4d6   :  { %8847 = vmatpush3.bf16.msra.mxu1 %v5911_v44  ;;  %8826 = vmatprep.subr.bf16.mxu0 %v5890_v48  ;;  %v9069_v44 = vld [vmem:[%s11217_s7 + $0xf8] ss:$12 sps:$4 sm:$0xff]  }
 0x4d7   :  { %8848 = vmatprep.subr.bf16.mxu1 %v5938_v0  ;;  %v9058_v48 = vld [vmem:[%s11217_s7 + $0xc4] ss:$12 sps:$4 sm:$0xff]  }
 0x4d8   :  { %v9070_v0 = vld [vmem:[%s11217_s7 + $0x38] ss:$12 sps:$4 sm:$0xff]  }
 0x4d9   :  { %8827 = vmatpush3.bf16.msra.mxu0 %v5866_v1  ;;  %v9056_v1 = vld [vmem:[%s11217_s7 + $0xc0] ss:$12 sps:$4 sm:$0xff]  }
 0x4da   :  { %8849 = vmatpush3.bf16.msra.mxu1 %v5914_v4  ;;  %8828 = vmatprep.subr.bf16.mxu0 %v5893_v18  ;;  %v9074_v4 = vld [vmem:[%s11217_s7 + $0x110] ss:$12 sps:$4 sm:$0xff]  }
 0x4db   :  { %8850 = vmatprep.subr.bf16.mxu1 %v5941_v13  ;;  %v9063_v18 = vld [vmem:[%s11217_s7 + $0xdc] ss:$12 sps:$4 sm:$0xff]   ;;  %v9061_v13 = vld [vmem:[%s11217_s7 + $0xd8] ss:$12 sps:$4 sm:$0xff]  }
 0x4dd   :  { %8829 = vmatpush3.bf16.msra.mxu0 %v5869_v23  ;;  %v9068_v23 = vld [vmem:[%s11217_s7 + $0xf4] ss:$12 sps:$4 sm:$0xff]  }
 0x4de   :  { %8851 = vmatpush3.bf16.msra.mxu1 %v5917_v52  ;;  %8830 = vmatprep.subr.bf16.mxu0 %v5896_v30  ;;  %v9066_v52 = vld [vmem:[%s11217_s7 + $0xf0] ss:$12 sps:$4 sm:$0xff]   ;;  %v9073_v30 = vld [vmem:[%s11217_s7 + $0x10c] ss:$12 sps:$4 sm:$0xff]  }
 0x4df   :  { %8852 = vmatprep.subr.bf16.mxu1 %v5944_v49  ;;  %v9071_v49 = vld [vmem:[%s11217_s7 + $0x108] ss:$12 sps:$4 sm:$0xff]  }
 0x4e1   :  { %8831 = vmatpush3.bf16.msra.mxu0 %v5872_v25  ;;  %v9075_v25 = vld [vmem:[%s11217_s7 + $0x50] ss:$12 sps:$4 sm:$0xff]  }
 0x4e2   :  { %8853 = vmatpush3.bf16.msra.mxu1 %v5920_v38  ;;  %8465 = vmatprep.subr.msk.bf16.mxu0 %vm6929_vm3, %v8463_v39 }
 0x4e3   :  { %8934 = vmatprep.subr.bf16.mxu1 %v9244_v31 }
 0x4e4   :  { %6870 = vmatmul.mubr.bf16.vlgmr.msra.gmra.mrb[44].mxu0 %v10678_v35 }
 0x4e5   :  { %6910 = vmatmul.mubr.bf16.vlgmr.msra.gmra.mrb[52].mxu1 %v10686_v42  ;;  %6940 = vmatpush1.bf16.msra.mxu0 %v6931_v28  ;;  %v9078_v28 = vld [vmem:[%s11217_s7 + $0x124] ss:$12 sps:$4 sm:$0xff]  }
 0x4e6   :  { %8935 = vmatpush3.bf16.msra.mxu1 %v6937_v63  ;;  %6971 = vmatprep.mubr.bf16.mxu0 %v9241_v2  ;;  %v9079_v63 = vld [vmem:[%s11217_s7 + $0x128] ss:$12 sps:$4 sm:$0xff]  }
 0x4e7   :  { %8936 = vmatprep.mubr.msk.bf16.mxu1 %vm9245_vm4, %v9244_v31  ;;  %7407 = vmatprep.subr.bf16.mxu0 %v9034_v7  ;;  %v9084_v7 = vld [vmem:[%s11217_s7 + $0x140] ss:$12 sps:$4 sm:$0xff]  }
 0x4e8   :  { %8862 = vmatprep.subr.bf16.mxu1 %v9059_v40 }
 0x4ec   :  { %8466 = vmatmul.mubr.msk.bf16.vlgmr.msra.gmra.mrb[48].mxu0 %vm6925_vm5, %v10556_v20 }
 0x4ed   :  { %8937 = vmatmul.mubr.msk.bf16.vlgmr.msra.gmra.mrb[56].mxu1 %vm6925_vm5, %v10556_v20  ;;  %v9032_v20 = vld [vmem:[%s11217_s7] ss:$12 sps:$4 sm:$0xff]  }
 0x4ee   :  { %7408 = vmatpush1.bf16.msra.mxu0 %v9032_v20  ;;  %8863 = vmatpush3.bf16.msra.mxu1 %v9060_v14  ;;  %v9083_v20 = vld [vmem:[%s11217_s7 + $0x13c] ss:$12 sps:$4 sm:$0xff]  }
 0x4ef   :  { %8864 = vmatprep.subr.bf16.mxu1 %v9064_v59 }
 0x4f2   :  { %8865 = vmatpush3.bf16.msra.mxu1 %v9065_v60 }
 0x4f3   :  { %8866 = vmatprep.subr.bf16.mxu1 %v9069_v44 }
 0x4f6   :  { %8867 = vmatpush3.bf16.msra.mxu1 %v9070_v0 }
 0x4f7   :  { %v6389_v21 = vpop.f32.mrb[20].mxu0  ;;  %8868 = vmatprep.subr.bf16.mxu1 %v9074_v4 }
 0x4f8   :  { %v6430_v22 = vpop.f32.mrb[28].mxu1  ;;  %v6390_v12 = vadd.f32 %v6389_v21, %v10758_v45  ;;  %v6391_v35 = vpop.f32.mrb[21].mxu0  ;;  %v9037_v45 = vld [vmem:[%s11217_s7 + $0x1c] ss:$12 sps:$4 sm:$0xff]  }
 0x4f9   :  { %v6432_v32 = vpop.f32.mrb[29].mxu1  ;;  %v6392_v42 = vadd.f32 %v6391_v35, %v10760_v47  ;;  %v6393_v33 = vpop.f32.mrb[22].mxu0  ;;  %7409 = vmatprep.subr.bf16.mxu0 %v9037_v45  ;;  %v9041_v47 = vld [vmem:[%s11217_s7 + $0x48] ss:$12 sps:$4 sm:$0xff]  }
 0x4fa   :  { %v6434_v36 = vpop.f32.mrb[30].mxu1  ;;  %v10782_v37 = vadd.f32 %v6430_v22, %v6390_v12  ;;  %v6394_v11 = vpop.f32.mrb[23].mxu0  ;;  %7410 = vmatpush1.bf16.msra.mxu0 %v9035_v10  ;;  %8869 = vmatpush3.bf16.msra.mxu1 %v9075_v25  ;;  %v9085_v10 = vld [vmem:[%s11217_s7 + $0x80] ss:$12 sps:$4 sm:$0xff]  }
 0x4fb   :  { %v6435_v43 = vpop.f32.mrb[31].mxu1  ;;  %v10784_v16 = vadd.f32 %v6432_v32, %v6392_v42  ;;  %7411 = vmatprep.subr.bf16.mxu0 %v9040_v46  ;;  %v9076_v32 = vld [vmem:[%s11217_s7 + $0x120] ss:$12 sps:$4 sm:$0xff]   ;;  %v9080_v42 = vld [vmem:[%s11217_s7 + $0x68] ss:$12 sps:$4 sm:$0xff]   ;;  %8870 = vmatprep.subr.bf16.mxu1 %v9079_v63 }
 0x4fc   :  { %v9081_v43 = vld [vmem:[%s11217_s7 + $0x138] ss:$12 sps:$4 sm:$0xff]   ;;  %v9088_v46 = vld [vmem:[%s11217_s7 + $0x154] ss:$12 sps:$4 sm:$0xff]  }
 0x4fe   :  { %7412 = vmatpush1.bf16.msra.mxu0 %v9038_v19  ;;  %8871 = vmatpush3.bf16.msra.mxu1 %v9080_v42  ;;  %v9089_v19 = vld [vmem:[%s11217_s7 + $0x158] ss:$12 sps:$4 sm:$0xff]  }
 0x4ff   :  { %7413 = vmatprep.subr.bf16.mxu0 %v9043_v24  ;;  %8872 = vmatprep.subr.bf16.mxu1 %v9084_v7  ;;  %v9086_v24 = vld [vmem:[%s11217_s7 + $0x150] ss:$12 sps:$4 sm:$0xff]   ;;  %v10940_v7 = vsub.s32 0, %v10568_v29 }
 0x502   :  { %7414 = vmatpush1.bf16.msra.mxu0 %v9041_v47  ;;  %8873 = vmatpush3.bf16.msra.mxu1 %v9085_v10  ;;  %v9090_v47 = vld [vmem:[%s11217_s7 + $0x98] ss:$12 sps:$4 sm:$0xff]   ;;  %v7020_v10 = vld [vmem:[%s11216_s6] sm:$0x7] }
 0x503   :  { %7415 = vmatprep.subr.bf16.mxu0 %v9046_v15  ;;  %8874 = vmatprep.subr.bf16.mxu1 %v9089_v19  ;;  %v10934_v15 = vld [vmem:[%s11217_s7 + $0x180] sm:$0x11] }
 0x506   :  { %7416 = vmatpush1.bf16.msra.mxu0 %v9044_v3  ;;  %8875 = vmatpush3.bf16.msra.mxu1 %v9090_v47 }
 0x507   :  { %7417 = vmatprep.subr.bf16.mxu0 %v9049_v56 }
 0x50a   :  { %7418 = vmatpush1.bf16.msra.mxu0 %v9047_v57 }
 0x50b   :  { %7419 = vmatprep.subr.bf16.mxu0 %v9052_v34 }
 0x50e   :  { %7420 = vmatpush1.bf16.msra.mxu0 %v9050_v9 }
 0x50f   :  { %7421 = vmatprep.subr.bf16.mxu0 %v9055_v58 }
 0x512   :  { %7422 = vmatpush1.bf16.msra.mxu0 %v9053_v41 }
 0x513   :  { %7423 = vmatprep.subr.bf16.mxu0 %v9058_v48 }
 0x516   :  { %7424 = vmatpush1.bf16.msra.mxu0 %v9056_v1 }
 0x517   :  { %v8612_v50 = vpop.f32.mrb[24].mxu0  ;;  %7425 = vmatprep.subr.bf16.mxu0 %v9063_v18 }
 0x518   :  { %v8634_v61 = vpop.f32.mrb[32].mxu1  ;;  %v8613_v8 = vpop.f32.mrb[25].mxu0 }
 0x519   :  { %v8635_v51 = vpop.f32.mrb[33].mxu1  ;;  %v8614_v17 = vadd.f32 %v8613_v8, %v8612_v50  ;;  %v8615_v54 = vpop.f32.mrb[26].mxu0  ;;  %v9093_v50 = vld [vmem:[%s11217_s7 + $0x16c] ss:$12 sps:$4 sm:$0xff]   ;;  %v9091_v8 = vld [vmem:[%s11217_s7 + $0x168] ss:$12 sps:$4 sm:$0xff]  }
 0x51a   :  { %v8636_v53 = vadd.f32 %v8635_v51, %v8634_v61  ;;  %v8637_v62 = vpop.f32.mrb[34].mxu1  ;;  %v8616_v5 = vpop.f32.mrb[27].mxu0  ;;  %7426 = vmatpush1.bf16.msra.mxu0 %v9061_v13  ;;  %v9094_v61 = vld [vmem:[%s11217_s7 + $0x170] ss:$12 sps:$4 sm:$0xff]  }
 0x51b   :  { %v8638_v6 = vpop.f32.mrb[35].mxu1  ;;  %7427 = vmatprep.subr.bf16.mxu0 %v9068_v23  ;;  %v9095_v51 = vld [vmem:[%s11217_s7 + $0xb0] ss:$12 sps:$4 sm:$0xff]   ;;  %8876 = vmatprep.subr.bf16.mxu1 %v9094_v61 }
 0x51c   :  { %v6512_v55 = vadd.f32 %v8636_v53, %v8614_v17  ;;  %8877 = vmatpush3.bf16.msra.mxu1 %v9095_v51  ;;  %v8517_v17 = vcombine.high %v10934_v15, %v10934_v15 }
 0x51d   :  { %8940 = vmatprep.subr.bf16.mxu1 %v9244_v31 }
 0x51e   :  { %7428 = vmatpush1.bf16.msra.mxu0 %v9066_v52 }
 0x51f   :  { %7429 = vmatprep.subr.bf16.mxu0 %v9073_v30 }
 0x522   :  { %7430 = vmatpush1.bf16.msra.mxu0 %v9071_v49 }
 0x523   :  { %7431 = vmatprep.subr.bf16.mxu0 %v9078_v28 }
 0x526   :  { %7432 = vmatpush1.bf16.msra.mxu0 %v9076_v32 }
 0x527   :  { %7433 = vmatprep.subr.bf16.mxu0 %v9083_v20 }
 0x52a   :  { %7434 = vmatpush1.bf16.msra.mxu0 %v9081_v43 }
 0x52b   :  { %7435 = vmatprep.subr.bf16.mxu0 %v9088_v46  ;;  %v10946_v46 = vsub.s32 1, %v10568_v29 }
 0x52d   :  { %v7029_v61 = vrot.slane %v7020_v10, %v10946_v46 }
 0x52e   :  { %7436 = vmatpush1.bf16.msra.mxu0 %v9086_v24  ;;  %v7025_v24 = vrot.slane %v7020_v10, %v10940_v7 }
 0x52f   :  { %7437 = vmatprep.subr.bf16.mxu0 %v9093_v50 }
 0x532   :  { %7438 = vmatpush1.bf16.msra.mxu0 %v9091_v8 }
 0x533   :  { %8519 = vmatprep.subr.msk.bf16.mxu0 %vm7397_vm6, %v8517_v17  ;;  %v10952_v17 = vsub.s32 2, %v10568_v29  ;;  %v9098_v29 = vld [vmem:[%s11217_s7 + $0x188] ss:$0 sps:$4 sm:$0x11]  }
 0x537   :  { %v8656_v38 = vpop.f32.mrb[28].mxu0 }
 0x538   :  { %v8678_v39 = vpop.f32.mrb[36].mxu1  ;;  %v8657_v26 = vpop.f32.mrb[29].mxu0 }
 0x539   :  { %v8679_v27 = vpop.f32.mrb[37].mxu1  ;;  %v8658_v21 = vadd.f32 %v8657_v26, %v8656_v38  ;;  %v8659_v22 = vpop.f32.mrb[30].mxu0 }
 0x53a   :  { %v8680_v12 = vadd.f32 %v8679_v27, %v8678_v39  ;;  %v8681_v35 = vpop.f32.mrb[38].mxu1  ;;  %v8660_v33 = vpop.f32.mrb[31].mxu0 }
 0x53b   :  { %v8682_v36 = vpop.f32.mrb[39].mxu1  ;;  %v6552_v11 = vadd.f32 %v8658_v21, %v6512_v55 }
 0x53d   :  { %v6592_v45 = vadd.f32 %v8680_v12, %v6552_v11 }
 0x557   :  { %v8700_v53 = vpop.f32.mrb[32].mxu0 }
 0x558   :  { %v8722_v54 = vpop.f32.mrb[40].mxu1  ;;  %v8701_v62 = vpop.f32.mrb[33].mxu0 }
 0x559   :  { %v8723_v3 = vpop.f32.mrb[41].mxu1  ;;  %v8702_v5 = vadd.f32 %v8701_v62, %v8700_v53  ;;  %v8703_v6 = vpop.f32.mrb[34].mxu0 }
 0x55a   :  { %v8724_v55 = vadd.f32 %v8723_v3, %v8722_v54  ;;  %v8725_v56 = vpop.f32.mrb[42].mxu1  ;;  %v8704_v57 = vpop.f32.mrb[35].mxu0 }
 0x55b   :  { %v8726_v34 = vpop.f32.mrb[43].mxu1  ;;  %v6632_v9 = vadd.f32 %v8702_v5, %v6592_v45 }
 0x55d   :  { %v6672_v40 = vadd.f32 %v8724_v55, %v6632_v9  ;;  %v7033_v9 = vrot.slane %v7020_v10, %v10952_v17  ;;  %v9138_v10 = vld [vmem:[%s11219_s9 + $0x108] ss:$12 sps:$4 sm:$0xff]  }
 0x577   :  { %v8744_v14 = vpop.f32.mrb[36].mxu0 }
 0x578   :  { %v8766_v58 = vpop.f32.mrb[44].mxu1  ;;  %v8745_v59 = vpop.f32.mrb[37].mxu0 }
 0x579   :  { %v8767_v60 = vpop.f32.mrb[45].mxu1  ;;  %v8746_v41 = vadd.f32 %v8745_v59, %v8744_v14  ;;  %v8747_v44 = vpop.f32.mrb[38].mxu0 }
 0x57a   :  { %v8768_v48 = vadd.f32 %v8767_v60, %v8766_v58  ;;  %v8769_v0 = vpop.f32.mrb[46].mxu1  ;;  %v8748_v1 = vpop.f32.mrb[39].mxu0  ;;  %v7405_v60 = vsel %vm7397_vm6, %v9098_v29, 0 }
 0x57b   :  { %v8770_v4 = vpop.f32.mrb[47].mxu1  ;;  %v6712_v18 = vadd.f32 %v8746_v41, %v6672_v40  ;;  %v9101_v41 = vld [vmem:[%s11219_s9 + $0x4] ss:$12 sps:$4 sm:$0xff]   ;;  %v9104_v1 = vld [vmem:[%s11219_s9 + $0x1c] ss:$12 sps:$4 sm:$0xff]  }
 0x57c   :  { %v9102_v4 = vld [vmem:[%s11219_s9 + $0x18] ss:$12 sps:$4 sm:$0xff]  }
 0x57d   :  { %v6752_v13 = vadd.f32 %v8768_v48, %v6712_v18  ;;  %v9099_v48 = vld [vmem:[%s11219_s9] ss:$12 sps:$4 sm:$0xff]   ;;  %v9127_v18 = vld [vmem:[%s11219_s9 + $0x8] ss:$12 sps:$4 sm:$0xff]  }
 0x597   :  { %v8788_v23 = vpop.f32.mrb[40].mxu0 }
 0x598   :  { %v8810_v52 = vpop.f32.mrb[48].mxu1  ;;  %v8789_v30 = vpop.f32.mrb[41].mxu0 }
 0x599   :  { %v8811_v49 = vpop.f32.mrb[49].mxu1  ;;  %v8790_v25 = vadd.f32 %v8789_v30, %v8788_v23  ;;  %v8791_v38 = vpop.f32.mrb[42].mxu0  ;;  %v9131_v23 = vld [vmem:[%s11219_s9 + $0xe0] ss:$12 sps:$4 sm:$0xff]  }
 0x59a   :  { %v8812_v39 = vadd.f32 %v8811_v49, %v8810_v52  ;;  %v8813_v26 = vpop.f32.mrb[50].mxu1  ;;  %v8792_v27 = vpop.f32.mrb[43].mxu0  ;;  %v9105_v52 = vld [vmem:[%s11219_s9 + $0x30] ss:$12 sps:$4 sm:$0xff]   ;;  %v9132_v30 = vld [vmem:[%s11219_s9 + $0x20] ss:$12 sps:$4 sm:$0xff]  }
 0x59b   :  { %v8814_v28 = vpop.f32.mrb[51].mxu1  ;;  %v6792_v63 = vadd.f32 %v8790_v25, %v6752_v13  ;;  %v9107_v13 = vld [vmem:[%s11219_s9 + $0x34] ss:$12 sps:$4 sm:$0xff]   ;;  %v9110_v49 = vld [vmem:[%s11219_s9 + $0x4c] ss:$12 sps:$4 sm:$0xff]  }
 0x59c   :  { %v9136_v25 = vld [vmem:[%s11219_s9 + $0xf8] ss:$12 sps:$4 sm:$0xff]   ;;  %v9108_v38 = vld [vmem:[%s11219_s9 + $0x48] ss:$12 sps:$4 sm:$0xff]   ;;  %v9111_v27 = vld [vmem:[%s11219_s9 + $0x60] ss:$12 sps:$4 sm:$0xff]  }
 0x59d   :  { %v6832_v21 = vadd.f32 %v8812_v39, %v6792_v63  ;;  %v9137_v39 = vld [vmem:[%s11219_s9 + $0x38] ss:$12 sps:$4 sm:$0xff]   ;;  %v9116_v28 = vld [vmem:[%s11219_s9 + $0x7c] ss:$12 sps:$4 sm:$0xff]  }
 0x59e   :  { %v9113_v26 = vld [vmem:[%s11219_s9 + $0x64] ss:$12 sps:$4 sm:$0xff]  }
 0x59f   :  { %v9114_v63 = vld [vmem:[%s11219_s9 + $0x78] ss:$12 sps:$4 sm:$0xff]  }
 0x5b7   :  { %v8832_v22 = vpop.f32.mrb[44].mxu0 }
 0x5b8   :  { %v8854_v12 = vpop.f32.mrb[52].mxu1  ;;  %v8833_v35 = vpop.f32.mrb[45].mxu0 }
 0x5b9   :  { %v8855_v32 = vpop.f32.mrb[53].mxu1  ;;  %v8834_v42 = vadd.f32 %v8833_v35, %v8832_v22  ;;  %v8835_v33 = vpop.f32.mrb[46].mxu0  ;;  %v9117_v22 = vld [vmem:[%s11219_s9 + $0x90] ss:$12 sps:$4 sm:$0xff]   ;;  %v9120_v35 = vld [vmem:[%s11219_s9 + $0xa8] ss:$12 sps:$4 sm:$0xff]  }
 0x5ba   :  { %v8856_v36 = vadd.f32 %v8855_v32, %v8854_v12  ;;  %v8857_v11 = vpop.f32.mrb[54].mxu1  ;;  %v8836_v43 = vpop.f32.mrb[47].mxu0  ;;  %v9122_v12 = vld [vmem:[%s11219_s9 + $0xac] ss:$12 sps:$4 sm:$0xff]   ;;  %v9125_v32 = vld [vmem:[%s11219_s9 + $0xc4] ss:$12 sps:$4 sm:$0xff]  }
 0x5bb   :  { %v8858_v20 = vpop.f32.mrb[55].mxu1  ;;  %v6872_v45 = vadd.f32 %v8834_v42, %v6832_v21  ;;  %v9119_v21 = vld [vmem:[%s11219_s9 + $0x94] ss:$12 sps:$4 sm:$0xff]   ;;  %v9130_v33 = vld [vmem:[%s11219_s9 + $0xdc] ss:$12 sps:$4 sm:$0xff]  }
 0x5bc   :  { %v9123_v42 = vld [vmem:[%s11219_s9 + $0xc0] ss:$12 sps:$4 sm:$0xff]   ;;  %v9133_v43 = vld [vmem:[%s11219_s9 + $0xf0] ss:$12 sps:$4 sm:$0xff]  }
 0x5bd   :  { %v6912_v19 = vadd.f32 %v8856_v36, %v6872_v45  ;;  %v9128_v36 = vld [vmem:[%s11219_s9 + $0xd8] ss:$12 sps:$4 sm:$0xff]   ;;  %v9135_v11 = vld [vmem:[%s11219_s9 + $0xf4] ss:$12 sps:$4 sm:$0xff]   ;;  %v9141_v45 = vld [vmem:[%s11219_s9 + $0x110] ss:$12 sps:$4 sm:$0xff]  }
 0x5be   :  { %v9140_v20 = vld [vmem:[%s11219_s9 + $0x10c] ss:$12 sps:$4 sm:$0xff]  }
 0x5bf   :  { %v6973_v47 = vpop.f32.mrb[48].mxu0 }
 0x5c0   :  { %v7014_v50 = vpop.f32.mrb[56].mxu1  ;;  %v6974_v8 = vadd.f32 %v6973_v47, %v10782_v37  ;;  %v6975_v53 = vpop.f32.mrb[49].mxu0  ;;  %v8516_v37 = vcombine.low %v10934_v15, %v10934_v15  ;;  %v9126_v15 = vld [vmem:[%s11219_s9 + $0xc8] ss:$12 sps:$4 sm:$0xff]   ;;  %v9145_v47 = vld [vmem:[%s11219_s9 + $0x124] ss:$12 sps:$4 sm:$0xff]  }
 0x5c1   :  { %v7015_v51 = vadd.f32 %v7014_v50, %v6912_v19  ;;  %v8938_v54 = vpop.f32.mrb[57].mxu1  ;;  %v6976_v62 = vadd.f32 %v6975_v53, %v10784_v16  ;;  %v6977_v3 = vpop.f32.mrb[50].mxu0  ;;  %v9142_v19 = vld [vmem:[%s11219_s9 + $0x50] ss:$12 sps:$4 sm:$0xff]   ;;  %v9146_v50 = vld [vmem:[%s11219_s9 + $0x128] ss:$12 sps:$4 sm:$0xff]  }
 0x5c2   :  { %v7017_v5 = vpop.f32.mrb[58].mxu1  ;;  %v7037_v6 = vadd.f32 %v7025_v24, %v6974_v8  ;;  %v6978_v55 = vpop.f32.mrb[51].mxu0  ;;  %v7399_v59 = vsel %vm7397_vm6, %v8516_v37, 0  ;;  %v9143_v24 = vld [vmem:[%s11219_s9 + $0x120] ss:$12 sps:$4 sm:$0xff]  }
 0x5c3   :  { %v8939_v56 = vpop.f32.mrb[59].mxu1  ;;  %v7038_v57 = vadd.f32 %v7029_v61, %v6976_v62  ;;  %v7039_v16 = vadd.f32 %v7033_v9, %v7015_v51  ;;  %v9147_v61 = vld [vmem:[%s11219_s9 + $0x68] ss:$12 sps:$4 sm:$0xff]   ;;  %v9151_v51 = vld [vmem:[%s11219_s9 + $0x140] ss:$12 sps:$4 sm:$0xff]  }
 0x5c4   :  { %v7040_v34 = vmax.f32 %v7037_v6, 0.0  ;;  %v9150_v8 = vld [vmem:[%s11219_s9 + $0x13c] ss:$12 sps:$4 sm:$0xff]   ;;  %v9148_v53 = vld [vmem:[%s11219_s9 + $0x138] ss:$12 sps:$4 sm:$0xff]  }
 0x5c5   :  { %v7041_v40 = vmax.f32 %v7038_v57, 0.0  ;;  %v7042_v44 = vmax.f32 %v7039_v16, 0.0  ;;  %v9152_v54 = vld [vmem:[%s11219_s9 + $0x80] ss:$12 sps:$4 sm:$0xff]   ;;  %v9156_v3 = vld [vmem:[%s11219_s9 + $0x158] ss:$12 sps:$4 sm:$0xff]  }
 0x5c6   :  { %v7043_v58 = vpack.c.bf16 %v7040_v34, %v7040_v34  ;;  %v9155_v62 = vld [vmem:[%s11219_s9 + $0x154] ss:$12 sps:$4 sm:$0xff]   ;;  %v9153_v5 = vld [vmem:[%s11219_s9 + $0x150] ss:$12 sps:$4 sm:$0xff]   ;;  %v9157_v6 = vld [vmem:[%s11219_s9 + $0x98] ss:$12 sps:$4 sm:$0xff]  }
 0x5c7   :  { %v7044_v14 = vpack.c.bf16 %v7041_v40, %v7041_v40  ;;  %v7045_v0 = vpack.c.bf16 %v7042_v44, %v7042_v44  ;;  %v9160_v55 = vld [vmem:[%s11219_s9 + $0x16c] ss:$12 sps:$4 sm:$0xff]   ;;  %v9161_v56 = vld [vmem:[%s11219_s9 + $0x170] ss:$12 sps:$4 sm:$0xff]   ;;  %v9158_v57 = vld [vmem:[%s11219_s9 + $0x168] ss:$12 sps:$4 sm:$0xff]  }
 0x5c8   :  { %v9162_v34 = vld [vmem:[%s11219_s9 + $0xb0] ss:$12 sps:$4 sm:$0xff]   ;;  %v7639_v9 = vld [vmem:[%s11219_s9 + $0x180] sm:$0x11] }
 0x5c9   :  { %7439 = vmatprep.mubr.bf16.mxu0 %v7044_v14  ;;  %7521 = vmatprep.mubr.bf16.mxu1 %v7044_v14  ;;  %v8571_v37 = vcombine.high %v7639_v9, %v7639_v9  ;;  %v7112_v40 = vld [vmem:[%s11218_s8] sm:$0x7] }
 0x5ca   :  { %7440 = vmatmul.mubr.bf16.vlgmr.msra.gmra.mrb[52].mxu0 %v7043_v58  ;;  %7522 = vmatmul.mubr.bf16.vlgmr.msra.gmra.mrb[60].mxu1 %v7043_v58 }
 0x5cb   :  { %7449 = vmatpush1.bf16.msra.mxu0 %v7399_v59  ;;  %8941 = vmatpush3.bf16.msra.mxu1 %v7405_v60  ;;  %v7125_v60 = vrot.slane %v7112_v40, %v10952_v17 }
 0x5cc   :  { %8942 = vmatprep.mubr.msk.bf16.mxu1 %vm9245_vm4, %v9244_v31  ;;  %7480 = vmatprep.mubr.bf16.mxu0 %v9241_v2 }
 0x5cd   :  { %7934 = vmatprep.subr.bf16.mxu1 %v9101_v41  ;;  %8886 = vmatprep.subr.bf16.mxu0 %v9126_v15 }
 0x5d2   :  { %8943 = vmatmul.mubr.msk.bf16.vlgmr.msra.gmra.mrb[64].mxu1 %vm7393_vm7, %v7045_v0 }
 0x5d3   :  { %7935 = vmatpush1.bf16.msra.mxu1 %v9099_v48 }
 0x5d4   :  { %7936 = vmatprep.subr.bf16.mxu1 %v9104_v1 }
 0x5d6   :  { %8520 = vmatmul.mubr.msk.bf16.vlgmr.msra.gmra.mrb[52].mxu0 %vm7393_vm7, %v7045_v0  ;;  %v7117_v0 = vrot.slane %v7112_v40, %v10940_v7 }
 0x5d7   :  { %7937 = vmatpush1.bf16.msra.mxu1 %v9102_v4  ;;  %8887 = vmatpush3.bf16.msra.mxu0 %v9127_v18  ;;  %v7121_v4 = vrot.slane %v7112_v40, %v10946_v46 }
 0x5d8   :  { %7938 = vmatprep.subr.bf16.mxu1 %v9107_v13  ;;  %8888 = vmatprep.subr.bf16.mxu0 %v9131_v23 }
 0x5db   :  { %7939 = vmatpush1.bf16.msra.mxu1 %v9105_v52  ;;  %8889 = vmatpush3.bf16.msra.mxu0 %v9132_v30 }
 0x5dc   :  { %7940 = vmatprep.subr.bf16.mxu1 %v9110_v49  ;;  %8890 = vmatprep.subr.bf16.mxu0 %v9136_v25 }
 0x5df   :  { %7941 = vmatpush1.bf16.msra.mxu1 %v9108_v38  ;;  %8891 = vmatpush3.bf16.msra.mxu0 %v9137_v39  ;;  %v8570_v39 = vcombine.low %v7639_v9, %v7639_v9 }
 0x5e0   :  { %7942 = vmatprep.subr.bf16.mxu1 %v9113_v26  ;;  %8892 = vmatprep.subr.bf16.mxu0 %v9141_v45  ;;  %v9165_v26 = vld [vmem:[%s11219_s9 + $0x188] ss:$0 sps:$4 sm:$0x11]   ;;  %v9174_v45 = vld [vmem:[%s11221_s11 + $0x60] sm:$0xff]  }
 0x5e3   :  { %7943 = vmatpush1.bf16.msra.mxu1 %v9111_v27  ;;  %8893 = vmatpush3.bf16.msra.mxu0 %v9142_v19  ;;  %v9177_v19 = vld [vmem:[%s11221_s11 + $0x28] sm:$0xff]  }
 0x5e4   :  { %7944 = vmatprep.subr.bf16.mxu1 %v9116_v28  ;;  %8894 = vmatprep.subr.bf16.mxu0 %v9146_v50  ;;  %v9179_v50 = vld [vmem:[%s11221_s11 + $0x70] sm:$0xff]  }
 0x5e7   :  { %7945 = vmatpush1.bf16.msra.mxu1 %v9114_v63  ;;  %8895 = vmatpush3.bf16.msra.mxu0 %v9147_v61  ;;  %v9180_v61 = vld [vmem:[%s11221_s11 + $0x30] sm:$0xff]  }
 0x5e8   :  { %7946 = vmatprep.subr.bf16.mxu1 %v9119_v21  ;;  %8896 = vmatprep.subr.bf16.mxu0 %v9151_v51  ;;  %v7926_v21 = vsel %vm7397_vm6, %v8570_v39, 0  ;;  %v9182_v51 = vld [vmem:[%s11221_s11 + $0x38] sm:$0xff]  }
 0x5eb   :  { %7947 = vmatpush1.bf16.msra.mxu1 %v9117_v22  ;;  %8897 = vmatpush3.bf16.msra.mxu0 %v9152_v54  ;;  %v7932_v22 = vsel %vm7397_vm6, %v9165_v26, 0  ;;  %v7641_v54 = vld [vmem:[%s11220_s10] sm:$0x7] }
 0x5ec   :  { %7948 = vmatprep.subr.bf16.mxu1 %v9122_v12  ;;  %8898 = vmatprep.subr.bf16.mxu0 %v9156_v3  ;;  %v9166_v12 = vld [vmem:[%s11221_s11 + $0x40] sm:$0xff]   ;;  %v7650_v40 = vrot.slane %v7641_v54, %v10946_v46 }
 0x5ef   :  { %7949 = vmatpush1.bf16.msra.mxu1 %v9120_v35  ;;  %8899 = vmatpush3.bf16.msra.mxu0 %v9157_v6 }
 0x5f0   :  { %7950 = vmatprep.subr.bf16.mxu1 %v9125_v32  ;;  %8900 = vmatprep.subr.bf16.mxu0 %v9161_v56  ;;  %v9167_v32 = vld [vmem:[%s11221_s11] sm:$0xff]  }
 0x5f3   :  { %7951 = vmatpush1.bf16.msra.mxu1 %v9123_v42  ;;  %8901 = vmatpush3.bf16.msra.mxu0 %v9162_v34 }
 0x5f4   :  { %7952 = vmatprep.subr.bf16.mxu1 %v9130_v33  ;;  %8946 = vmatprep.subr.bf16.mxu0 %v9244_v31  ;;  %v9168_v33 = vld [vmem:[%s11221_s11 + $0x48] sm:$0xff]  }
 0x5f7   :  { %7953 = vmatpush1.bf16.msra.mxu1 %v9128_v36  ;;  %v9169_v36 = vld [vmem:[%s11221_s11 + $0x8] sm:$0xff]  }
 0x5f8   :  { %7954 = vmatprep.subr.bf16.mxu1 %v9135_v11  ;;  %v9171_v11 = vld [vmem:[%s11221_s11 + $0x10] sm:$0xff]  }
 0x5fb   :  { %7955 = vmatpush1.bf16.msra.mxu1 %v9133_v43  ;;  %v9172_v43 = vld [vmem:[%s11221_s11 + $0x58] sm:$0xff]  }
 0x5fc   :  { %7956 = vmatprep.subr.bf16.mxu1 %v9140_v20  ;;  %v9173_v20 = vld [vmem:[%s11221_s11 + $0x18] sm:$0xff]  }
 0x5ff   :  { %7957 = vmatpush1.bf16.msra.mxu1 %v9138_v10  ;;  %v9176_v10 = vld [vmem:[%s11221_s11 + $0x68] sm:$0xff]  }
 0x600   :  { %7958 = vmatprep.subr.bf16.mxu1 %v9145_v47 }
 0x603   :  { %7959 = vmatpush1.bf16.msra.mxu1 %v9143_v24  ;;  %v9178_v24 = vld [vmem:[%s11221_s11 + $0x80] ss:$0 sps:$4 sm:$0x11]  }
 0x604   :  { %7960 = vmatprep.subr.bf16.mxu1 %v9150_v8  ;;  %v8245_v47 = vsel %vm7397_vm6, %v9178_v24, 0  ;;  %v9181_v8 = vld [vmem:[%s11221_s11 + $0x78] sm:$0xff]  }
 0x607   :  { %7961 = vmatpush1.bf16.msra.mxu1 %v9148_v53 }
 0x608   :  { %7962 = vmatprep.subr.bf16.mxu1 %v9155_v62 }
 0x60b   :  { %7963 = vmatpush1.bf16.msra.mxu1 %v9153_v5 }
 0x60c   :  { %7964 = vmatprep.subr.bf16.mxu1 %v9160_v55  ;;  %v7654_v55 = vrot.slane %v7641_v54, %v10952_v17 }
 0x60f   :  { %7965 = vmatpush1.bf16.msra.mxu1 %v9158_v57 }
 0x610   :  { %8573 = vmatprep.subr.msk.bf16.mxu1 %vm7397_vm6, %v8571_v37  ;;  %v7646_v37 = vrot.slane %v7641_v54, %v10940_v7 }
 0x69d   :  { %v8878_v29 = vpop.f32.mrb[60].mxu1 }
 0x69e   :  { %v8879_v14 = vpop.f32.mrb[61].mxu1 }
 0x69f   :  { %v8880_v58 = vadd.f32 %v8879_v14, %v8878_v29  ;;  %v8881_v16 = vpop.f32.mrb[62].mxu1 }
 0x6a0   :  { %v8882_v59 = vpop.f32.mrb[63].mxu1 }
 0x6a1   :  { %v7524_v41 = vadd.f32 %v8880_v58, %v7125_v60 }
 0x6a5   :  { %v7563_v15 = vpop.f32.mrb[64].mxu1 }
 0x6a6   :  { %v7564_v44 = vadd.f32 %v7563_v15, %v7524_v41  ;;  %v8944_v48 = vpop.f32.mrb[65].mxu1 }
 0x6a7   :  { %v7566_v1 = vpop.f32.mrb[66].mxu1 }
 0x6a8   :  { %v8945_v18 = vpop.f32.mrb[67].mxu1  ;;  %v7571_v35 = vmax.f32 %v7564_v44, 0.0 }
 0x6a9   :  { %v7482_v13 = vpop.f32.mrb[52].mxu0 }
 0x6aa   :  { %v8958_v23 = vadd.f32 %v7482_v13, %v7117_v0  ;;  %v7484_v52 = vpop.f32.mrb[53].mxu0  ;;  %v7574_v42 = vpack.c.bf16 %v7571_v35, %v7571_v35 }
 0x6ab   :  { %v8959_v30 = vadd.f32 %v7484_v52, %v7121_v4  ;;  %v7486_v49 = vpop.f32.mrb[54].mxu0  ;;  %v8576_v52 = vld [vmem:[%s11222_s12] ss:$0 sm:$0xff] }
 0x6ac   :  { %v7569_v25 = vmax.f32 %v8958_v23, 0.0  ;;  %v7487_v38 = vpop.f32.mrb[55].mxu0 }
 0x6ad   :  { %v7570_v27 = vmax.f32 %v8959_v30, 0.0 }
 0x6ae   :  { %v7572_v63 = vpack.c.bf16 %v7569_v25, %v7569_v25 }
 0x6af   :  { %v7573_v28 = vpack.c.bf16 %v7570_v27, %v7570_v27 }
 0x6b1   :  { %7966 = vmatprep.mubr.bf16.mxu1 %v7573_v28  ;;  %8048 = vmatprep.mubr.bf16.mxu0 %v7573_v28 }
 0x6b2   :  { %7967 = vmatmul.mubr.bf16.vlgmr.msra.gmra.mrb[68].mxu1 %v7572_v63  ;;  %8049 = vmatmul.mubr.bf16.vlgmr.msra.gmra.mrb[56].mxu0 %v7572_v63 }
 0x6b3   :  { %7976 = vmatpush1.bf16.msra.mxu1 %v7926_v21  ;;  %8947 = vmatpush3.bf16.msra.mxu0 %v7932_v22 }
 0x6b4   :  { %8948 = vmatprep.mubr.msk.bf16.mxu0 %vm9245_vm4, %v9244_v31  ;;  %8007 = vmatprep.mubr.bf16.mxu1 %v9241_v2  ;;  %v9170_v2 = vld [vmem:[%s11221_s11 + $0x50] sm:$0xff]  }
 0x6b5   :  { %8910 = vmatprep.subr.bf16.mxu0 %v9166_v12  ;;  %8952 = vmatprep.subr.bf16.mxu1 %v9244_v31 }
 0x6ba   :  { %8949 = vmatmul.mubr.msk.bf16.vlgmr.msra.gmra.mrb[60].mxu0 %vm7393_vm7, %v7574_v42 }
 0x6bb   :  { %8911 = vmatpush3.bf16.msra.mxu0 %v9167_v32 }
 0x6bc   :  { %8912 = vmatprep.subr.bf16.mxu0 %v9168_v33 }
 0x6be   :  { %8574 = vmatmul.mubr.msk.bf16.vlgmr.msra.gmra.mrb[68].mxu1 %vm7393_vm7, %v7574_v42 }
 0x6bf   :  { %8913 = vmatpush3.bf16.msra.mxu0 %v9169_v36  ;;  %8954 = vmatprep.mubr.msk.bf16.mxu1 %vm9245_vm4, %v9244_v31  ;;  %v9175_v31 = vld [vmem:[%s11221_s11 + $0x20] sm:$0xff]  }
 0x6c0   :  { %8914 = vmatprep.subr.bf16.mxu0 %v9170_v2  ;;  %8953 = vmatpush3.bf16.msra.mxu1 %v8245_v47 }
 0x6c3   :  { %8915 = vmatpush3.bf16.msra.mxu0 %v9171_v11 }
 0x6c4   :  { %8916 = vmatprep.subr.bf16.mxu0 %v9172_v43 }
 0x6c7   :  { %8917 = vmatpush3.bf16.msra.mxu0 %v9173_v20 }
 0x6c8   :  { %8918 = vmatprep.subr.bf16.mxu0 %v9174_v45 }
 0x6cb   :  { %8919 = vmatpush3.bf16.msra.mxu0 %v9175_v31 }
 0x6cc   :  { %8920 = vmatprep.subr.bf16.mxu0 %v9176_v10 }
 0x6cf   :  { %8921 = vmatpush3.bf16.msra.mxu0 %v9177_v19 }
 0x6d0   :  { %8922 = vmatprep.subr.bf16.mxu0 %v9179_v50 }
 0x6d3   :  { %8923 = vmatpush3.bf16.msra.mxu0 %v9180_v61 }
 0x6d4   :  { %8924 = vmatprep.subr.bf16.mxu0 %v9181_v8 }
 0x6d7   :  { %8925 = vmatpush3.bf16.msra.mxu0 %v9182_v51 }
 0x785   :  { %v8902_v53 = vpop.f32.mrb[56].mxu0 }
 0x786   :  { %v8903_v62 = vpop.f32.mrb[57].mxu0 }
 0x787   :  { %v8904_v3 = vadd.f32 %v8903_v62, %v8902_v53  ;;  %v8905_v5 = vpop.f32.mrb[58].mxu0 }
 0x788   :  { %v8906_v6 = vpop.f32.mrb[59].mxu0 }
 0x789   :  { %v8051_v56 = vadd.f32 %v8904_v3, %v7654_v55 }
 0x78d   :  { %v8090_v57 = vpop.f32.mrb[60].mxu0 }
 0x78e   :  { %v8091_v34 = vadd.f32 %v8090_v57, %v8051_v56  ;;  %v8950_v9 = vpop.f32.mrb[61].mxu0 }
 0x78f   :  { %v8093_v29 = vpop.f32.mrb[62].mxu0 }
 0x790   :  { %v8098_v14 = vmax.f32 %v8091_v34, 0.0  ;;  %v8951_v58 = vpop.f32.mrb[63].mxu0 }
 0x791   :  { %v8009_v16 = vpop.f32.mrb[68].mxu1 }
 0x792   :  { %v8101_v59 = vpack.c.bf16 %v8098_v14, %v8098_v14  ;;  %v8960_v60 = vadd.f32 %v8009_v16, %v7646_v37  ;;  %v8011_v41 = vpop.f32.mrb[69].mxu1 }
 0x793   :  { %v8961_v15 = vadd.f32 %v8011_v41, %v7650_v40  ;;  %v8013_v44 = vpop.f32.mrb[70].mxu1 }
 0x794   :  { %v8096_v48 = vmax.f32 %v8960_v60, 0.0  ;;  %v8014_v0 = vpop.f32.mrb[71].mxu1  ;;  %8955 = vmatmul.mubr.msk.bf16.vlgmr.msra.gmra.mrb[72].mxu1 %vm7393_vm7, %v8101_v59 }
 0x795   :  { %v8097_v17 = vmax.f32 %v8961_v15, 0.0 }
 0x796   :  { %v8099_v4 = vpack.c.bf16 %v8096_v48, %v8096_v48 }
 0x797   :  { %v8100_v1 = vpack.c.bf16 %v8097_v17, %v8097_v17 }
 0x799   :  { %8279 = vmatprep.mubr.bf16.mxu0 %v8100_v1 }
 0x79a   :  { %8280 = vmatmul.mubr.bf16.vlgmr.msra.gmra.mrb[64].mxu0 %v8099_v4 }
 0x867   :  { %v8321_v7 = vpop.f32.mrb[72].mxu1 }
 0x868   :  { %v8956_v18 = vpop.f32.mrb[73].mxu1 }
 0x869   :  { %v8324_v46 = vpop.f32.mrb[74].mxu1 }
 0x86a   :  { %v8957_v13 = vpop.f32.mrb[75].mxu1 }
 0x86d   :  { %v8926_v23 = vpop.f32.mrb[64].mxu0 }
 0x86e   :  { %v8927_v30 = vpop.f32.mrb[65].mxu0 }
 0x86f   :  { %v8928_v49 = vadd.f32 %v8927_v30, %v8926_v23  ;;  %v8929_v25 = vpop.f32.mrb[66].mxu0 }
 0x870   :  { %v8930_v38 = vpop.f32.mrb[67].mxu0 }
 0x871   :  { %v8282_v39 = vadd.f32 %v8928_v49, %v8576_v52 }
 0x873   :  { %v8322_v26 = vadd.f32 %v8321_v7, %v8282_v39 }
 0x875   :  { %8328 = vst.msk [vmem:[#allocation5] sm:$0x3] %vm8327_vm8, %v8322_v26 }
 0x876   :  { %9194 = shalt.err (!%p9191_p6)
}
 0x877   :  { %s9195_s27 = scalar_lea.hbm %s11223_s13, 32 }
 0x878   :  { %p9196_p7 = scmp.ne.s32.totalorder %s11223_s13, %s9195_s27  ;;  %p9199_p8 = scmp.lt.u32.totalorder %s9195_s27, %s11223_s13 }
 0x87a   :  { %p9201_p9 = pnand %p9199_p8, %p9196_p7 }
 0x87c   :  { %9204 = shalt.err (!%p9201_p9)
}
 0x87d   :  { %8338 = dma.vmem_to_hbm [thread:$0]  %s8336_s4, 32, %s11223_s13, [#allocation6]  }
 0x87e   :  { %9223 = dma.done.wait [#allocation6], 32  }
 0x87f   :  { %9224 = vsyncadd [#allocation6], 4294967264 }
 0x880   :  { %8342 = vsyncpa [#allocation6], 1 }
 0x881   :  { %8343 = vsyncmov [#allocation4] }
 0x884   :  { %s8344_s15 = vpop.sfrf %8343 }
 0x885   :  { %p8595_p10 = scmp.ne.s32.totalorder %s8344_s15, 0 }
 0x887   :  { %8348 = shalt.err (%p8595_p10)  }

</bundles_post_ra>
